<compile_context>
chip_gen: v5e
topology: v5e:2x2
jax: 0.10.0
libtpu: 0.0.40
codegen_flags: <defaults>
</compile_context>

<pallas_src>
import functools

import jax
import jax.numpy as jnp
from jax.experimental import pallas as pl
from jax.experimental.pallas import tpu as pltpu


# ------------------------- fused head + CE kernel -----------------------------
def reranker_kernel(ids_ref, mask_ref, tbl_ref, w1_ref, b1_ref, w2_ref, b2_ref,
                    logits_ref, loss_ref, acc_ref, *, n_pairs_total):
    i = pl.program_id(0)
    tb, seq = ids_ref.shape
    vocab, _ = tbl_ref.shape
    half = tb // 2

    @pl.when(i == 0)
    def _init():
        loss_ref[...] = jnp.zeros_like(loss_ref)
        acc_ref[...] = jnp.zeros_like(acc_ref)

    ids = ids_ref[...]                                    # (TB, S) int32
    mask = mask_ref[...]                                  # (TB, S) f32, 1.0 = valid

    # ---- fused embedding gather + masked-sum pooling -------------------------
    # counts[b, v] = sum_s mask[b, s] * [ids[b, s] == v]   (masked histogram)
    # pooled_sum   = counts @ emb_table                    (single MXU matmul)
    vocab_iota = jax.lax.broadcasted_iota(jnp.int32, (tb, vocab), 1)
    counts = jnp.zeros((tb, vocab), jnp.float32)
    for s in range(seq):                                  # S is small and static
        hit = (ids[:, s:s + 1] == vocab_iota).astype(jnp.float32)    # (TB, V)
        counts = counts + mask[:, s:s + 1] * hit

    # masked-mean denominator (guard all-padding rows)
    msum = jnp.maximum(jnp.sum(mask, axis=1, keepdims=True), 1.0)    # (TB, 1)

    # counts are small integers -> exact in bf16; bf16 x bf16 -> f32 MXU path.
    pooled = jnp.dot(counts.astype(tbl_ref.dtype), tbl_ref[...],
                     preferred_element_type=jnp.float32) / msum      # (TB, H) f32

    # ---- pooler: dense(H, H) + tanh (f32 activations, bf16-streamed weight) --
    h = jnp.tanh(
        jnp.dot(pooled, w1_ref[...].astype(jnp.float32),
                preferred_element_type=jnp.float32) + b1_ref[...])   # (TB, H)

    # ---- classifier: dense(H, 1), emitted as a lane-dense (1, TB) row --------
    logits_row = jax.lax.dot_general(
        w2_ref[...], h, dimension_numbers=(((1,), (1,)), ((), ())),
        preferred_element_type=jnp.float32) + b2_ref[...]            # (1, TB)
    logits_ref[...] = logits_row

    # ---- fused pairwise cross-entropy (target 0) + accuracy ------------------
    # lanes are ordered pos0, neg0, pos1, neg1, ...; extract pos / neg columns
    # with exact 0/1 selection matmuls (keeps everything lane-dense, MXU slot).
    row_i = jax.lax.broadcasted_iota(jnp.int32, (tb, half), 0)
    col_i = jax.lax.broadcasted_iota(jnp.int32, (tb, half), 1)
    sel_pos = (row_i == 2 * col_i).astype(jnp.float32)               # (TB, TB/2)
    sel_neg = (row_i == 2 * col_i + 1).astype(jnp.float32)
    s_pos = jnp.dot(logits_row, sel_pos, preferred_element_type=jnp.float32)
    s_neg = jnp.dot(logits_row, sel_neg, preferred_element_type=jnp.float32)
    d = s_neg - s_pos                                                # (1, TB/2)
    # logsumexp(s_pos, s_neg) - s_pos == log1p(exp(d)); numerically stable form:
    nll = jnp.maximum(d, 0.0) + jnp.log1p(jnp.exp(-jnp.abs(d)))
    correct = (d <= 0.0).astype(jnp.float32)                         # argmax == 0
    loss_ref[...] += jnp.sum(nll, axis=1, keepdims=True)
    acc_ref[...] += jnp.sum(correct, axis=1, keepdims=True)

    @pl.when(i == pl.num_programs(0) - 1)
    def _finalize():
        inv = jnp.float32(1.0 / n_pairs_total)
        loss_ref[...] = loss_ref[...] * inv
        acc_ref[...] = acc_ref[...] * inv


# --------------------------------- wrapper ------------------------------------
def reranker_forward(input_ids, attention_mask, params):
    """Returns (loss, accuracy, logits) like RerankerOutput (eval branch)."""
    emb_table, w1, b1, w2, b2 = params
    B, S = input_ids.shape
    V, H = emb_table.shape
    assert B % 2 == 0, "batch must hold (pos, neg) pairs"

    # Batch tile: 128 rows per grid step (lane-dense logits block). On v6e/v7x
    # a larger TB (>=256) fills the 2x256 MXU better; 128 keeps the small demo
    # on a multi-step, pipelined grid.
    tb = 128 if (B % 128 == 0) else B
    assert B % tb == 0 and tb % 2 == 0
    n_tiles = B // tb
    n_pairs = B // 2

    mask_f = attention_mask.astype(jnp.float32)
    w2_row = w2.reshape(1, H).astype(jnp.float32)   # classifier as lane-dense row

    kernel = functools.partial(reranker_kernel, n_pairs_total=n_pairs)

    grid_spec = pltpu.PrefetchScalarGridSpec(
        num_scalar_prefetch=0,
        grid=(n_tiles,),
        in_specs=[
            pl.BlockSpec((tb, S), lambda i: (i, 0)),    # input_ids  (streamed)
            pl.BlockSpec((tb, S), lambda i: (i, 0)),    # attn mask  (streamed)
            pl.BlockSpec((V, H), lambda i: (0, 0)),     # emb table  (resident, bf16)
            pl.BlockSpec((H, H), lambda i: (0, 0)),     # pooler W   (resident, bf16)
            pl.BlockSpec((1, H), lambda i: (0, 0)),     # pooler b
            pl.BlockSpec((1, H), lambda i: (0, 0)),     # classifier row
            pl.BlockSpec((1, 1), lambda i: (0, 0)),     # classifier bias
        ],
        out_specs=[
            pl.BlockSpec((1, tb), lambda i: (0, i)),    # logits (lane-dense)
            pl.BlockSpec((1, 1), lambda i: (0, 0)),     # loss (accumulated)
            pl.BlockSpec((1, 1), lambda i: (0, 0)),     # accuracy (accumulated)
        ],
    )

    logits_row, loss, acc = pl.pallas_call(
        kernel,
        out_shape=(
            jax.ShapeDtypeStruct((1, B), jnp.float32),
            jax.ShapeDtypeStruct((1, 1), jnp.float32),
            jax.ShapeDtypeStruct((1, 1), jnp.float32),
        ),
        grid_spec=grid_spec,
        compiler_params=pltpu.CompilerParams(
            # loss/acc accumulate across grid steps -> batch axis is sequential.
            dimension_semantics=("arbitrary",),
        ),
    )(input_ids, mask_f, emb_table, w1, b1, w2_row, b2)

    logits = logits_row.reshape(B, 1)   # match the module's (B, 1) logits
    return loss[0, 0], acc[0, 0], logits


# ------------------------------ reference (JAX) --------------------------------
def reranker_reference(input_ids, attention_mask, params):
    emb_table, w1, b1, w2, b2 = params
    table_f = emb_table.astype(jnp.float32)
    w1_f = w1.astype(jnp.float32)
    emb = table_f[input_ids]                                         # (B, S, H)
    mask = attention_mask.astype(jnp.float32)
    msum = jnp.maximum(jnp.sum(mask, axis=1, keepdims=True), 1.0)
    pooled = jnp.sum(emb * mask[:, :, None], axis=1) / msum
    h = jnp.tanh(jnp.dot(pooled, w1_f,
                         precision=jax.lax.Precision.HIGHEST) + b1)
    logits = jnp.dot(h, w2, precision=jax.lax.Precision.HIGHEST) + b2
    scores = logits.reshape(-1, 2)
    lse = jax.nn.logsumexp(scores, axis=1)
    loss = jnp.mean(lse - scores[:, 0])
    acc = jnp.mean((jnp.argmax(scores, axis=1) == 0).astype(jnp.float32))
    return loss, acc, logits


# ----------------------------------- main ---------------------------------------
if __name__ == "__main__":
    B, S, H, V = 256, 16, 128, 64   # B even: (pos, neg) pairs

    key = jax.random.PRNGKey(0)
    k_emb, k_w1, k_b1, k_w2, k_b2, k_ids, k_len = jax.random.split(key, 7)

    emb_table = (jax.random.normal(k_emb, (V, H), jnp.float32) * 0.05).astype(jnp.bfloat16)
    w1 = (jax.random.normal(k_w1, (H, H), jnp.float32) * 0.05).astype(jnp.bfloat16)
    b1 = jax.random.normal(k_b1, (1, H), jnp.float32) * 0.01
    w2 = jax.random.normal(k_w2, (H, 1), jnp.float32) * 0.05
    b2 = jax.random.normal(k_b2, (1, 1), jnp.float32) * 0.01
    params = (emb_table, w1, b1, w2, b2)

    input_ids = jax.random.randint(k_ids, (B, S), 0, V, jnp.int32)
    # variable-length sequences: first `len` tokens valid, at least 4 valid
    lens = jax.random.randint(k_len, (B, 1), 4, S + 1, jnp.int32)
    attention_mask = (jnp.arange(S)[None, :] < lens).astype(jnp.int32)

    loss, acc, logits = reranker_forward(input_ids, attention_mask, params)
    jax.block_until_ready((loss, acc, logits))

    loss_ref, acc_ref, logits_ref = reranker_reference(input_ids, attention_mask, params)

    # head pipeline (gather -> pool -> pooler -> classifier) vs f32 reference
    assert jnp.allclose(logits, logits_ref, atol=1e-3), "logits mismatch"
    assert jnp.allclose(loss, loss_ref, atol=5e-4), "loss vs reference mismatch"

    # fused CE / accuracy must be exactly consistent with the kernel's own logits
    sk = logits.reshape(-1, 2).astype(jnp.float32)
    loss_k = jnp.mean(jax.nn.logsumexp(sk, axis=1) - sk[:, 0])
    acc_k = jnp.mean((jnp.argmax(sk, axis=1) == 0).astype(jnp.float32))
    assert jnp.allclose(loss, loss_k, atol=1e-5), "fused CE mismatch"
    assert jnp.allclose(acc, acc_k, atol=1e-6), "fused accuracy mismatch"

    print("KERNEL_OK")
</pallas_src>

<mosaic_0001>
module attributes {stable_mosaic.version = 11 : i64} {
  func.func @reranker_kernel(%arg0: i32, %arg1: memref<128x16xi32, #tpu.memory_space<vmem>>, %arg2: memref<128x16xf32, #tpu.memory_space<vmem>>, %arg3: memref<64x128xbf16, #tpu.memory_space<vmem>>, %arg4: memref<128x128xbf16, #tpu.memory_space<vmem>>, %arg5: memref<1x128xf32, #tpu.memory_space<vmem>>, %arg6: memref<1x128xf32, #tpu.memory_space<vmem>>, %arg7: memref<1x1xf32, #tpu.memory_space<vmem>>, %arg8: memref<1x128xf32, #tpu.memory_space<vmem>>, %arg9: memref<1x1xf32, #tpu.memory_space<vmem>>, %arg10: memref<1x1xf32, #tpu.memory_space<vmem>>) attributes {dimension_semantics = [#tpu.dimension_semantics<arbitrary>], iteration_bounds = array<i64: 2>, scalar_prefetch = 0 : i64, scratch_operands = 0 : i64, tpu.core_type = #tpu.core_type<tc>, window_params = [{transform_indices = @transform_0, window_bounds = array<i64: 128, 16>}, {transform_indices = @transform_1, window_bounds = array<i64: 128, 16>}, {pipeline_mode = #tpu.pipeline_mode<synchronous>, transform_indices = @transform_2, window_bounds = array<i64: 64, 128>}, {pipeline_mode = #tpu.pipeline_mode<synchronous>, transform_indices = @transform_3, window_bounds = array<i64: 128, 128>}, {pipeline_mode = #tpu.pipeline_mode<synchronous>, transform_indices = @transform_4, window_bounds = array<i64: 1, 128>}, {pipeline_mode = #tpu.pipeline_mode<synchronous>, transform_indices = @transform_5, window_bounds = array<i64: 1, 128>}, {pipeline_mode = #tpu.pipeline_mode<synchronous>, transform_indices = @transform_6, window_bounds = array<i64: 1, 1>}, {transform_indices = @transform_7, window_bounds = array<i64: 1, 128>}, {pipeline_mode = #tpu.pipeline_mode<synchronous>, transform_indices = @transform_8, window_bounds = array<i64: 1, 1>}, {pipeline_mode = #tpu.pipeline_mode<synchronous>, transform_indices = @transform_9, window_bounds = array<i64: 1, 1>}]} {
    %c0_i32 = arith.constant 0 : i32
    %0 = arith.cmpi eq, %arg0, %c0_i32 : i32
    %1 = arith.extui %0 : i1 to i32
    %c0_i32_0 = arith.constant 0 : i32
    %2 = arith.cmpi ne, %1, %c0_i32_0 : i32
    scf.if %2 {
      %cst_39 = arith.constant 0.000000e+00 : f32
      %215 = vector.broadcast %cst_39 : f32 to vector<1x1xf32>
      %c0_40 = arith.constant 0 : index
      %c0_41 = arith.constant 0 : index
      %216 = vector.load %arg9[%c0_40, %c0_41] : memref<1x1xf32, #tpu.memory_space<vmem>>, vector<1x1xf32>
      tpu.vector_store %arg9[%c0_40, %c0_41], %215 {strides = array<i32>} : memref<1x1xf32, #tpu.memory_space<vmem>>, vector<1x1xf32>,
      %cst_42 = arith.constant 0.000000e+00 : f32
      %217 = vector.broadcast %cst_42 : f32 to vector<1x1xf32>
      %c0_43 = arith.constant 0 : index
      %c0_44 = arith.constant 0 : index
      %218 = vector.load %arg10[%c0_43, %c0_44] : memref<1x1xf32, #tpu.memory_space<vmem>>, vector<1x1xf32>
      tpu.vector_store %arg10[%c0_43, %c0_44], %217 {strides = array<i32>} : memref<1x1xf32, #tpu.memory_space<vmem>>, vector<1x1xf32>,
    } else {
    }
    %c0 = arith.constant 0 : index
    %c0_1 = arith.constant 0 : index
    %3 = vector.load %arg1[%c0, %c0_1] : memref<128x16xi32, #tpu.memory_space<vmem>>, vector<128x16xi32>
    %c0_2 = arith.constant 0 : index
    %c0_3 = arith.constant 0 : index
    %4 = vector.load %arg2[%c0_2, %c0_3] : memref<128x16xf32, #tpu.memory_space<vmem>>, vector<128x16xf32>
    %5 = tpu.iota {dimensions = array<i32: 1>} : vector<128x64xi32>
    %cst = arith.constant 0.000000e+00 : f32
    %6 = vector.broadcast %cst : f32 to vector<128x64xf32>
    %7 = vector.extract_strided_slice %3 {offsets = [0, 0], sizes = [128, 1], strides = [1, 1]} : vector<128x16xi32> to vector<128x1xi32>
    %8 = vector.broadcast %7 : vector<128x1xi32> to vector<128x64xi32>
    %9 = arith.cmpi eq, %8, %5 : vector<128x64xi32>
    %10 = arith.extui %9 : vector<128x64xi1> to vector<128x64xi32>
    %11 = arith.sitofp %10 : vector<128x64xi32> to vector<128x64xf32>
    %12 = vector.extract_strided_slice %4 {offsets = [0, 0], sizes = [128, 1], strides = [1, 1]} : vector<128x16xf32> to vector<128x1xf32>
    %13 = vector.broadcast %12 : vector<128x1xf32> to vector<128x64xf32>
    %14 = arith.mulf %13, %11 : vector<128x64xf32>
    %15 = arith.addf %6, %14 : vector<128x64xf32>
    %16 = vector.extract_strided_slice %3 {offsets = [0, 1], sizes = [128, 1], strides = [1, 1]} : vector<128x16xi32> to vector<128x1xi32>
    %17 = vector.broadcast %16 : vector<128x1xi32> to vector<128x64xi32>
    %18 = arith.cmpi eq, %17, %5 : vector<128x64xi32>
    %19 = arith.extui %18 : vector<128x64xi1> to vector<128x64xi32>
    %20 = arith.sitofp %19 : vector<128x64xi32> to vector<128x64xf32>
    %21 = vector.extract_strided_slice %4 {offsets = [0, 1], sizes = [128, 1], strides = [1, 1]} : vector<128x16xf32> to vector<128x1xf32>
    %22 = vector.broadcast %21 : vector<128x1xf32> to vector<128x64xf32>
    %23 = arith.mulf %22, %20 : vector<128x64xf32>
    %24 = arith.addf %15, %23 : vector<128x64xf32>
    %25 = vector.extract_strided_slice %3 {offsets = [0, 2], sizes = [128, 1], strides = [1, 1]} : vector<128x16xi32> to vector<128x1xi32>
    %26 = vector.broadcast %25 : vector<128x1xi32> to vector<128x64xi32>
    %27 = arith.cmpi eq, %26, %5 : vector<128x64xi32>
    %28 = arith.extui %27 : vector<128x64xi1> to vector<128x64xi32>
    %29 = arith.sitofp %28 : vector<128x64xi32> to vector<128x64xf32>
    %30 = vector.extract_strided_slice %4 {offsets = [0, 2], sizes = [128, 1], strides = [1, 1]} : vector<128x16xf32> to vector<128x1xf32>
    %31 = vector.broadcast %30 : vector<128x1xf32> to vector<128x64xf32>
    %32 = arith.mulf %31, %29 : vector<128x64xf32>
    %33 = arith.addf %24, %32 : vector<128x64xf32>
    %34 = vector.extract_strided_slice %3 {offsets = [0, 3], sizes = [128, 1], strides = [1, 1]} : vector<128x16xi32> to vector<128x1xi32>
    %35 = vector.broadcast %34 : vector<128x1xi32> to vector<128x64xi32>
    %36 = arith.cmpi eq, %35, %5 : vector<128x64xi32>
    %37 = arith.extui %36 : vector<128x64xi1> to vector<128x64xi32>
    %38 = arith.sitofp %37 : vector<128x64xi32> to vector<128x64xf32>
    %39 = vector.extract_strided_slice %4 {offsets = [0, 3], sizes = [128, 1], strides = [1, 1]} : vector<128x16xf32> to vector<128x1xf32>
    %40 = vector.broadcast %39 : vector<128x1xf32> to vector<128x64xf32>
    %41 = arith.mulf %40, %38 : vector<128x64xf32>
    %42 = arith.addf %33, %41 : vector<128x64xf32>
    %43 = vector.extract_strided_slice %3 {offsets = [0, 4], sizes = [128, 1], strides = [1, 1]} : vector<128x16xi32> to vector<128x1xi32>
    %44 = vector.broadcast %43 : vector<128x1xi32> to vector<128x64xi32>
    %45 = arith.cmpi eq, %44, %5 : vector<128x64xi32>
    %46 = arith.extui %45 : vector<128x64xi1> to vector<128x64xi32>
    %47 = arith.sitofp %46 : vector<128x64xi32> to vector<128x64xf32>
    %48 = vector.extract_strided_slice %4 {offsets = [0, 4], sizes = [128, 1], strides = [1, 1]} : vector<128x16xf32> to vector<128x1xf32>
    %49 = vector.broadcast %48 : vector<128x1xf32> to vector<128x64xf32>
    %50 = arith.mulf %49, %47 : vector<128x64xf32>
    %51 = arith.addf %42, %50 : vector<128x64xf32>
    %52 = vector.extract_strided_slice %3 {offsets = [0, 5], sizes = [128, 1], strides = [1, 1]} : vector<128x16xi32> to vector<128x1xi32>
    %53 = vector.broadcast %52 : vector<128x1xi32> to vector<128x64xi32>
    %54 = arith.cmpi eq, %53, %5 : vector<128x64xi32>
    %55 = arith.extui %54 : vector<128x64xi1> to vector<128x64xi32>
    %56 = arith.sitofp %55 : vector<128x64xi32> to vector<128x64xf32>
    %57 = vector.extract_strided_slice %4 {offsets = [0, 5], sizes = [128, 1], strides = [1, 1]} : vector<128x16xf32> to vector<128x1xf32>
    %58 = vector.broadcast %57 : vector<128x1xf32> to vector<128x64xf32>
    %59 = arith.mulf %58, %56 : vector<128x64xf32>
    %60 = arith.addf %51, %59 : vector<128x64xf32>
    %61 = vector.extract_strided_slice %3 {offsets = [0, 6], sizes = [128, 1], strides = [1, 1]} : vector<128x16xi32> to vector<128x1xi32>
    %62 = vector.broadcast %61 : vector<128x1xi32> to vector<128x64xi32>
    %63 = arith.cmpi eq, %62, %5 : vector<128x64xi32>
    %64 = arith.extui %63 : vector<128x64xi1> to vector<128x64xi32>
    %65 = arith.sitofp %64 : vector<128x64xi32> to vector<128x64xf32>
    %66 = vector.extract_strided_slice %4 {offsets = [0, 6], sizes = [128, 1], strides = [1, 1]} : vector<128x16xf32> to vector<128x1xf32>
    %67 = vector.broadcast %66 : vector<128x1xf32> to vector<128x64xf32>
    %68 = arith.mulf %67, %65 : vector<128x64xf32>
    %69 = arith.addf %60, %68 : vector<128x64xf32>
    %70 = vector.extract_strided_slice %3 {offsets = [0, 7], sizes = [128, 1], strides = [1, 1]} : vector<128x16xi32> to vector<128x1xi32>
    %71 = vector.broadcast %70 : vector<128x1xi32> to vector<128x64xi32>
    %72 = arith.cmpi eq, %71, %5 : vector<128x64xi32>
    %73 = arith.extui %72 : vector<128x64xi1> to vector<128x64xi32>
    %74 = arith.sitofp %73 : vector<128x64xi32> to vector<128x64xf32>
    %75 = vector.extract_strided_slice %4 {offsets = [0, 7], sizes = [128, 1], strides = [1, 1]} : vector<128x16xf32> to vector<128x1xf32>
    %76 = vector.broadcast %75 : vector<128x1xf32> to vector<128x64xf32>
    %77 = arith.mulf %76, %74 : vector<128x64xf32>
    %78 = arith.addf %69, %77 : vector<128x64xf32>
    %79 = vector.extract_strided_slice %3 {offsets = [0, 8], sizes = [128, 1], strides = [1, 1]} : vector<128x16xi32> to vector<128x1xi32>
    %80 = vector.broadcast %79 : vector<128x1xi32> to vector<128x64xi32>
    %81 = arith.cmpi eq, %80, %5 : vector<128x64xi32>
    %82 = arith.extui %81 : vector<128x64xi1> to vector<128x64xi32>
    %83 = arith.sitofp %82 : vector<128x64xi32> to vector<128x64xf32>
    %84 = vector.extract_strided_slice %4 {offsets = [0, 8], sizes = [128, 1], strides = [1, 1]} : vector<128x16xf32> to vector<128x1xf32>
    %85 = vector.broadcast %84 : vector<128x1xf32> to vector<128x64xf32>
    %86 = arith.mulf %85, %83 : vector<128x64xf32>
    %87 = arith.addf %78, %86 : vector<128x64xf32>
    %88 = vector.extract_strided_slice %3 {offsets = [0, 9], sizes = [128, 1], strides = [1, 1]} : vector<128x16xi32> to vector<128x1xi32>
    %89 = vector.broadcast %88 : vector<128x1xi32> to vector<128x64xi32>
    %90 = arith.cmpi eq, %89, %5 : vector<128x64xi32>
    %91 = arith.extui %90 : vector<128x64xi1> to vector<128x64xi32>
    %92 = arith.sitofp %91 : vector<128x64xi32> to vector<128x64xf32>
    %93 = vector.extract_strided_slice %4 {offsets = [0, 9], sizes = [128, 1], strides = [1, 1]} : vector<128x16xf32> to vector<128x1xf32>
    %94 = vector.broadcast %93 : vector<128x1xf32> to vector<128x64xf32>
    %95 = arith.mulf %94, %92 : vector<128x64xf32>
    %96 = arith.addf %87, %95 : vector<128x64xf32>
    %97 = vector.extract_strided_slice %3 {offsets = [0, 10], sizes = [128, 1], strides = [1, 1]} : vector<128x16xi32> to vector<128x1xi32>
    %98 = vector.broadcast %97 : vector<128x1xi32> to vector<128x64xi32>
    %99 = arith.cmpi eq, %98, %5 : vector<128x64xi32>
    %100 = arith.extui %99 : vector<128x64xi1> to vector<128x64xi32>
    %101 = arith.sitofp %100 : vector<128x64xi32> to vector<128x64xf32>
    %102 = vector.extract_strided_slice %4 {offsets = [0, 10], sizes = [128, 1], strides = [1, 1]} : vector<128x16xf32> to vector<128x1xf32>
    %103 = vector.broadcast %102 : vector<128x1xf32> to vector<128x64xf32>
    %104 = arith.mulf %103, %101 : vector<128x64xf32>
    %105 = arith.addf %96, %104 : vector<128x64xf32>
    %106 = vector.extract_strided_slice %3 {offsets = [0, 11], sizes = [128, 1], strides = [1, 1]} : vector<128x16xi32> to vector<128x1xi32>
    %107 = vector.broadcast %106 : vector<128x1xi32> to vector<128x64xi32>
    %108 = arith.cmpi eq, %107, %5 : vector<128x64xi32>
    %109 = arith.extui %108 : vector<128x64xi1> to vector<128x64xi32>
    %110 = arith.sitofp %109 : vector<128x64xi32> to vector<128x64xf32>
    %111 = vector.extract_strided_slice %4 {offsets = [0, 11], sizes = [128, 1], strides = [1, 1]} : vector<128x16xf32> to vector<128x1xf32>
    %112 = vector.broadcast %111 : vector<128x1xf32> to vector<128x64xf32>
    %113 = arith.mulf %112, %110 : vector<128x64xf32>
    %114 = arith.addf %105, %113 : vector<128x64xf32>
    %115 = vector.extract_strided_slice %3 {offsets = [0, 12], sizes = [128, 1], strides = [1, 1]} : vector<128x16xi32> to vector<128x1xi32>
    %116 = vector.broadcast %115 : vector<128x1xi32> to vector<128x64xi32>
    %117 = arith.cmpi eq, %116, %5 : vector<128x64xi32>
    %118 = arith.extui %117 : vector<128x64xi1> to vector<128x64xi32>
    %119 = arith.sitofp %118 : vector<128x64xi32> to vector<128x64xf32>
    %120 = vector.extract_strided_slice %4 {offsets = [0, 12], sizes = [128, 1], strides = [1, 1]} : vector<128x16xf32> to vector<128x1xf32>
    %121 = vector.broadcast %120 : vector<128x1xf32> to vector<128x64xf32>
    %122 = arith.mulf %121, %119 : vector<128x64xf32>
    %123 = arith.addf %114, %122 : vector<128x64xf32>
    %124 = vector.extract_strided_slice %3 {offsets = [0, 13], sizes = [128, 1], strides = [1, 1]} : vector<128x16xi32> to vector<128x1xi32>
    %125 = vector.broadcast %124 : vector<128x1xi32> to vector<128x64xi32>
    %126 = arith.cmpi eq, %125, %5 : vector<128x64xi32>
    %127 = arith.extui %126 : vector<128x64xi1> to vector<128x64xi32>
    %128 = arith.sitofp %127 : vector<128x64xi32> to vector<128x64xf32>
    %129 = vector.extract_strided_slice %4 {offsets = [0, 13], sizes = [128, 1], strides = [1, 1]} : vector<128x16xf32> to vector<128x1xf32>
    %130 = vector.broadcast %129 : vector<128x1xf32> to vector<128x64xf32>
    %131 = arith.mulf %130, %128 : vector<128x64xf32>
    %132 = arith.addf %123, %131 : vector<128x64xf32>
    %133 = vector.extract_strided_slice %3 {offsets = [0, 14], sizes = [128, 1], strides = [1, 1]} : vector<128x16xi32> to vector<128x1xi32>
    %134 = vector.broadcast %133 : vector<128x1xi32> to vector<128x64xi32>
    %135 = arith.cmpi eq, %134, %5 : vector<128x64xi32>
    %136 = arith.extui %135 : vector<128x64xi1> to vector<128x64xi32>
    %137 = arith.sitofp %136 : vector<128x64xi32> to vector<128x64xf32>
    %138 = vector.extract_strided_slice %4 {offsets = [0, 14], sizes = [128, 1], strides = [1, 1]} : vector<128x16xf32> to vector<128x1xf32>
    %139 = vector.broadcast %138 : vector<128x1xf32> to vector<128x64xf32>
    %140 = arith.mulf %139, %137 : vector<128x64xf32>
    %141 = arith.addf %132, %140 : vector<128x64xf32>
    %142 = vector.extract_strided_slice %3 {offsets = [0, 15], sizes = [128, 1], strides = [1, 1]} : vector<128x16xi32> to vector<128x1xi32>
    %143 = vector.broadcast %142 : vector<128x1xi32> to vector<128x64xi32>
    %144 = arith.cmpi eq, %143, %5 : vector<128x64xi32>
    %145 = arith.extui %144 : vector<128x64xi1> to vector<128x64xi32>
    %146 = arith.sitofp %145 : vector<128x64xi32> to vector<128x64xf32>
    %147 = vector.extract_strided_slice %4 {offsets = [0, 15], sizes = [128, 1], strides = [1, 1]} : vector<128x16xf32> to vector<128x1xf32>
    %148 = vector.broadcast %147 : vector<128x1xf32> to vector<128x64xf32>
    %149 = arith.mulf %148, %146 : vector<128x64xf32>
    %150 = arith.addf %141, %149 : vector<128x64xf32>
    %cst_4 = arith.constant dense<0.000000e+00> : vector<128xf32>
    %151 = vector.multi_reduction <add>, %4, %cst_4 [1] : vector<128x16xf32> to vector<128xf32>
    %152 = vector.shape_cast %151 : vector<128xf32> to vector<128x1xf32>
    %cst_5 = arith.constant 1.000000e+00 : f32
    %153 = vector.broadcast %cst_5 : f32 to vector<128x1xf32>
    %154 = arith.maximumf %152, %153 : vector<128x1xf32>
    %155 = arith.truncf %150 : vector<128x64xf32> to vector<128x64xbf16>
    %c0_6 = arith.constant 0 : index
    %c0_7 = arith.constant 0 : index
    %156 = vector.load %arg3[%c0_6, %c0_7] : memref<64x128xbf16, #tpu.memory_space<vmem>>, vector<64x128xbf16>
    %cst_8 = arith.constant dense<0.000000e+00> : vector<128x128xf32>
    %157 = tpu.matmul %155, %156, %cst_8 {dimension_numbers = #tpu.dot_dimension_numbers<[1], [0], [0], [1], [0, 0, 1, 1], [], []>} : vector<128x64xbf16>, vector<64x128xbf16>, vector<128x128xf32> -> vector<128x128xf32>
    %158 = vector.broadcast %154 : vector<128x1xf32> to vector<128x128xf32>
    %159 = arith.divf %157, %158 : vector<128x128xf32>
    %c0_9 = arith.constant 0 : index
    %c0_10 = arith.constant 0 : index
    %160 = vector.load %arg4[%c0_9, %c0_10] : memref<128x128xbf16, #tpu.memory_space<vmem>>, vector<128x128xbf16>
    %161 = arith.extf %160 : vector<128x128xbf16> to vector<128x128xf32>
    %cst_11 = arith.constant dense<0.000000e+00> : vector<128x128xf32>
    %162 = tpu.matmul %159, %161, %cst_11 {dimension_numbers = #tpu.dot_dimension_numbers<[1], [0], [0], [1], [0, 0, 1, 1], [], []>} : vector<128x128xf32>, vector<128x128xf32>, vector<128x128xf32> -> vector<128x128xf32>
    %c0_12 = arith.constant 0 : index
    %c0_13 = arith.constant 0 : index
    %163 = vector.load %arg5[%c0_12, %c0_13] : memref<1x128xf32, #tpu.memory_space<vmem>>, vector<1x128xf32>
    %164 = vector.broadcast %163 : vector<1x128xf32> to vector<128x128xf32>
    %165 = arith.addf %162, %164 : vector<128x128xf32>
    %166 = math.tanh %165 : vector<128x128xf32>
    %c0_14 = arith.constant 0 : index
    %c0_15 = arith.constant 0 : index
    %167 = vector.load %arg6[%c0_14, %c0_15] : memref<1x128xf32, #tpu.memory_space<vmem>>, vector<1x128xf32>
    %cst_16 = arith.constant dense<0.000000e+00> : vector<1x128xf32>
    %168 = tpu.matmul %167, %166, %cst_16 {dimension_numbers = #tpu.dot_dimension_numbers<[1], [1], [0], [0], [0, 0, 1, 0], [], []>} : vector<1x128xf32>, vector<128x128xf32>, vector<1x128xf32> -> vector<1x128xf32>
    %c0_17 = arith.constant 0 : index
    %c0_18 = arith.constant 0 : index
    %169 = vector.load %arg7[%c0_17, %c0_18] : memref<1x1xf32, #tpu.memory_space<vmem>>, vector<1x1xf32>
    %170 = vector.broadcast %169 : vector<1x1xf32> to vector<1x128xf32>
    %171 = arith.addf %168, %170 : vector<1x128xf32>
    %c0_19 = arith.constant 0 : index
    %c0_20 = arith.constant 0 : index
    %172 = vector.load %arg8[%c0_19, %c0_20] : memref<1x128xf32, #tpu.memory_space<vmem>>, vector<1x128xf32>
    tpu.vector_store %arg8[%c0_19, %c0_20], %171 {strides = array<i32>} : memref<1x128xf32, #tpu.memory_space<vmem>>, vector<1x128xf32>,
    %173 = tpu.iota {dimensions = array<i32: 0>} : vector<128x64xi32>
    %174 = tpu.iota {dimensions = array<i32: 1>} : vector<128x64xi32>
    %c2_i32 = arith.constant 2 : i32
    %175 = vector.broadcast %c2_i32 : i32 to vector<128x64xi32>
    %176 = arith.muli %175, %174 : vector<128x64xi32>
    %177 = arith.cmpi eq, %173, %176 : vector<128x64xi32>
    %178 = arith.extui %177 : vector<128x64xi1> to vector<128x64xi32>
    %179 = arith.sitofp %178 : vector<128x64xi32> to vector<128x64xf32>
    %c2_i32_21 = arith.constant 2 : i32
    %180 = vector.broadcast %c2_i32_21 : i32 to vector<128x64xi32>
    %181 = arith.muli %180, %174 : vector<128x64xi32>
    %c1_i32 = arith.constant 1 : i32
    %182 = vector.broadcast %c1_i32 : i32 to vector<128x64xi32>
    %183 = arith.addi %181, %182 : vector<128x64xi32>
    %184 = arith.cmpi eq, %173, %183 : vector<128x64xi32>
    %185 = arith.extui %184 : vector<128x64xi1> to vector<128x64xi32>
    %186 = arith.sitofp %185 : vector<128x64xi32> to vector<128x64xf32>
    %cst_22 = arith.constant dense<0.000000e+00> : vector<1x64xf32>
    %187 = tpu.matmul %171, %179, %cst_22 {dimension_numbers = #tpu.dot_dimension_numbers<[1], [0], [0], [1], [0, 0, 1, 1], [], []>} : vector<1x128xf32>, vector<128x64xf32>, vector<1x64xf32> -> vector<1x64xf32>
    %cst_23 = arith.constant dense<0.000000e+00> : vector<1x64xf32>
    %188 = tpu.matmul %171, %186, %cst_23 {dimension_numbers = #tpu.dot_dimension_numbers<[1], [0], [0], [1], [0, 0, 1, 1], [], []>} : vector<1x128xf32>, vector<128x64xf32>, vector<1x64xf32> -> vector<1x64xf32>
    %189 = arith.subf %188, %187 : vector<1x64xf32>
    %cst_24 = arith.constant 0.000000e+00 : f32
    %190 = vector.broadcast %cst_24 : f32 to vector<1x64xf32>
    %191 = arith.maximumf %189, %190 : vector<1x64xf32>
    %192 = math.absf %189 : vector<1x64xf32>
    %cst_25 = arith.constant 0.000000e+00 : f32
    %193 = vector.broadcast %cst_25 : f32 to vector<1x64xf32>
    %194 = arith.subf %193, %192 : vector<1x64xf32>
    %195 = math.exp %194 : vector<1x64xf32>
    %196 = math.log1p %195 : vector<1x64xf32>
    %197 = arith.addf %191, %196 : vector<1x64xf32>
    %cst_26 = arith.constant 0.000000e+00 : f32
    %198 = vector.broadcast %cst_26 : f32 to vector<1x64xf32>
    %199 = arith.cmpf ole, %189, %198 : vector<1x64xf32>
    %200 = arith.extui %199 : vector<1x64xi1> to vector<1x64xi32>
    %201 = arith.sitofp %200 : vector<1x64xi32> to vector<1x64xf32>
    %c0_27 = arith.constant 0 : index
    %c0_28 = arith.constant 0 : index
    %202 = vector.load %arg9[%c0_27, %c0_28] : memref<1x1xf32, #tpu.memory_space<vmem>>, vector<1x1xf32>
    %cst_29 = arith.constant dense<0.000000e+00> : vector<1xf32>
    %203 = vector.multi_reduction <add>, %197, %cst_29 [1] : vector<1x64xf32> to vector<1xf32>
    %204 = vector.shape_cast %203 : vector<1xf32> to vector<1x1xf32>
    %205 = arith.addf %202, %204 : vector<1x1xf32>
    %c0_30 = arith.constant 0 : index
    %c0_31 = arith.constant 0 : index
    %206 = vector.load %arg9[%c0_30, %c0_31] : memref<1x1xf32, #tpu.memory_space<vmem>>, vector<1x1xf32>
    tpu.vector_store %arg9[%c0_30, %c0_31], %205 {strides = array<i32>} : memref<1x1xf32, #tpu.memory_space<vmem>>, vector<1x1xf32>,
    %c0_32 = arith.constant 0 : index
    %c0_33 = arith.constant 0 : index
    %207 = vector.load %arg10[%c0_32, %c0_33] : memref<1x1xf32, #tpu.memory_space<vmem>>, vector<1x1xf32>
    %cst_34 = arith.constant dense<0.000000e+00> : vector<1xf32>
    %208 = vector.multi_reduction <add>, %201, %cst_34 [1] : vector<1x64xf32> to vector<1xf32>
    %209 = vector.shape_cast %208 : vector<1xf32> to vector<1x1xf32>
    %210 = arith.addf %207, %209 : vector<1x1xf32>
    %c0_35 = arith.constant 0 : index
    %c0_36 = arith.constant 0 : index
    %211 = vector.load %arg10[%c0_35, %c0_36] : memref<1x1xf32, #tpu.memory_space<vmem>>, vector<1x1xf32>
    tpu.vector_store %arg10[%c0_35, %c0_36], %210 {strides = array<i32>} : memref<1x1xf32, #tpu.memory_space<vmem>>, vector<1x1xf32>,
    %c1_i32_37 = arith.constant 1 : i32
    %212 = arith.cmpi eq, %arg0, %c1_i32_37 : i32
    %213 = arith.extui %212 : i1 to i32
    %c0_i32_38 = arith.constant 0 : i32
    %214 = arith.cmpi ne, %213, %c0_i32_38 : i32
    scf.if %214 {
      %c0_39 = arith.constant 0 : index
      %c0_40 = arith.constant 0 : index
      %215 = vector.load %arg9[%c0_39, %c0_40] : memref<1x1xf32, #tpu.memory_space<vmem>>, vector<1x1xf32>
      %cst_41 = arith.constant 7.812500e-03 : f32
      %216 = vector.broadcast %cst_41 : f32 to vector<1x1xf32>
      %217 = arith.mulf %215, %216 : vector<1x1xf32>
      %c0_42 = arith.constant 0 : index
      %c0_43 = arith.constant 0 : index
      %218 = vector.load %arg9[%c0_42, %c0_43] : memref<1x1xf32, #tpu.memory_space<vmem>>, vector<1x1xf32>
      tpu.vector_store %arg9[%c0_42, %c0_43], %217 {strides = array<i32>} : memref<1x1xf32, #tpu.memory_space<vmem>>, vector<1x1xf32>,
      %c0_44 = arith.constant 0 : index
      %c0_45 = arith.constant 0 : index
      %219 = vector.load %arg10[%c0_44, %c0_45] : memref<1x1xf32, #tpu.memory_space<vmem>>, vector<1x1xf32>
      %cst_46 = arith.constant 7.812500e-03 : f32
      %220 = vector.broadcast %cst_46 : f32 to vector<1x1xf32>
      %221 = arith.mulf %219, %220 : vector<1x1xf32>
      %c0_47 = arith.constant 0 : index
      %c0_48 = arith.constant 0 : index
      %222 = vector.load %arg10[%c0_47, %c0_48] : memref<1x1xf32, #tpu.memory_space<vmem>>, vector<1x1xf32>
      tpu.vector_store %arg10[%c0_47, %c0_48], %221 {strides = array<i32>} : memref<1x1xf32, #tpu.memory_space<vmem>>, vector<1x1xf32>,
    } else {
    }
    return
  }
  func.func @transform_0(%arg0: i32) -> (i32, i32) {
    %c0_i32 = arith.constant 0 : i32
    %c0_i32_0 = arith.constant 0 : i32
    return %arg0, %c0_i32 : i32, i32
  }
  func.func @transform_1(%arg0: i32) -> (i32, i32) {
    %c0_i32 = arith.constant 0 : i32
    %c0_i32_0 = arith.constant 0 : i32
    return %arg0, %c0_i32 : i32, i32
  }
  func.func @transform_2(%arg0: i32) -> (i32, i32) {
    %c0_i32 = arith.constant 0 : i32
    %c0_i32_0 = arith.constant 0 : i32
    %c0_i32_1 = arith.constant 0 : i32
    return %c0_i32, %c0_i32_0 : i32, i32
  }
  func.func @transform_3(%arg0: i32) -> (i32, i32) {
    %c0_i32 = arith.constant 0 : i32
    %c0_i32_0 = arith.constant 0 : i32
    %c0_i32_1 = arith.constant 0 : i32
    return %c0_i32, %c0_i32_0 : i32, i32
  }
  func.func @transform_4(%arg0: i32) -> (i32, i32) {
    %c0_i32 = arith.constant 0 : i32
    %c0_i32_0 = arith.constant 0 : i32
    %c0_i32_1 = arith.constant 0 : i32
    return %c0_i32, %c0_i32_0 : i32, i32
  }
  func.func @transform_5(%arg0: i32) -> (i32, i32) {
    %c0_i32 = arith.constant 0 : i32
    %c0_i32_0 = arith.constant 0 : i32
    %c0_i32_1 = arith.constant 0 : i32
    return %c0_i32, %c0_i32_0 : i32, i32
  }
  func.func @transform_6(%arg0: i32) -> (i32, i32) {
    %c0_i32 = arith.constant 0 : i32
    %c0_i32_0 = arith.constant 0 : i32
    %c0_i32_1 = arith.constant 0 : i32
    return %c0_i32, %c0_i32_0 : i32, i32
  }
  func.func @transform_7(%arg0: i32) -> (i32, i32) {
    %c0_i32 = arith.constant 0 : i32
    %c0_i32_0 = arith.constant 0 : i32
    return %c0_i32, %arg0 : i32, i32
  }
  func.func @transform_8(%arg0: i32) -> (i32, i32) {
    %c0_i32 = arith.constant 0 : i32
    %c0_i32_0 = arith.constant 0 : i32
    %c0_i32_1 = arith.constant 0 : i32
    return %c0_i32, %c0_i32_0 : i32, i32
  }
  func.func @transform_9(%arg0: i32) -> (i32, i32) {
    %c0_i32 = arith.constant 0 : i32
    %c0_i32_0 = arith.constant 0 : i32
    %c0_i32_1 = arith.constant 0 : i32
    return %c0_i32, %c0_i32_0 : i32, i32
  }
}

</mosaic_0001>

<bundles_post_ra>
// kernel: tpu_custom_call.1
= control target key start
LH: loop header
LB: loop body
LE: loop exit
PB: predicated region body
PF: predicated region fallthrough
CT: control target
= control target key end

     0   :  { %s8590_s0 = inlined_call_operand.vmem [shape: s32[256,16], index: 0, kind: input, shape index: {}]   ;;  %s8591_s1 = inlined_call_operand.vmem [shape: f32[256,16], index: 1, kind: input, shape index: {}]   ;;  %s8592_s2 = inlined_call_operand.vmem [shape: bf16[64,128], index: 2, kind: input, shape index: {}]   ;;  %s8593_s3 = inlined_call_operand.vmem [shape: bf16[128,128], index: 3, kind: input, shape index: {}]   ;;  %s8594_s4 = inlined_call_operand.vmem [shape: f32[1,128], index: 4, kind: input, shape index: {}]   ;;  %s8595_s5 = inlined_call_operand.vmem [shape: f32[1,128], index: 5, kind: input, shape index: {}]   ;;  %s8596_s6 = inlined_call_operand.<no memory space> [shape: f32[1,1], index: 6, kind: input, shape index: {}]   ;;  %s8597_s7 = inlined_call_operand.hbm [shape: f32[1,256], index: 7, kind: output, shape index: {0}]   ;;  %s8598_s8 = inlined_call_operand.hbm [shape: f32[1,1], index: 8, kind: output, shape index: {1}]   ;;  %s8599_s9 = inlined_call_operand.hbm [shape: f32[1,1], index: 9, kind: output, shape index: {2}]  }
   0x1   :  { %8638 = sst [smem:[#allocation317_spill]] %s8590_s0  ;;  %v15_v0 = vstv %s8596_s6 }
   0x2   :  { %16 = vst [vmem:[#allocation2] sm:$0x1] %v15_v0 }
   0x3   :  { %17 = vsyncpa [#allocation4], 0 }
   0x4   :  { %19 = vsyncpa [#allocation4 + $0x1], 0 }
   0x5   :  { %20 = vsyncpa [#allocation6], 0  ;;  %s5303_s11 = smov 0   ;;  %s5305_s12 = smov 0  }
   0x6   :  { %s5307_s13 = smov 0   ;;  %s5309_s14 = smov 0  }
   0x7 LB: > { %s5324_s6 = sadd.s32 4294967295, %s5227_s14   ;;  %s4372_s15 = sadd.s32 4294967294, %s5227_s14   ;;  %s5227_s14 = sphi %s5309_s14, %s9314_s14   ;;  %s5223_s13 = sphi %s5307_s13, %s9313_s13   ;;  %s5219_s12 = sphi %s5305_s12, %s9312_s12   ;;  %s5215_s11 = sphi %s5303_s11, %s9311_s11  }
   0x8   : > { %s5328_s16 = sadd.s32 1, %s5227_s14   ;;  %s190_s17 = sadd.s32 1, %s5223_s13 }
   0x9   : > { %s187_s18 = ssub.s32 %s5227_s14, %s5328_s16  ;;  %p200_p0 = scmp.ne.s32.totalorder %s5223_s13, %s5219_s12 }
   0xa   : > { %p188_p1 = scmp.eq.s32.totalorder %s187_s18, 0  ;;  %p201_p2 = scmp.eq.s32.totalorder %s5324_s6, 1 }
   0xb   : > { %p206_p3 = scmp.ne.s32.totalorder %s5219_s12, %s5215_s11  ;;  %p207_p4 = scmp.eq.s32.totalorder %s4372_s15, 1 }
   0xc   : > { %s5339_s19 = scalar_select %p188_p1, %s5223_s13, %s190_s17  }
   0xd   : > { %p5343_p5 = por %p201_p2, %p200_p0  ;;  %p5347_p6 = por %p207_p4, %p206_p3 }
   0xe   : > { %p4375_p7 = scmp.ge.s32.totalorder %s5227_s14, 1  ;;  %p300_p8 = scmp.lt.s32.totalorder %s5227_s14, 3 }
  0x10   : > { %p301_p9 = pnand %p4375_p7, %p300_p8 }
  0x12   : > { %304 = sbr.rel (%p301_p9) target bundleno = 2480 (0x9b0), region = 48 }
  0x17   : > { %s334_s22 = sand.u32 1, %s5219_s12   ;;  %s4376_s23 = sshll.u32 %s5324_s6, 4 }
  0x18   : > { %p341_p10 = scmp.lt.s32.totalorder %s4376_s23, 31  ;;  %s8641_s0 = sld [smem:[#allocation317_spill]] }
  0x19   : > { %s5367_s10 = scalar_lea.vmem [#allocation3], %s334_s22  ;;  %p4380_p11 = scmp.ne.s32.totalorder %s5324_s6, 0 }
  0x1a   : > { %s9316_s23 = smov (!%p341_p10, %s4376_s23), 31 }
  0x1b   : > { %s4377_s24 = sshll.u32 %s9316_s23, 3  ;;  %356 = sbr.rel (%p4380_p11) target bundleno = 35 (0x23), region = 52 }
  0x1c   : > { %s5363_s30 = scalar_lea.vmem %s8591_s1, %s4377_s24 }
  0x1e   : > { %s5358_s27 = scalar_lea.vmem %s8641_s0, %s4377_s24 }
  0x20   : > { %vm357_vm0 = vcmask 0   ;;  %v5229_v1 = vmov 0.0  }
  0x21   : > { %358 = vst.msk [vmem:[#allocation5] sm:$0x1] %vm357_vm0, %v5229_v1 }
  0x22   : > { %359 = vst.msk [vmem:[#allocation7] sm:$0x1] %vm357_vm0, %v5229_v1 }
  0x23 PF: > { %v5371_v2 = vld [vmem:[%s5358_s27 + $0x20] sm:$0xff]  ;;  %v5374_v3 = vld [vmem:[%s5358_s27 + $0x10] sm:$0xff]  ;;  %v8600_v5 = vmov 0   ;;  %v5386_v6 = vld [vmem:[%s5358_s27 + $0x28] sm:$0xff]  ;;  %v5231_v35 = vmov 1   ;;  %v5232_v60 = vmov 2  }
  0x24   : > { %v5377_v4 = vld [vmem:[%s5358_s27] sm:$0xff]  ;;  %4850 = vset.pattern.permute.xlu2 %v8600_v5  ;;  %4849 = vset.pattern.permute.xlu1 %v8600_v5  ;;  %v5389_v7 = vld [vmem:[%s5358_s27 + $0x18] sm:$0xff]  ;;  %v5392_v8 = vld [vmem:[%s5358_s27 + $0x8] sm:$0xff]  ;;  %p4726_p12 = scmp.ne.s32.totalorder %s5324_s6, 1 }
  0x25   : > { %4848 = vset.pattern.permute.xlu0 %v8600_v5  ;;  %407 = vperm.xlu2 %4850, %v5371_v2   ;;  %v5398_v9 = vld [vmem:[%s5358_s27 + $0x40] sm:$0xff]  ;;  %v5401_v10 = vld [vmem:[%s5358_s27 + $0x38] sm:$0xff]  ;;  %v5404_v11 = vld [vmem:[%s5358_s27 + $0x30] sm:$0xff] }
  0x26   : > { %401 = vperm.xlu1 %4849, %v5374_v3   ;;  %395 = vperm.xlu0 %4848, %v5377_v4   ;;  %v5410_v12 = vld [vmem:[%s5358_s27 + $0x58] sm:$0xff]  ;;  %v5413_v13 = vld [vmem:[%s5358_s27 + $0x50] sm:$0xff]  ;;  %v5416_v14 = vld [vmem:[%s5358_s27 + $0x48] sm:$0xff] }
  0x27   : > { %v5422_v15 = vld [vmem:[%s5358_s27 + $0x70] sm:$0xff]  ;;  %v5425_v16 = vld [vmem:[%s5358_s27 + $0x68] sm:$0xff]  ;;  %v5428_v17 = vld [vmem:[%s5358_s27 + $0x60] sm:$0xff] }
  0x28   : > { %v5434_v18 = vld [vmem:[%s5363_s30 + $0x8] sm:$0xff]  ;;  %v5437_v19 = vld [vmem:[%s5363_s30] sm:$0xff]  ;;  %v5440_v20 = vld [vmem:[%s5358_s27 + $0x78] sm:$0xff] }
  0x29   : > { %v5446_v21 = vld [vmem:[%s5363_s30 + $0x20] sm:$0xff]  ;;  %v5449_v22 = vld [vmem:[%s5363_s30 + $0x18] sm:$0xff]  ;;  %v5452_v23 = vld [vmem:[%s5363_s30 + $0x10] sm:$0xff] }
  0x2a   : > { %v5458_v24 = vld [vmem:[%s5363_s30 + $0x38] sm:$0xff]  ;;  %v5461_v25 = vld [vmem:[%s5363_s30 + $0x30] sm:$0xff]  ;;  %v5464_v26 = vld [vmem:[%s5363_s30 + $0x28] sm:$0xff] }
  0x2b   : > { %v5470_v27 = vld [vmem:[%s5363_s30 + $0x50] sm:$0xff]  ;;  %v5473_v28 = vld [vmem:[%s5363_s30 + $0x48] sm:$0xff]  ;;  %v5476_v29 = vld [vmem:[%s5363_s30 + $0x40] sm:$0xff] }
  0x2c   : > { %v5482_v30 = vld [vmem:[%s5363_s30 + $0x68] sm:$0xff]  ;;  %v5485_v31 = vld [vmem:[%s5363_s30 + $0x60] sm:$0xff]  ;;  %v5488_v32 = vld [vmem:[%s5363_s30 + $0x58] sm:$0xff] }
  0x2d   : > { %410 = vperm.xlu2 %4850, %v5386_v6   ;;  %v5494_v33 = vld [vmem:[%s5363_s30 + $0x78] sm:$0xff]  ;;  %v5497_v34 = vld [vmem:[%s5363_s30 + $0x70] sm:$0xff] }
  0x2e   : > { %404 = vperm.xlu1 %4849, %v5389_v7   ;;  %398 = vperm.xlu0 %4848, %v5392_v8  }
  0x35   : > { %419 = vperm.xlu2 %4850, %v5398_v9  }
  0x36   : > { %416 = vperm.xlu1 %4849, %v5401_v10   ;;  %413 = vperm.xlu0 %4848, %v5404_v11  }
  0x3d   : > { %428 = vperm.xlu2 %4850, %v5410_v12  }
  0x3e   : > { %425 = vperm.xlu1 %4849, %v5413_v13   ;;  %422 = vperm.xlu0 %4848, %v5416_v14  }
  0x45   : > { %437 = vperm.xlu2 %4850, %v5422_v15  }
  0x46   : > { %434 = vperm.xlu1 %4849, %v5425_v16   ;;  %431 = vperm.xlu0 %4848, %v5428_v17  }
  0x4d   : > { %497 = vperm.xlu2 %4850, %v5434_v18  }
  0x4e   : > { %492 = vperm.xlu1 %4849, %v5437_v19   ;;  %440 = vperm.xlu0 %4848, %v5440_v20  }
  0x55   : > { %512 = vperm.xlu2 %4850, %v5446_v21  }
  0x56   : > { %507 = vperm.xlu1 %4849, %v5449_v22   ;;  %502 = vperm.xlu0 %4848, %v5452_v23  }
  0x5d   : > { %527 = vperm.xlu2 %4850, %v5458_v24  }
  0x5e   : > { %522 = vperm.xlu1 %4849, %v5461_v25   ;;  %517 = vperm.xlu0 %4848, %v5464_v26  }
  0x65   : > { %542 = vperm.xlu2 %4850, %v5470_v27  }
  0x66   : > { %537 = vperm.xlu1 %4849, %v5473_v28   ;;  %532 = vperm.xlu0 %4848, %v5476_v29  }
  0x6d   : > { %557 = vperm.xlu2 %4850, %v5482_v30  }
  0x6e   : > { %552 = vperm.xlu1 %4849, %v5485_v31   ;;  %547 = vperm.xlu0 %4848, %v5488_v32  }
  0x75   : > { %4851 = vset.pattern.permute.xlu2 %v5231_v35 }
  0x76   : > { %567 = vperm.xlu1 %4849, %v5494_v33   ;;  %562 = vperm.xlu0 %4848, %v5497_v34  }
  0x77   : > { %603 = vperm.xlu2 %4851, %v5377_v4  }
  0x7e   : > { %4853 = vset.pattern.permute.xlu1 %v5231_v35  ;;  %4852 = vset.pattern.permute.xlu0 %v5231_v35 }
  0x7f   : > { %609 = vperm.xlu1 %4853, %v5374_v3   ;;  %612 = vperm.xlu2 %4851, %v5389_v7   ;;  %v5504_v36 = vpop.permute.xlu2 %407 }
  0x80   : > { %8642 = vst [vmem:[#allocation10_spill] sm:$0xff] %v5504_v36  ;;  %606 = vperm.xlu0 %4852, %v5392_v8  }
  0x87   : > { %615 = vperm.xlu1 %4853, %v5371_v2   ;;  %618 = vperm.xlu2 %4851, %v5386_v6   ;;  %v5509_v37 = vpop.permute.xlu2 %410 }
  0x88   : > { %621 = vperm.xlu0 %4852, %v5404_v11  }
  0x8f   : > { %624 = vperm.xlu1 %4853, %v5401_v10   ;;  %627 = vperm.xlu2 %4851, %v5398_v9   ;;  %v5514_v38 = vpop.permute.xlu2 %419 }
  0x90   : > { %630 = vperm.xlu0 %4852, %v5416_v14  }
  0x97   : > { %633 = vperm.xlu1 %4853, %v5413_v13   ;;  %636 = vperm.xlu2 %4851, %v5410_v12   ;;  %v5519_v39 = vpop.permute.xlu2 %428 }
  0x98   : > { %639 = vperm.xlu0 %4852, %v5428_v17   ;;  %v5522_v40 = vpop.permute.xlu1 %401  ;;  %v5524_v41 = vpop.permute.xlu0 %395 }
  0x99   : > { %8643 = vst [vmem:[#allocation11_spill] sm:$0xff] %v5524_v41 }
  0x9f   : > { %642 = vperm.xlu1 %4853, %v5425_v16   ;;  %645 = vperm.xlu2 %4851, %v5422_v15   ;;  %v5528_v42 = vpop.permute.xlu2 %437 }
  0xa0   : > { %648 = vperm.xlu0 %4852, %v5440_v20   ;;  %v5531_v43 = vpop.permute.xlu1 %404  ;;  %v5533_v44 = vpop.permute.xlu0 %398 }
  0xa1   : > { %8644 = vst [vmem:[#allocation12_spill] sm:$0xff] %v5531_v43 }
  0xa2   : > { %8645 = vst [vmem:[#allocation13_spill] sm:$0xff] %v5533_v44 }
  0xa7   : > { %699 = vperm.xlu1 %4853, %v5437_v19   ;;  %703 = vperm.xlu2 %4851, %v5434_v18   ;;  %v5537_v45 = vpop.permute.xlu2 %497 }
  0xa8   : > { %8646 = vst [vmem:[#allocation14_spill] sm:$0xff] %v5537_v45  ;;  %707 = vperm.xlu0 %4852, %v5452_v23   ;;  %v5540_v46 = vpop.permute.xlu1 %416  ;;  %v5542_v47 = vpop.permute.xlu0 %413 }
  0xa9   : > { %8647 = vst [vmem:[#allocation15_spill] sm:$0xff] %v5540_v46 }
  0xaa   : > { %8648 = vst [vmem:[#allocation16_spill] sm:$0xff] %v5542_v47 }
  0xaf   : > { %711 = vperm.xlu1 %4853, %v5449_v22   ;;  %715 = vperm.xlu2 %4851, %v5446_v21   ;;  %v5546_v48 = vpop.permute.xlu2 %512 }
  0xb0   : > { %8649 = vst [vmem:[#allocation17_spill] sm:$0xff] %v5546_v48  ;;  %719 = vperm.xlu0 %4852, %v5464_v26   ;;  %v5549_v49 = vpop.permute.xlu1 %425  ;;  %v5551_v50 = vpop.permute.xlu0 %422 }
  0xb1   : > { %8650 = vst [vmem:[#allocation18_spill] sm:$0xff] %v5549_v49 }
  0xb2   : > { %8651 = vst [vmem:[#allocation19_spill] sm:$0xff] %v5551_v50 }
  0xb7   : > { %723 = vperm.xlu1 %4853, %v5461_v25   ;;  %727 = vperm.xlu2 %4851, %v5458_v24   ;;  %v5555_v51 = vpop.permute.xlu2 %527 }
  0xb8   : > { %8652 = vst [vmem:[#allocation20_spill] sm:$0xff] %v5555_v51  ;;  %731 = vperm.xlu0 %4852, %v5476_v29   ;;  %v5558_v52 = vpop.permute.xlu1 %434  ;;  %v5560_v53 = vpop.permute.xlu0 %431 }
  0xb9   : > { %8653 = vst [vmem:[#allocation21_spill] sm:$0xff] %v5558_v52 }
  0xba   : > { %8654 = vst [vmem:[#allocation22_spill] sm:$0xff] %v5560_v53 }
  0xbf   : > { %735 = vperm.xlu1 %4853, %v5473_v28   ;;  %739 = vperm.xlu2 %4851, %v5470_v27   ;;  %v5564_v54 = vpop.permute.xlu2 %542 }
  0xc0   : > { %8655 = vst [vmem:[#allocation23_spill] sm:$0xff] %v5564_v54  ;;  %743 = vperm.xlu0 %4852, %v5488_v32   ;;  %v5567_v55 = vpop.permute.xlu1 %492  ;;  %v5569_v56 = vpop.permute.xlu0 %440 }
  0xc1   : > { %8656 = vst [vmem:[#allocation24_spill] sm:$0xff] %v5567_v55 }
  0xc2   : > { %8657 = vst [vmem:[#allocation25_spill] sm:$0xff] %v5569_v56 }
  0xc7   : > { %747 = vperm.xlu1 %4853, %v5485_v31   ;;  %751 = vperm.xlu2 %4851, %v5482_v30   ;;  %v5573_v57 = vpop.permute.xlu2 %557 }
  0xc8   : > { %8658 = vst [vmem:[#allocation26_spill] sm:$0xff] %v5573_v57  ;;  %755 = vperm.xlu0 %4852, %v5497_v34   ;;  %v5576_v58 = vpop.permute.xlu1 %507  ;;  %v5578_v59 = vpop.permute.xlu0 %502 }
  0xc9   : > { %8659 = vst [vmem:[#allocation27_spill] sm:$0xff] %v5576_v58 }
  0xcf   : > { %759 = vperm.xlu1 %4853, %v5494_v33   ;;  %4854 = vset.pattern.permute.xlu2 %v5232_v60 }
  0xd0   : > { %4855 = vset.pattern.permute.xlu0 %v5232_v60  ;;  %v5581_v61 = vpop.permute.xlu1 %522  ;;  %795 = vperm.xlu2 %4854, %v5377_v4   ;;  %v5584_v62 = vpop.permute.xlu0 %517 }
  0xd1   : > { %8660 = vst [vmem:[#allocation28_spill] sm:$0xff] %v5581_v61  ;;  %798 = vperm.xlu0 %4855, %v5392_v8   ;;  %v5587_v63 = vpop.permute.xlu2 %603 }
  0xd2   : > { %8661 = vst [vmem:[#allocation29_spill] sm:$0xff] %v5587_v63 }
  0xd7   : > { %4856 = vset.pattern.permute.xlu1 %v5232_v60 }
  0xd8   : > { %801 = vperm.xlu1 %4856, %v5374_v3   ;;  %v5590_v0 = vpop.permute.xlu1 %537  ;;  %804 = vperm.xlu2 %4854, %v5389_v7   ;;  %v5593_v1 = vpop.permute.xlu0 %532 }
  0xd9   : > { %8662 = vst [vmem:[#allocation30_spill] sm:$0xff] %v5590_v0  ;;  %813 = vperm.xlu0 %4855, %v5404_v11   ;;  %v5596_v35 = vpop.permute.xlu2 %612 }
  0xda   : > { %8663 = vst [vmem:[#allocation31_spill] sm:$0xff] %v5596_v35 }
  0xe0   : > { %807 = vperm.xlu1 %4856, %v5371_v2   ;;  %v5599_v5 = vpop.permute.xlu1 %552  ;;  %810 = vperm.xlu2 %4854, %v5386_v6   ;;  %v5602_v57 = vpop.permute.xlu0 %547 }
  0xe1   : > { %8664 = vst [vmem:[#allocation32_spill] sm:$0xff] %v5599_v5  ;;  %822 = vperm.xlu0 %4855, %v5416_v14   ;;  %v5605_v60 = vpop.permute.xlu2 %618 }
  0xe8   : > { %816 = vperm.xlu1 %4856, %v5401_v10   ;;  %v5608_v52 = vpop.permute.xlu1 %567  ;;  %819 = vperm.xlu2 %4854, %v5398_v9   ;;  %v5611_v54 = vpop.permute.xlu0 %562 }
  0xe9   : > { %8665 = vst [vmem:[#allocation33_spill] sm:$0xff] %v5608_v52  ;;  %831 = vperm.xlu0 %4855, %v5428_v17   ;;  %v5614_v49 = vpop.permute.xlu2 %627 }
  0xf0   : > { %825 = vperm.xlu1 %4856, %v5413_v13   ;;  %828 = vperm.xlu2 %4854, %v5410_v12  }
  0xf1   : > { %840 = vperm.xlu0 %4855, %v5440_v20   ;;  %v5619_v61 = vpop.permute.xlu1 %609  ;;  %v5621_v51 = vpop.permute.xlu2 %636 }
  0xf2   : > { %v5623_v46 = vpop.permute.xlu0 %606 }
  0xf3   : > { %8666 = vst [vmem:[#allocation34_spill] sm:$0xff] %v5623_v46 }
  0xf8   : > { %834 = vperm.xlu1 %4856, %v5425_v16   ;;  %837 = vperm.xlu2 %4854, %v5422_v15  }
  0xf9   : > { %899 = vperm.xlu0 %4855, %v5452_v23   ;;  %v5628_v47 = vpop.permute.xlu1 %615  ;;  %v5630_v48 = vpop.permute.xlu2 %645 }
  0xfa   : > { %8667 = vst [vmem:[#allocation35_spill] sm:$0xff] %v5628_v47  ;;  %v5632_v36 = vpop.permute.xlu0 %621 }
  0xfb   : > { %8668 = vst [vmem:[#allocation36_spill] sm:$0xff] %v5632_v36 }
 0x100   : > { %891 = vperm.xlu1 %4856, %v5437_v19   ;;  %895 = vperm.xlu2 %4854, %v5434_v18  }
 0x101   : > { %911 = vperm.xlu0 %4855, %v5464_v26   ;;  %v5637_v58 = vpop.permute.xlu1 %624  ;;  %v5639_v43 = vpop.permute.xlu2 %703 }
 0x102   : > { %8669 = vst [vmem:[#allocation37_spill] sm:$0xff] %v5637_v58  ;;  %v5641_v35 = vpop.permute.xlu0 %630 }
 0x103   : > { %8670 = vst [vmem:[#allocation38_spill] sm:$0xff] %v5639_v43 }
 0x104   : > { %8671 = vst [vmem:[#allocation39_spill] sm:$0xff] %v5641_v35 }
 0x108   : > { %903 = vperm.xlu1 %4856, %v5449_v22   ;;  %907 = vperm.xlu2 %4854, %v5446_v21  }
 0x109   : > { %923 = vperm.xlu0 %4855, %v5476_v29   ;;  %v5646_v47 = vpop.permute.xlu1 %633  ;;  %v5648_v36 = vpop.permute.xlu2 %715 }
 0x10a   : > { %8672 = vst [vmem:[#allocation40_spill] sm:$0xff] %v5646_v47  ;;  %v5650_v55 = vpop.permute.xlu0 %639 }
 0x10b   : > { %8673 = vst [vmem:[#allocation41_spill] sm:$0xff] %v5648_v36 }
 0x10c   : > { %8674 = vst [vmem:[#allocation42_spill] sm:$0xff] %v5650_v55 }
 0x110   : > { %915 = vperm.xlu1 %4856, %v5461_v25   ;;  %919 = vperm.xlu2 %4854, %v5458_v24  }
 0x111   : > { %935 = vperm.xlu0 %4855, %v5488_v32   ;;  %v5655_v58 = vpop.permute.xlu1 %642  ;;  %v5657_v45 = vpop.permute.xlu2 %727 }
 0x112   : > { %8675 = vst [vmem:[#allocation43_spill] sm:$0xff] %v5655_v58  ;;  %v5659_v43 = vpop.permute.xlu0 %648  ;;  %v5233_v58 = vmov 3  }
 0x113   : > { %8676 = vst [vmem:[#allocation44_spill] sm:$0xff] %v5657_v45 }
 0x114   : > { %8677 = vst [vmem:[#allocation45_spill] sm:$0xff] %v5659_v43 }
 0x118   : > { %927 = vperm.xlu1 %4856, %v5473_v28   ;;  %931 = vperm.xlu2 %4854, %v5470_v27  }
 0x119   : > { %947 = vperm.xlu0 %4855, %v5497_v34   ;;  %v5664_v47 = vpop.permute.xlu1 %699  ;;  %v5666_v36 = vpop.permute.xlu2 %739 }
 0x11a   : > { %8678 = vst [vmem:[#allocation46_spill] sm:$0xff] %v5664_v47  ;;  %v5668_v63 = vpop.permute.xlu0 %707 }
 0x11b   : > { %8679 = vst [vmem:[#allocation47_spill] sm:$0xff] %v5666_v36 }
 0x120   : > { %939 = vperm.xlu1 %4856, %v5485_v31   ;;  %943 = vperm.xlu2 %4854, %v5482_v30  }
 0x121   : > { %4858 = vset.pattern.permute.xlu0 %v5233_v58  ;;  %v5672_v45 = vpop.permute.xlu1 %711  ;;  %v5674_v41 = vpop.permute.xlu2 %751 }
 0x122   : > { %8680 = vst [vmem:[#allocation48_spill] sm:$0xff] %v5672_v45  ;;  %990 = vperm.xlu0 %4858, %v5392_v8   ;;  %v5677_v44 = vpop.permute.xlu0 %719 }
 0x123   : > { %8681 = vst [vmem:[#allocation49_spill] sm:$0xff] %v5674_v41 }
 0x128   : > { %951 = vperm.xlu1 %4856, %v5494_v33   ;;  %4857 = vset.pattern.permute.xlu2 %v5233_v58 }
 0x129   : > { %v5680_v36 = vpop.permute.xlu1 %723  ;;  %987 = vperm.xlu2 %4857, %v5377_v4  }
 0x12a   : > { %8682 = vst [vmem:[#allocation50_spill] sm:$0xff] %v5680_v36  ;;  %1005 = vperm.xlu0 %4858, %v5404_v11   ;;  %v5684_v47 = vpop.permute.xlu0 %731  ;;  %v5686_v46 = vpop.permute.xlu2 %795 }
 0x12b   : > { %8683 = vst [vmem:[#allocation51_spill] sm:$0xff] %v5686_v46 }
 0x130   : > { %4859 = vset.pattern.permute.xlu1 %v5233_v58 }
 0x131   : > { %993 = vperm.xlu1 %4859, %v5374_v3   ;;  %v5689_v41 = vpop.permute.xlu1 %735  ;;  %996 = vperm.xlu2 %4857, %v5389_v7  }
 0x132   : > { %8684 = vst [vmem:[#allocation52_spill] sm:$0xff] %v5689_v41  ;;  %1014 = vperm.xlu0 %4858, %v5416_v14   ;;  %v5693_v45 = vpop.permute.xlu0 %743  ;;  %v5695_v36 = vpop.permute.xlu2 %804 }
 0x133   : > { %8685 = vst [vmem:[#allocation53_spill] sm:$0xff] %v5695_v36 }
 0x139   : > { %999 = vperm.xlu1 %4859, %v5371_v2   ;;  %v5698_v52 = vpop.permute.xlu1 %747  ;;  %1002 = vperm.xlu2 %4857, %v5386_v6  }
 0x13a   : > { %8686 = vst [vmem:[#allocation54_spill] sm:$0xff] %v5698_v52  ;;  %1023 = vperm.xlu0 %4858, %v5428_v17   ;;  %v5702_v58 = vpop.permute.xlu0 %755  ;;  %v5704_v46 = vpop.permute.xlu2 %810 }
 0x141   : > { %1008 = vperm.xlu1 %4859, %v5401_v10   ;;  %v5707_v5 = vpop.permute.xlu1 %759  ;;  %1011 = vperm.xlu2 %4857, %v5398_v9  }
 0x142   : > { %8687 = vst [vmem:[#allocation55_spill] sm:$0xff] %v5707_v5  ;;  %1032 = vperm.xlu0 %4858, %v5440_v20   ;;  %v5711_v36 = vpop.permute.xlu2 %819 }
 0x143   : > { %v5713_v0 = vpop.permute.xlu0 %798 }
 0x144   : > { %8688 = vst [vmem:[#allocation56_spill] sm:$0xff] %v5713_v0 }
 0x149   : > { %1017 = vperm.xlu1 %4859, %v5413_v13   ;;  %1020 = vperm.xlu2 %4857, %v5410_v12  }
 0x14a   : > { %1091 = vperm.xlu0 %4858, %v5452_v23   ;;  %v5718_v52 = vpop.permute.xlu1 %801  ;;  %v5720_v41 = vpop.permute.xlu2 %828 }
 0x14b   : > { %v5722_v56 = vpop.permute.xlu0 %813 }
 0x14c   : > { %8689 = vst [vmem:[#allocation57_spill] sm:$0xff] %v5722_v56 }
 0x151   : > { %1026 = vperm.xlu1 %4859, %v5425_v16   ;;  %1029 = vperm.xlu2 %4857, %v5422_v15  }
 0x152   : > { %1103 = vperm.xlu0 %4858, %v5464_v26   ;;  %v5727_v5 = vpop.permute.xlu1 %807  ;;  %v5729_v0 = vpop.permute.xlu2 %837 }
 0x153   : > { %8690 = vst [vmem:[#allocation58_spill] sm:$0xff] %v5727_v5  ;;  %v5731_v43 = vpop.permute.xlu0 %822 }
 0x154   : > { %8691 = vst [vmem:[#allocation59_spill] sm:$0xff] %v5731_v43 }
 0x159   : > { %1083 = vperm.xlu1 %4859, %v5437_v19   ;;  %1087 = vperm.xlu2 %4857, %v5434_v18  }
 0x15a   : > { %1115 = vperm.xlu0 %4858, %v5476_v29   ;;  %v5736_v53 = vpop.permute.xlu1 %816  ;;  %v5738_v56 = vpop.permute.xlu2 %895 }
 0x15b   : > { %8692 = vst [vmem:[#allocation60_spill] sm:$0xff] %v5736_v53  ;;  %v5740_v55 = vpop.permute.xlu0 %831 }
 0x15c   : > { %8693 = vst [vmem:[#allocation61_spill] sm:$0xff] %v5738_v56 }
 0x15d   : > { %8694 = vst [vmem:[#allocation62_spill] sm:$0xff] %v5740_v55 }
 0x161   : > { %1095 = vperm.xlu1 %4859, %v5449_v22   ;;  %1099 = vperm.xlu2 %4857, %v5446_v21  }
 0x162   : > { %1127 = vperm.xlu0 %4858, %v5488_v32   ;;  %v5745_v5 = vpop.permute.xlu1 %825  ;;  %v5747_v43 = vpop.permute.xlu2 %907 }
 0x163   : > { %8695 = vst [vmem:[#allocation63_spill] sm:$0xff] %v5745_v5  ;;  %v5749_v50 = vpop.permute.xlu0 %840  ;;  %v5234_v5 = vmov 4  }
 0x164   : > { %8696 = vst [vmem:[#allocation64_spill] sm:$0xff] %v5747_v43 }
 0x165   : > { %8697 = vst [vmem:[#allocation65_spill] sm:$0xff] %v5749_v50 }
 0x169   : > { %1107 = vperm.xlu1 %4859, %v5461_v25   ;;  %1111 = vperm.xlu2 %4857, %v5458_v24  }
 0x16a   : > { %1139 = vperm.xlu0 %4858, %v5497_v34   ;;  %v5754_v53 = vpop.permute.xlu1 %834  ;;  %v5756_v56 = vpop.permute.xlu2 %919 }
 0x16b   : > { %8698 = vst [vmem:[#allocation66_spill] sm:$0xff] %v5754_v53  ;;  %v5758_v55 = vpop.permute.xlu0 %899 }
 0x16c   : > { %8699 = vst [vmem:[#allocation67_spill] sm:$0xff] %v5756_v56 }
 0x16d   : > { %8700 = vst [vmem:[#allocation68_spill] sm:$0xff] %v5758_v55 }
 0x171   : > { %1119 = vperm.xlu1 %4859, %v5473_v28   ;;  %1123 = vperm.xlu2 %4857, %v5470_v27  }
 0x172   : > { %4861 = vset.pattern.permute.xlu0 %v5234_v5  ;;  %v5762_v43 = vpop.permute.xlu1 %891  ;;  %v5764_v50 = vpop.permute.xlu2 %931 }
 0x173   : > { %8701 = vst [vmem:[#allocation69_spill] sm:$0xff] %v5762_v43  ;;  %1182 = vperm.xlu0 %4861, %v5392_v8   ;;  %v5767_v35 = vpop.permute.xlu0 %911 }
 0x174   : > { %8702 = vst [vmem:[#allocation70_spill] sm:$0xff] %v5764_v50 }
 0x175   : > { %8703 = vst [vmem:[#allocation71_spill] sm:$0xff] %v5767_v35 }
 0x179   : > { %1131 = vperm.xlu1 %4859, %v5485_v31   ;;  %1135 = vperm.xlu2 %4857, %v5482_v30  }
 0x17a   : > { %v5771_v53 = vpop.permute.xlu1 %903  ;;  %v5773_v56 = vpop.permute.xlu2 %943 }
 0x17b   : > { %8704 = vst [vmem:[#allocation72_spill] sm:$0xff] %v5771_v53  ;;  %1197 = vperm.xlu0 %4861, %v5404_v11   ;;  %v5776_v55 = vpop.permute.xlu0 %923 }
 0x17c   : > { %8705 = vst [vmem:[#allocation73_spill] sm:$0xff] %v5773_v56 }
 0x17d   : > { %8706 = vst [vmem:[#allocation74_spill] sm:$0xff] %v5776_v55 }
 0x181   : > { %1143 = vperm.xlu1 %4859, %v5494_v33   ;;  %4860 = vset.pattern.permute.xlu2 %v5234_v5 }
 0x182   : > { %v5779_v50 = vpop.permute.xlu1 %915  ;;  %1179 = vperm.xlu2 %4860, %v5377_v4  }
 0x183   : > { %8707 = vst [vmem:[#allocation75_spill] sm:$0xff] %v5779_v50  ;;  %1206 = vperm.xlu0 %4861, %v5416_v14   ;;  %v5783_v43 = vpop.permute.xlu0 %935  ;;  %v5785_v35 = vpop.permute.xlu2 %987 }
 0x184   : > { %8708 = vst [vmem:[#allocation76_spill] sm:$0xff] %v5783_v43 }
 0x185   : > { %8709 = vst [vmem:[#allocation77_spill] sm:$0xff] %v5785_v35 }
 0x189   : > { %4862 = vset.pattern.permute.xlu1 %v5234_v5 }
 0x18a   : > { %1185 = vperm.xlu1 %4862, %v5374_v3   ;;  %v5788_v56 = vpop.permute.xlu1 %927  ;;  %1188 = vperm.xlu2 %4860, %v5389_v7  }
 0x18b   : > { %8710 = vst [vmem:[#allocation78_spill] sm:$0xff] %v5788_v56  ;;  %1215 = vperm.xlu0 %4861, %v5428_v17   ;;  %v5792_v53 = vpop.permute.xlu0 %947  ;;  %v5794_v50 = vpop.permute.xlu2 %996 }
 0x18c   : > { %8711 = vst [vmem:[#allocation79_spill] sm:$0xff] %v5792_v53 }
 0x18d   : > { %8712 = vst [vmem:[#allocation80_spill] sm:$0xff] %v5794_v50 }
 0x192   : > { %1191 = vperm.xlu1 %4862, %v5371_v2   ;;  %v5797_v55 = vpop.permute.xlu1 %939  ;;  %1194 = vperm.xlu2 %4860, %v5386_v6  }
 0x193   : > { %8713 = vst [vmem:[#allocation81_spill] sm:$0xff] %v5797_v55  ;;  %1224 = vperm.xlu0 %4861, %v5440_v20   ;;  %v5801_v5 = vpop.permute.xlu2 %1002 }
 0x194   : > { %8714 = vst [vmem:[#allocation82_spill] sm:$0xff] %v5801_v5  ;;  %v5803_v35 = vpop.permute.xlu0 %990 }
 0x195   : > { %8715 = vst [vmem:[#allocation83_spill] sm:$0xff] %v5803_v35 }
 0x19a   : > { %1200 = vperm.xlu1 %4862, %v5401_v10   ;;  %v5806_v56 = vpop.permute.xlu1 %951  ;;  %1203 = vperm.xlu2 %4860, %v5398_v9  }
 0x19b   : > { %8716 = vst [vmem:[#allocation84_spill] sm:$0xff] %v5806_v56  ;;  %1283 = vperm.xlu0 %4861, %v5452_v23   ;;  %v5810_v50 = vpop.permute.xlu2 %1011 }
 0x19c   : > { %8717 = vst [vmem:[#allocation85_spill] sm:$0xff] %v5810_v50  ;;  %v5812_v53 = vpop.permute.xlu0 %1005 }
 0x19d   : > { %8718 = vst [vmem:[#allocation86_spill] sm:$0xff] %v5812_v53 }
 0x1a2   : > { %1209 = vperm.xlu1 %4862, %v5413_v13   ;;  %1212 = vperm.xlu2 %4860, %v5410_v12  }
 0x1a3   : > { %1295 = vperm.xlu0 %4861, %v5464_v26   ;;  %v5817_v55 = vpop.permute.xlu1 %993  ;;  %v5819_v35 = vpop.permute.xlu2 %1020 }
 0x1a4   : > { %8719 = vst [vmem:[#allocation87_spill] sm:$0xff] %v5817_v55  ;;  %v5821_v43 = vpop.permute.xlu0 %1014 }
 0x1a5   : > { %8720 = vst [vmem:[#allocation88_spill] sm:$0xff] %v5819_v35 }
 0x1a6   : > { %8721 = vst [vmem:[#allocation89_spill] sm:$0xff] %v5821_v43 }
 0x1aa   : > { %1218 = vperm.xlu1 %4862, %v5425_v16   ;;  %1221 = vperm.xlu2 %4860, %v5422_v15  }
 0x1ab   : > { %1307 = vperm.xlu0 %4861, %v5476_v29   ;;  %v5826_v56 = vpop.permute.xlu1 %999  ;;  %v5828_v53 = vpop.permute.xlu2 %1029 }
 0x1ac   : > { %8722 = vst [vmem:[#allocation90_spill] sm:$0xff] %v5826_v56  ;;  %v5830_v50 = vpop.permute.xlu0 %1023 }
 0x1ad   : > { %8723 = vst [vmem:[#allocation91_spill] sm:$0xff] %v5828_v53 }
 0x1ae   : > { %8724 = vst [vmem:[#allocation92_spill] sm:$0xff] %v5830_v50 }
 0x1b2   : > { %1275 = vperm.xlu1 %4862, %v5437_v19   ;;  %1279 = vperm.xlu2 %4860, %v5434_v18  }
 0x1b3   : > { %1319 = vperm.xlu0 %4861, %v5488_v32   ;;  %v5835_v35 = vpop.permute.xlu1 %1008  ;;  %v5837_v43 = vpop.permute.xlu2 %1087 }
 0x1b4   : > { %8725 = vst [vmem:[#allocation93_spill] sm:$0xff] %v5835_v35  ;;  %v5839_v55 = vpop.permute.xlu0 %1032  ;;  %v5235_v35 = vmov 5  }
 0x1b5   : > { %8726 = vst [vmem:[#allocation94_spill] sm:$0xff] %v5837_v43 }
 0x1b6   : > { %8727 = vst [vmem:[#allocation95_spill] sm:$0xff] %v5839_v55 }
 0x1ba   : > { %1287 = vperm.xlu1 %4862, %v5449_v22   ;;  %1291 = vperm.xlu2 %4860, %v5446_v21  }
 0x1bb   : > { %1331 = vperm.xlu0 %4861, %v5497_v34   ;;  %v5844_v56 = vpop.permute.xlu1 %1017  ;;  %v5846_v50 = vpop.permute.xlu2 %1099 }
 0x1bc   : > { %8728 = vst [vmem:[#allocation96_spill] sm:$0xff] %v5844_v56  ;;  %v5848_v53 = vpop.permute.xlu0 %1091 }
 0x1bd   : > { %8729 = vst [vmem:[#allocation97_spill] sm:$0xff] %v5846_v50 }
 0x1be   : > { %8730 = vst [vmem:[#allocation98_spill] sm:$0xff] %v5848_v53 }
 0x1c2   : > { %1299 = vperm.xlu1 %4862, %v5461_v25   ;;  %1303 = vperm.xlu2 %4860, %v5458_v24  }
 0x1c3   : > { %4864 = vset.pattern.permute.xlu0 %v5235_v35  ;;  %v5852_v43 = vpop.permute.xlu1 %1026  ;;  %v5854_v55 = vpop.permute.xlu2 %1111 }
 0x1c4   : > { %8731 = vst [vmem:[#allocation99_spill] sm:$0xff] %v5852_v43  ;;  %1374 = vperm.xlu0 %4864, %v5392_v8   ;;  %v5857_v5 = vpop.permute.xlu0 %1103 }
 0x1c5   : > { %8732 = vst [vmem:[#allocation100_spill] sm:$0xff] %v5854_v55 }
 0x1c6   : > { %8733 = vst [vmem:[#allocation101_spill] sm:$0xff] %v5857_v5 }
 0x1ca   : > { %1311 = vperm.xlu1 %4862, %v5473_v28   ;;  %1315 = vperm.xlu2 %4860, %v5470_v27  }
 0x1cb   : > { %v5861_v56 = vpop.permute.xlu1 %1083  ;;  %v5863_v50 = vpop.permute.xlu2 %1123 }
 0x1cc   : > { %8734 = vst [vmem:[#allocation102_spill] sm:$0xff] %v5861_v56  ;;  %1389 = vperm.xlu0 %4864, %v5404_v11   ;;  %v5866_v53 = vpop.permute.xlu0 %1115 }
 0x1cd   : > { %8735 = vst [vmem:[#allocation103_spill] sm:$0xff] %v5863_v50 }
 0x1ce   : > { %8736 = vst [vmem:[#allocation104_spill] sm:$0xff] %v5866_v53 }
 0x1d2   : > { %1323 = vperm.xlu1 %4862, %v5485_v31   ;;  %1327 = vperm.xlu2 %4860, %v5482_v30  }
 0x1d3   : > { %v5870_v43 = vpop.permute.xlu1 %1095  ;;  %v5872_v55 = vpop.permute.xlu2 %1135 }
 0x1d4   : > { %8737 = vst [vmem:[#allocation105_spill] sm:$0xff] %v5870_v43  ;;  %1398 = vperm.xlu0 %4864, %v5416_v14   ;;  %v5875_v5 = vpop.permute.xlu0 %1127 }
 0x1d5   : > { %8738 = vst [vmem:[#allocation106_spill] sm:$0xff] %v5872_v55 }
 0x1d6   : > { %8739 = vst [vmem:[#allocation107_spill] sm:$0xff] %v5875_v5 }
 0x1da   : > { %1335 = vperm.xlu1 %4862, %v5494_v33   ;;  %4863 = vset.pattern.permute.xlu2 %v5235_v35 }
 0x1db   : > { %v5878_v50 = vpop.permute.xlu1 %1107  ;;  %1371 = vperm.xlu2 %4863, %v5377_v4  }
 0x1dc   : > { %8740 = vst [vmem:[#allocation108_spill] sm:$0xff] %v5878_v50  ;;  %1407 = vperm.xlu0 %4864, %v5428_v17   ;;  %v5882_v56 = vpop.permute.xlu0 %1139  ;;  %v5884_v53 = vpop.permute.xlu2 %1179 }
 0x1dd   : > { %8741 = vst [vmem:[#allocation109_spill] sm:$0xff] %v5882_v56 }
 0x1de   : > { %8742 = vst [vmem:[#allocation110_spill] sm:$0xff] %v5884_v53 }
 0x1e2   : > { %4865 = vset.pattern.permute.xlu1 %v5235_v35 }
 0x1e3   : > { %1377 = vperm.xlu1 %4865, %v5374_v3   ;;  %v5887_v55 = vpop.permute.xlu1 %1119  ;;  %1380 = vperm.xlu2 %4863, %v5389_v7  }
 0x1e4   : > { %8743 = vst [vmem:[#allocation111_spill] sm:$0xff] %v5887_v55  ;;  %1416 = vperm.xlu0 %4864, %v5440_v20   ;;  %v5891_v43 = vpop.permute.xlu2 %1188 }
 0x1e5   : > { %8744 = vst [vmem:[#allocation112_spill] sm:$0xff] %v5891_v43  ;;  %v5893_v50 = vpop.permute.xlu0 %1182 }
 0x1e6   : > { %8745 = vst [vmem:[#allocation113_spill] sm:$0xff] %v5893_v50 }
 0x1eb   : > { %1383 = vperm.xlu1 %4865, %v5371_v2   ;;  %v5896_v5 = vpop.permute.xlu1 %1131  ;;  %1386 = vperm.xlu2 %4863, %v5386_v6  }
 0x1ec   : > { %8746 = vst [vmem:[#allocation114_spill] sm:$0xff] %v5896_v5  ;;  %1475 = vperm.xlu0 %4864, %v5452_v23   ;;  %v5900_v35 = vpop.permute.xlu2 %1194 }
 0x1ed   : > { %8747 = vst [vmem:[#allocation115_spill] sm:$0xff] %v5900_v35  ;;  %v5902_v53 = vpop.permute.xlu0 %1197 }
 0x1ee   : > { %8748 = vst [vmem:[#allocation116_spill] sm:$0xff] %v5902_v53 }
 0x1f3   : > { %1392 = vperm.xlu1 %4865, %v5401_v10   ;;  %v5905_v55 = vpop.permute.xlu1 %1143  ;;  %1395 = vperm.xlu2 %4863, %v5398_v9  }
 0x1f4   : > { %8749 = vst [vmem:[#allocation117_spill] sm:$0xff] %v5905_v55  ;;  %1487 = vperm.xlu0 %4864, %v5464_v26   ;;  %v5909_v43 = vpop.permute.xlu2 %1203 }
 0x1f5   : > { %8750 = vst [vmem:[#allocation118_spill] sm:$0xff] %v5909_v43  ;;  %v5911_v50 = vpop.permute.xlu0 %1206 }
 0x1f6   : > { %8751 = vst [vmem:[#allocation119_spill] sm:$0xff] %v5911_v50 }
 0x1fb   : > { %1401 = vperm.xlu1 %4865, %v5413_v13   ;;  %1404 = vperm.xlu2 %4863, %v5410_v12  }
 0x1fc   : > { %1499 = vperm.xlu0 %4864, %v5476_v29   ;;  %v5916_v5 = vpop.permute.xlu1 %1185  ;;  %v5918_v53 = vpop.permute.xlu2 %1212 }
 0x1fd   : > { %8752 = vst [vmem:[#allocation120_spill] sm:$0xff] %v5916_v5  ;;  %v5920_v56 = vpop.permute.xlu0 %1215 }
 0x1fe   : > { %8753 = vst [vmem:[#allocation121_spill] sm:$0xff] %v5918_v53 }
 0x1ff   : > { %8754 = vst [vmem:[#allocation122_spill] sm:$0xff] %v5920_v56 }
 0x203   : > { %1410 = vperm.xlu1 %4865, %v5425_v16   ;;  %1413 = vperm.xlu2 %4863, %v5422_v15  }
 0x204   : > { %1511 = vperm.xlu0 %4864, %v5488_v32   ;;  %v5925_v55 = vpop.permute.xlu1 %1191  ;;  %v5927_v50 = vpop.permute.xlu2 %1221 }
 0x205   : > { %8755 = vst [vmem:[#allocation123_spill] sm:$0xff] %v5925_v55  ;;  %v5929_v43 = vpop.permute.xlu0 %1224  ;;  %v5236_v55 = vmov 6  }
 0x206   : > { %8756 = vst [vmem:[#allocation124_spill] sm:$0xff] %v5927_v50 }
 0x207   : > { %8757 = vst [vmem:[#allocation125_spill] sm:$0xff] %v5929_v43 }
 0x20b   : > { %1467 = vperm.xlu1 %4865, %v5437_v19   ;;  %1471 = vperm.xlu2 %4863, %v5434_v18  }
 0x20c   : > { %1523 = vperm.xlu0 %4864, %v5497_v34   ;;  %v5934_v53 = vpop.permute.xlu1 %1200  ;;  %v5936_v56 = vpop.permute.xlu2 %1279 }
 0x20d   : > { %8758 = vst [vmem:[#allocation126_spill] sm:$0xff] %v5934_v53  ;;  %v5938_v5 = vpop.permute.xlu0 %1283 }
 0x20e   : > { %8759 = vst [vmem:[#allocation127_spill] sm:$0xff] %v5936_v56 }
 0x20f   : > { %8760 = vst [vmem:[#allocation128_spill] sm:$0xff] %v5938_v5 }
 0x213   : > { %1479 = vperm.xlu1 %4865, %v5449_v22   ;;  %1483 = vperm.xlu2 %4863, %v5446_v21  }
 0x214   : > { %4867 = vset.pattern.permute.xlu0 %v5236_v55  ;;  %v5942_v50 = vpop.permute.xlu1 %1209  ;;  %v5944_v43 = vpop.permute.xlu2 %1291 }
 0x215   : > { %8761 = vst [vmem:[#allocation129_spill] sm:$0xff] %v5942_v50  ;;  %1566 = vperm.xlu0 %4867, %v5392_v8   ;;  %v5947_v35 = vpop.permute.xlu0 %1295 }
 0x216   : > { %8762 = vst [vmem:[#allocation130_spill] sm:$0xff] %v5944_v43 }
 0x217   : > { %8763 = vst [vmem:[#allocation131_spill] sm:$0xff] %v5947_v35 }
 0x21b   : > { %1491 = vperm.xlu1 %4865, %v5461_v25   ;;  %1495 = vperm.xlu2 %4863, %v5458_v24  }
 0x21c   : > { %v5951_v53 = vpop.permute.xlu1 %1218  ;;  %v5953_v56 = vpop.permute.xlu2 %1303 }
 0x21d   : > { %8764 = vst [vmem:[#allocation132_spill] sm:$0xff] %v5951_v53  ;;  %1581 = vperm.xlu0 %4867, %v5404_v11   ;;  %v5956_v5 = vpop.permute.xlu0 %1307 }
 0x21e   : > { %8765 = vst [vmem:[#allocation133_spill] sm:$0xff] %v5953_v56 }
 0x21f   : > { %8766 = vst [vmem:[#allocation134_spill] sm:$0xff] %v5956_v5 }
 0x223   : > { %1503 = vperm.xlu1 %4865, %v5473_v28   ;;  %1507 = vperm.xlu2 %4863, %v5470_v27  }
 0x224   : > { %v5960_v50 = vpop.permute.xlu1 %1275  ;;  %v5962_v43 = vpop.permute.xlu2 %1315 }
 0x225   : > { %8767 = vst [vmem:[#allocation135_spill] sm:$0xff] %v5960_v50  ;;  %1590 = vperm.xlu0 %4867, %v5416_v14   ;;  %v5965_v35 = vpop.permute.xlu0 %1319 }
 0x226   : > { %8768 = vst [vmem:[#allocation136_spill] sm:$0xff] %v5962_v43 }
 0x227   : > { %8769 = vst [vmem:[#allocation137_spill] sm:$0xff] %v5965_v35 }
 0x22b   : > { %1515 = vperm.xlu1 %4865, %v5485_v31   ;;  %1519 = vperm.xlu2 %4863, %v5482_v30  }
 0x22c   : > { %v5969_v53 = vpop.permute.xlu1 %1287  ;;  %v5971_v56 = vpop.permute.xlu2 %1327 }
 0x22d   : > { %8770 = vst [vmem:[#allocation138_spill] sm:$0xff] %v5969_v53  ;;  %1599 = vperm.xlu0 %4867, %v5428_v17   ;;  %v5974_v5 = vpop.permute.xlu0 %1331 }
 0x22e   : > { %8771 = vst [vmem:[#allocation139_spill] sm:$0xff] %v5971_v56 }
 0x22f   : > { %8772 = vst [vmem:[#allocation140_spill] sm:$0xff] %v5974_v5 }
 0x233   : > { %1527 = vperm.xlu1 %4865, %v5494_v33   ;;  %4866 = vset.pattern.permute.xlu2 %v5236_v55 }
 0x234   : > { %v5977_v43 = vpop.permute.xlu1 %1299  ;;  %1563 = vperm.xlu2 %4866, %v5377_v4  }
 0x235   : > { %8773 = vst [vmem:[#allocation141_spill] sm:$0xff] %v5977_v43  ;;  %1608 = vperm.xlu0 %4867, %v5440_v20   ;;  %v5981_v50 = vpop.permute.xlu2 %1371 }
 0x236   : > { %8774 = vst [vmem:[#allocation142_spill] sm:$0xff] %v5981_v50  ;;  %v5983_v35 = vpop.permute.xlu0 %1374 }
 0x237   : > { %8775 = vst [vmem:[#allocation143_spill] sm:$0xff] %v5983_v35 }
 0x23b   : > { %4868 = vset.pattern.permute.xlu1 %v5236_v55 }
 0x23c   : > { %1569 = vperm.xlu1 %4868, %v5374_v3   ;;  %v5986_v56 = vpop.permute.xlu1 %1311  ;;  %1572 = vperm.xlu2 %4866, %v5389_v7  }
 0x23d   : > { %8776 = vst [vmem:[#allocation144_spill] sm:$0xff] %v5986_v56  ;;  %1667 = vperm.xlu0 %4867, %v5452_v23   ;;  %v5990_v53 = vpop.permute.xlu2 %1380 }
 0x23e   : > { %8777 = vst [vmem:[#allocation145_spill] sm:$0xff] %v5990_v53  ;;  %v5992_v43 = vpop.permute.xlu0 %1389 }
 0x23f   : > { %8778 = vst [vmem:[#allocation146_spill] sm:$0xff] %v5992_v43 }
 0x244   : > { %1575 = vperm.xlu1 %4868, %v5371_v2   ;;  %v5995_v5 = vpop.permute.xlu1 %1323  ;;  %1578 = vperm.xlu2 %4866, %v5386_v6  }
 0x245   : > { %8779 = vst [vmem:[#allocation147_spill] sm:$0xff] %v5995_v5  ;;  %1679 = vperm.xlu0 %4867, %v5464_v26   ;;  %v5999_v55 = vpop.permute.xlu2 %1386 }
 0x246   : > { %8780 = vst [vmem:[#allocation148_spill] sm:$0xff] %v5999_v55  ;;  %v6001_v50 = vpop.permute.xlu0 %1398  ;;  %v5237_v55 = vmov 7  }
 0x247   : > { %8781 = vst [vmem:[#allocation149_spill] sm:$0xff] %v6001_v50 }
 0x24c   : > { %1584 = vperm.xlu1 %4868, %v5401_v10   ;;  %v6004_v35 = vpop.permute.xlu1 %1335  ;;  %1587 = vperm.xlu2 %4866, %v5398_v9  }
 0x24d   : > { %8782 = vst [vmem:[#allocation150_spill] sm:$0xff] %v6004_v35  ;;  %1691 = vperm.xlu0 %4867, %v5476_v29   ;;  %v6008_v43 = vpop.permute.xlu2 %1395 }
 0x24e   : > { %8783 = vst [vmem:[#allocation151_spill] sm:$0xff] %v6008_v43  ;;  %v6010_v53 = vpop.permute.xlu0 %1407 }
 0x24f   : > { %8784 = vst [vmem:[#allocation152_spill] sm:$0xff] %v6010_v53 }
 0x254   : > { %1593 = vperm.xlu1 %4868, %v5413_v13   ;;  %1596 = vperm.xlu2 %4866, %v5410_v12  }
 0x255   : > { %1703 = vperm.xlu0 %4867, %v5488_v32   ;;  %v6015_v5 = vpop.permute.xlu1 %1377  ;;  %v6017_v56 = vpop.permute.xlu2 %1404 }
 0x256   : > { %8785 = vst [vmem:[#allocation153_spill] sm:$0xff] %v6015_v5  ;;  %v6019_v50 = vpop.permute.xlu0 %1416 }
 0x257   : > { %8786 = vst [vmem:[#allocation154_spill] sm:$0xff] %v6017_v56 }
 0x258   : > { %8787 = vst [vmem:[#allocation155_spill] sm:$0xff] %v6019_v50 }
 0x25c   : > { %1602 = vperm.xlu1 %4868, %v5425_v16   ;;  %1605 = vperm.xlu2 %4866, %v5422_v15  }
 0x25d   : > { %1715 = vperm.xlu0 %4867, %v5497_v34   ;;  %v6024_v35 = vpop.permute.xlu1 %1383  ;;  %v6026_v53 = vpop.permute.xlu2 %1413 }
 0x25e   : > { %8788 = vst [vmem:[#allocation156_spill] sm:$0xff] %v6024_v35  ;;  %v6028_v43 = vpop.permute.xlu0 %1475 }
 0x25f   : > { %8789 = vst [vmem:[#allocation157_spill] sm:$0xff] %v6026_v53 }
 0x260   : > { %8790 = vst [vmem:[#allocation158_spill] sm:$0xff] %v6028_v43 }
 0x264   : > { %1659 = vperm.xlu1 %4868, %v5437_v19   ;;  %1663 = vperm.xlu2 %4866, %v5434_v18  }
 0x265   : > { %4870 = vset.pattern.permute.xlu0 %v5237_v55  ;;  %v6032_v56 = vpop.permute.xlu1 %1392  ;;  %v6034_v50 = vpop.permute.xlu2 %1471 }
 0x266   : > { %8791 = vst [vmem:[#allocation159_spill] sm:$0xff] %v6032_v56  ;;  %1758 = vperm.xlu0 %4870, %v5392_v8   ;;  %v6037_v5 = vpop.permute.xlu0 %1487 }
 0x267   : > { %8792 = vst [vmem:[#allocation160_spill] sm:$0xff] %v6034_v50 }
 0x268   : > { %8793 = vst [vmem:[#allocation161_spill] sm:$0xff] %v6037_v5 }
 0x26c   : > { %1671 = vperm.xlu1 %4868, %v5449_v22   ;;  %1675 = vperm.xlu2 %4866, %v5446_v21  }
 0x26d   : > { %v6041_v35 = vpop.permute.xlu1 %1401  ;;  %v6043_v43 = vpop.permute.xlu2 %1483 }
 0x26e   : > { %8794 = vst [vmem:[#allocation162_spill] sm:$0xff] %v6041_v35  ;;  %1773 = vperm.xlu0 %4870, %v5404_v11   ;;  %v6046_v53 = vpop.permute.xlu0 %1499 }
 0x26f   : > { %8795 = vst [vmem:[#allocation163_spill] sm:$0xff] %v6043_v43 }
 0x270   : > { %8796 = vst [vmem:[#allocation164_spill] sm:$0xff] %v6046_v53 }
 0x274   : > { %1683 = vperm.xlu1 %4868, %v5461_v25   ;;  %1687 = vperm.xlu2 %4866, %v5458_v24  }
 0x275   : > { %v6050_v56 = vpop.permute.xlu1 %1410  ;;  %v6052_v50 = vpop.permute.xlu2 %1495 }
 0x276   : > { %8797 = vst [vmem:[#allocation165_spill] sm:$0xff] %v6050_v56  ;;  %1782 = vperm.xlu0 %4870, %v5416_v14   ;;  %v6055_v5 = vpop.permute.xlu0 %1511 }
 0x277   : > { %8798 = vst [vmem:[#allocation166_spill] sm:$0xff] %v6052_v50 }
 0x278   : > { %8799 = vst [vmem:[#allocation167_spill] sm:$0xff] %v6055_v5 }
 0x27c   : > { %1695 = vperm.xlu1 %4868, %v5473_v28   ;;  %1699 = vperm.xlu2 %4866, %v5470_v27  }
 0x27d   : > { %v6059_v35 = vpop.permute.xlu1 %1467  ;;  %v6061_v43 = vpop.permute.xlu2 %1507 }
 0x27e   : > { %8800 = vst [vmem:[#allocation168_spill] sm:$0xff] %v6059_v35  ;;  %1791 = vperm.xlu0 %4870, %v5428_v17   ;;  %v6064_v53 = vpop.permute.xlu0 %1523 }
 0x27f   : > { %8801 = vst [vmem:[#allocation169_spill] sm:$0xff] %v6061_v43 }
 0x280   : > { %8802 = vst [vmem:[#allocation170_spill] sm:$0xff] %v6064_v53 }
 0x284   : > { %1707 = vperm.xlu1 %4868, %v5485_v31   ;;  %1711 = vperm.xlu2 %4866, %v5482_v30  }
 0x285   : > { %v6068_v56 = vpop.permute.xlu1 %1479  ;;  %v6070_v50 = vpop.permute.xlu2 %1519 }
 0x286   : > { %8803 = vst [vmem:[#allocation171_spill] sm:$0xff] %v6068_v56  ;;  %1800 = vperm.xlu0 %4870, %v5440_v20  }
 0x287   : > { %8804 = vst [vmem:[#allocation172_spill] sm:$0xff] %v6070_v50  ;;  %v6073_v5 = vpop.permute.xlu0 %1566 }
 0x288   : > { %8805 = vst [vmem:[#allocation173_spill] sm:$0xff] %v6073_v5 }
 0x28c   : > { %1719 = vperm.xlu1 %4868, %v5494_v33   ;;  %4869 = vset.pattern.permute.xlu2 %v5237_v55 }
 0x28d   : > { %v6076_v43 = vpop.permute.xlu1 %1491  ;;  %1755 = vperm.xlu2 %4869, %v5377_v4  }
 0x28e   : > { %8806 = vst [vmem:[#allocation174_spill] sm:$0xff] %v6076_v43  ;;  %1859 = vperm.xlu0 %4870, %v5452_v23   ;;  %v6080_v35 = vpop.permute.xlu2 %1563 }
 0x28f   : > { %8807 = vst [vmem:[#allocation175_spill] sm:$0xff] %v6080_v35  ;;  %v6082_v53 = vpop.permute.xlu0 %1581 }
 0x290   : > { %8808 = vst [vmem:[#allocation176_spill] sm:$0xff] %v6082_v53 }
 0x294   : > { %4871 = vset.pattern.permute.xlu1 %v5237_v55 }
 0x295   : > { %1761 = vperm.xlu1 %4871, %v5374_v3   ;;  %v6085_v50 = vpop.permute.xlu1 %1503  ;;  %1764 = vperm.xlu2 %4869, %v5389_v7  }
 0x296   : > { %8809 = vst [vmem:[#allocation177_spill] sm:$0xff] %v6085_v50  ;;  %1871 = vperm.xlu0 %4870, %v5464_v26   ;;  %v6089_v56 = vpop.permute.xlu2 %1572 }
 0x297   : > { %8810 = vst [vmem:[#allocation178_spill] sm:$0xff] %v6089_v56  ;;  %v6091_v43 = vpop.permute.xlu0 %1590 }
 0x298   : > { %8811 = vst [vmem:[#allocation179_spill] sm:$0xff] %v6091_v43  ;;  %v6291_v43 = vld [vmem:[%s5363_s30 + $0x20] sm:$0xff] }
 0x29d   : > { %1767 = vperm.xlu1 %4871, %v5371_v2   ;;  %v6094_v4 = vpop.permute.xlu1 %1515  ;;  %1770 = vperm.xlu2 %4869, %v5386_v6  }
 0x29e   : > { %8812 = vst [vmem:[#allocation180_spill] sm:$0xff] %v6094_v4  ;;  %1883 = vperm.xlu0 %4870, %v5476_v29   ;;  %v6098_v55 = vpop.permute.xlu2 %1578  ;;  %v6269_v4 = vld [vmem:[%s5363_s30] sm:$0xff] }
 0x29f   : > { %8813 = vst [vmem:[#allocation181_spill] sm:$0xff] %v6098_v55  ;;  %v6100_v3 = vpop.permute.xlu0 %1599 }
 0x2a0   : > { %8814 = vst [vmem:[#allocation182_spill] sm:$0xff] %v6100_v3 }
 0x2a5   : > { %1776 = vperm.xlu1 %4871, %v5401_v10   ;;  %v6103_v7 = vpop.permute.xlu1 %1527  ;;  %1779 = vperm.xlu2 %4869, %v5398_v9   ;;  %v5238_v9 = vmov 8  }
 0x2a6   : > { %8815 = vst [vmem:[#allocation183_spill] sm:$0xff] %v6103_v7  ;;  %1895 = vperm.xlu0 %4870, %v5488_v32   ;;  %v6107_v53 = vpop.permute.xlu2 %1587 }
 0x2a7   : > { %8816 = vst [vmem:[#allocation184_spill] sm:$0xff] %v6107_v53  ;;  %v6109_v2 = vpop.permute.xlu0 %1608 }
 0x2a8   : > { %8817 = vst [vmem:[#allocation185_spill] sm:$0xff] %v6109_v2  ;;  %v6263_v2 = vld [vmem:[%s5358_s27 + $0x30] sm:$0xff] }
 0x2ad   : > { %1785 = vperm.xlu1 %4871, %v5413_v13   ;;  %1788 = vperm.xlu2 %4869, %v5410_v12  }
 0x2ae   : > { %1907 = vperm.xlu0 %4870, %v5497_v34   ;;  %v6114_v6 = vpop.permute.xlu1 %1569  ;;  %v6116_v56 = vpop.permute.xlu2 %1596 }
 0x2af   : > { %8818 = vst [vmem:[#allocation186_spill] sm:$0xff] %v6114_v6  ;;  %v6118_v10 = vpop.permute.xlu0 %1667 }
 0x2b0   : > { %8819 = vst [vmem:[#allocation187_spill] sm:$0xff] %v6116_v56  ;;  %v8872_v56 = vmov 9  }
 0x2b1   : > { %8820 = vst [vmem:[#allocation188_spill] sm:$0xff] %v6118_v10 }
 0x2b5   : > { %1794 = vperm.xlu1 %4871, %v5425_v16   ;;  %1797 = vperm.xlu2 %4869, %v5422_v15  }
 0x2b6   : > { %4873 = vset.pattern.permute.xlu0 %v5238_v9  ;;  %v6122_v35 = vpop.permute.xlu1 %1575  ;;  %v6124_v5 = vpop.permute.xlu2 %1605 }
 0x2b7   : > { %8821 = vst [vmem:[#allocation189_spill] sm:$0xff] %v6122_v35  ;;  %1950 = vperm.xlu0 %4873, %v5392_v8   ;;  %v6127_v12 = vpop.permute.xlu0 %1679  ;;  %v6232_v35 = vld [vmem:[%s5358_s27 + $0x50] sm:$0xff] }
 0x2b8   : > { %8822 = vst [vmem:[#allocation190_spill] sm:$0xff] %v6124_v5  ;;  %v6341_v5 = vld [vmem:[%s5363_s30 + $0x60] sm:$0xff] }
 0x2b9   : > { %8823 = vst [vmem:[#allocation191_spill] sm:$0xff] %v6127_v12 }
 0x2bd   : > { %1851 = vperm.xlu1 %4871, %v5437_v19   ;;  %1855 = vperm.xlu2 %4869, %v5434_v18  }
 0x2be   : > { %v6131_v13 = vpop.permute.xlu1 %1584  ;;  %v6133_v7 = vpop.permute.xlu2 %1663 }
 0x2bf   : > { %8824 = vst [vmem:[#allocation192_spill] sm:$0xff] %v6131_v13  ;;  %1965 = vperm.xlu0 %4873, %v5404_v11   ;;  %v6136_v15 = vpop.permute.xlu0 %1691  ;;  %v6223_v13 = vld [vmem:[%s5358_s27 + $0x40] sm:$0xff] }
 0x2c0   : > { %8825 = vst [vmem:[#allocation193_spill] sm:$0xff] %v6133_v7  ;;  %v6245_v7 = vld [vmem:[%s5358_s27 + $0x8] sm:$0xff] }
 0x2c1   : > { %8826 = vst [vmem:[#allocation194_spill] sm:$0xff] %v6136_v15  ;;  %v6345_v15 = vld [vmem:[%s5363_s30 + $0x68] sm:$0xff] }
 0x2c5   : > { %1863 = vperm.xlu1 %4871, %v5449_v22   ;;  %1867 = vperm.xlu2 %4869, %v5446_v21  }
 0x2c6   : > { %v6140_v16 = vpop.permute.xlu1 %1593  ;;  %v6142_v8 = vpop.permute.xlu2 %1675 }
 0x2c7   : > { %8827 = vst [vmem:[#allocation195_spill] sm:$0xff] %v6140_v16  ;;  %1974 = vperm.xlu0 %4873, %v5416_v14   ;;  %v6145_v19 = vpop.permute.xlu0 %1703  ;;  %v6208_v16 = vld [vmem:[%s5358_s27 + $0x28] sm:$0xff] }
 0x2c8   : > { %8828 = vst [vmem:[#allocation196_spill] sm:$0xff] %v6142_v8 }
 0x2c9   : > { %8829 = vst [vmem:[#allocation197_spill] sm:$0xff] %v6145_v19  ;;  %v6323_v19 = vld [vmem:[%s5363_s30 + $0x48] sm:$0xff] }
 0x2cd   : > { %1875 = vperm.xlu1 %4871, %v5461_v25   ;;  %1879 = vperm.xlu2 %4869, %v5458_v24  }
 0x2ce   : > { %v6149_v18 = vpop.permute.xlu1 %1602  ;;  %v6151_v11 = vpop.permute.xlu2 %1687 }
 0x2cf   : > { %8830 = vst [vmem:[#allocation198_spill] sm:$0xff] %v6149_v18  ;;  %1983 = vperm.xlu0 %4873, %v5428_v17   ;;  %v6154_v22 = vpop.permute.xlu0 %1715 }
 0x2d0   : > { %8831 = vst [vmem:[#allocation199_spill] sm:$0xff] %v6151_v11  ;;  %v6217_v11 = vld [vmem:[%s5358_s27 + $0x38] sm:$0xff] }
 0x2d1   : > { %8832 = vst [vmem:[#allocation200_spill] sm:$0xff] %v6154_v22 }
 0x2d5   : > { %1887 = vperm.xlu1 %4871, %v5473_v28   ;;  %1891 = vperm.xlu2 %4869, %v5470_v27   ;;  %v6178_v28 = vld [vmem:[%s5358_s27] sm:$0xff] }
 0x2d6   : > { %v6158_v14 = vpop.permute.xlu1 %1659  ;;  %v6160_v21 = vpop.permute.xlu2 %1699 }
 0x2d7   : > { %8833 = vst [vmem:[#allocation201_spill] sm:$0xff] %v6158_v14  ;;  %1992 = vperm.xlu0 %4873, %v5440_v20  }
 0x2d8   : > { %8834 = vst [vmem:[#allocation202_spill] sm:$0xff] %v6160_v21  ;;  %v6163_v24 = vpop.permute.xlu0 %1758  ;;  %v6202_v21 = vld [vmem:[%s5358_s27 + $0x20] sm:$0xff] }
 0x2d9   : > { %8835 = vst [vmem:[#allocation203_spill] sm:$0xff] %v6163_v24  ;;  %v6251_v24 = vld [vmem:[%s5358_s27 + $0x68] sm:$0xff] }
 0x2dd   : > { %1899 = vperm.xlu1 %4871, %v5485_v31   ;;  %1903 = vperm.xlu2 %4869, %v5482_v30  }
 0x2de   : > { %v6167_v17 = vpop.permute.xlu1 %1671  ;;  %v6169_v25 = vpop.permute.xlu2 %1711 }
 0x2df   : > { %8836 = vst [vmem:[#allocation204_spill] sm:$0xff] %v6167_v17  ;;  %2051 = vperm.xlu0 %4873, %v5452_v23   ;;  %v6187_v23 = vld [vmem:[%s5358_s27 + $0x10] sm:$0xff]  ;;  %v6236_v17 = vld [vmem:[%s5358_s27 + $0x58] sm:$0xff] }
 0x2e0   : > { %8837 = vst [vmem:[#allocation205_spill] sm:$0xff] %v6169_v25  ;;  %v6172_v27 = vpop.permute.xlu0 %1773  ;;  %v6193_v25 = vld [vmem:[%s5358_s27 + $0x18] sm:$0xff] }
 0x2e1   : > { %8838 = vst [vmem:[#allocation206_spill] sm:$0xff] %v6172_v27 }
 0x2e5   : > { %1911 = vperm.xlu1 %4871, %v5494_v33   ;;  %4872 = vset.pattern.permute.xlu2 %v5238_v9 }
 0x2e6   : > { %v6175_v20 = vpop.permute.xlu1 %1683  ;;  %1947 = vperm.xlu2 %4872, %v6178_v28  }
 0x2e7   : > { %8839 = vst [vmem:[#allocation207_spill] sm:$0xff] %v6175_v20  ;;  %2063 = vperm.xlu0 %4873, %v5464_v26   ;;  %v6182_v30 = vpop.permute.xlu2 %1755 }
 0x2e8   : > { %8840 = vst [vmem:[#allocation208_spill] sm:$0xff] %v6182_v30  ;;  %v6184_v31 = vpop.permute.xlu0 %1782 }
 0x2e9   : > { %8841 = vst [vmem:[#allocation209_spill] sm:$0xff] %v6184_v31  ;;  %v6287_v31 = vld [vmem:[%s5363_s30 + $0x18] sm:$0xff] }
 0x2ed   : > { %4874 = vset.pattern.permute.xlu1 %v5238_v9 }
 0x2ee   : > { %1953 = vperm.xlu1 %4874, %v6187_v23   ;;  %v6190_v33 = vpop.permute.xlu1 %1695  ;;  %1956 = vperm.xlu2 %4872, %v6193_v25  }
 0x2ef   : > { %8842 = vst [vmem:[#allocation210_spill] sm:$0xff] %v6190_v33  ;;  %2075 = vperm.xlu0 %4873, %v5476_v29   ;;  %v6197_v26 = vpop.permute.xlu2 %1764  ;;  %v6281_v33 = vld [vmem:[%s5358_s27 + $0x48] sm:$0xff] }
 0x2f0   : > { %8843 = vst [vmem:[#allocation211_spill] sm:$0xff] %v6197_v26  ;;  %v6199_v18 = vpop.permute.xlu0 %1791  ;;  %v8612_v26 = vmov 9  }
 0x2f1   : > { %8844 = vst [vmem:[#allocation212_spill] sm:$0xff] %v6199_v18  ;;  %v6273_v18 = vld [vmem:[%s5363_s30 + $0x8] sm:$0xff] }
 0x2f6   : > { %1959 = vperm.xlu1 %4874, %v6202_v21   ;;  %v6205_v9 = vpop.permute.xlu1 %1707  ;;  %1962 = vperm.xlu2 %4872, %v6208_v16  }
 0x2f7   : > { %8845 = vst [vmem:[#allocation213_spill] sm:$0xff] %v6205_v9  ;;  %2087 = vperm.xlu0 %4873, %v5488_v32   ;;  %v6212_v20 = vpop.permute.xlu2 %1770 }
 0x2f8   : > { %8846 = vst [vmem:[#allocation214_spill] sm:$0xff] %v6212_v20  ;;  %v6214_v29 = vpop.permute.xlu0 %1800 }
 0x2f9   : > { %8847 = vst [vmem:[#allocation215_spill] sm:$0xff] %v6214_v29 }
 0x2fe   : > { %1968 = vperm.xlu1 %4874, %v6217_v11   ;;  %v6220_v27 = vpop.permute.xlu1 %1719  ;;  %1971 = vperm.xlu2 %4872, %v6223_v13  }
 0x2ff   : > { %8848 = vst [vmem:[#allocation216_spill] sm:$0xff] %v6220_v27  ;;  %2099 = vperm.xlu0 %4873, %v5497_v34   ;;  %v6227_v32 = vpop.permute.xlu2 %1779  ;;  %v6255_v27 = vld [vmem:[%s5358_s27 + $0x70] sm:$0xff] }
 0x300   : > { %8849 = vst [vmem:[#allocation217_spill] sm:$0xff] %v6227_v32  ;;  %v6229_v8 = vpop.permute.xlu0 %1859 }
 0x301   : > { %8850 = vst [vmem:[#allocation218_spill] sm:$0xff] %v6229_v8  ;;  %v6309_v8 = vld [vmem:[%s5363_s30 + $0x38] sm:$0xff] }
 0x306   : > { %1977 = vperm.xlu1 %4874, %v6232_v35   ;;  %1980 = vperm.xlu2 %4872, %v6236_v17  }
 0x307   : > { %4876 = vset.pattern.permute.xlu0 %v8612_v26  ;;  %v6240_v14 = vpop.permute.xlu1 %1761  ;;  %v6242_v34 = vpop.permute.xlu2 %1788 }
 0x308   : > { %8851 = vst [vmem:[#allocation219_spill] sm:$0xff] %v6240_v14  ;;  %2142 = vperm.xlu0 %4876, %v6245_v7   ;;  %v6248_v30 = vpop.permute.xlu0 %1871 }
 0x309   : > { %8852 = vst [vmem:[#allocation220_spill] sm:$0xff] %v6242_v34  ;;  %v6317_v34 = vld [vmem:[%s5358_s27 + $0x78] sm:$0xff] }
 0x30a   : > { %8853 = vst [vmem:[#allocation221_spill] sm:$0xff] %v6248_v30 }
 0x30e   : > { %1986 = vperm.xlu1 %4874, %v6251_v24   ;;  %1989 = vperm.xlu2 %4872, %v6255_v27  }
 0x30f   : > { %v6258_v26 = vpop.permute.xlu1 %1767  ;;  %v6260_v29 = vpop.permute.xlu2 %1797 }
 0x310   : > { %8854 = vst [vmem:[#allocation222_spill] sm:$0xff] %v6258_v26  ;;  %2157 = vperm.xlu0 %4876, %v6263_v2   ;;  %v6266_v9 = vpop.permute.xlu0 %1883 }
 0x311   : > { %8855 = vst [vmem:[#allocation223_spill] sm:$0xff] %v6260_v29  ;;  %v6299_v29 = vld [vmem:[%s5358_s27 + $0x60] sm:$0xff] }
 0x312   : > { %8856 = vst [vmem:[#allocation224_spill] sm:$0xff] %v6266_v9  ;;  %v6327_v9 = vld [vmem:[%s5363_s30 + $0x50] sm:$0xff] }
 0x316   : > { %2043 = vperm.xlu1 %4874, %v6269_v4   ;;  %2047 = vperm.xlu2 %4872, %v6273_v18  }
 0x317   : > { %v6276_v26 = vpop.permute.xlu1 %1776  ;;  %v6278_v3 = vpop.permute.xlu2 %1855 }
 0x318   : > { %8857 = vst [vmem:[#allocation225_spill] sm:$0xff] %v6276_v26  ;;  %2166 = vperm.xlu0 %4876, %v6281_v33   ;;  %v6284_v50 = vpop.permute.xlu0 %1895 }
 0x319   : > { %8858 = vst [vmem:[#allocation226_spill] sm:$0xff] %v6278_v3 }
 0x31a   : > { %8859 = vst [vmem:[#allocation227_spill] sm:$0xff] %v6284_v50  ;;  %v6305_v50 = vld [vmem:[%s5363_s30 + $0x30] sm:$0xff] }
 0x31e   : > { %2055 = vperm.xlu1 %4874, %v6287_v31   ;;  %2059 = vperm.xlu2 %4872, %v6291_v43  }
 0x31f   : > { %v6294_v26 = vpop.permute.xlu1 %1785  ;;  %v6296_v3 = vpop.permute.xlu2 %1867 }
 0x320   : > { %8860 = vst [vmem:[#allocation228_spill] sm:$0xff] %v6294_v26  ;;  %2175 = vperm.xlu0 %4876, %v6299_v29   ;;  %v6302_v22 = vpop.permute.xlu0 %1907 }
 0x321   : > { %8861 = vst [vmem:[#allocation229_spill] sm:$0xff] %v6296_v3 }
 0x322   : > { %8862 = vst [vmem:[#allocation230_spill] sm:$0xff] %v6302_v22 }
 0x326   : > { %2067 = vperm.xlu1 %4874, %v6305_v50   ;;  %2071 = vperm.xlu2 %4872, %v6309_v8  }
 0x327   : > { %v6312_v26 = vpop.permute.xlu1 %1794  ;;  %v6314_v3 = vpop.permute.xlu2 %1879 }
 0x328   : > { %8863 = vst [vmem:[#allocation231_spill] sm:$0xff] %v6312_v26  ;;  %2184 = vperm.xlu0 %4876, %v6317_v34  }
 0x329   : > { %8864 = vst [vmem:[#allocation232_spill] sm:$0xff] %v6314_v3  ;;  %v6320_v22 = vpop.permute.xlu0 %1950  ;;  %v6335_v3 = vld [vmem:[%s5363_s30 + $0x10] sm:$0xff] }
 0x32a   : > { %8865 = vst [vmem:[#allocation233_spill] sm:$0xff] %v6320_v22 }
 0x32e   : > { %2079 = vperm.xlu1 %4874, %v6323_v19   ;;  %2083 = vperm.xlu2 %4872, %v6327_v9  }
 0x32f   : > { %v6330_v26 = vpop.permute.xlu1 %1851  ;;  %v6332_v14 = vpop.permute.xlu2 %1891 }
 0x330   : > { %8866 = vst [vmem:[#allocation234_spill] sm:$0xff] %v6330_v26  ;;  %2243 = vperm.xlu0 %4876, %v6335_v3  }
 0x331   : > { %8867 = vst [vmem:[#allocation235_spill] sm:$0xff] %v6332_v14  ;;  %v6338_v22 = vpop.permute.xlu0 %1965  ;;  %v6353_v14 = vld [vmem:[%s5363_s30 + $0x28] sm:$0xff] }
 0x332   : > { %8868 = vst [vmem:[#allocation236_spill] sm:$0xff] %v6338_v22  ;;  %v6359_v22 = vld [vmem:[%s5363_s30 + $0x78] sm:$0xff] }
 0x336   : > { %2091 = vperm.xlu1 %4874, %v6341_v5   ;;  %2095 = vperm.xlu2 %4872, %v6345_v15  }
 0x337   : > { %v6348_v32 = vpop.permute.xlu1 %1863  ;;  %v6350_v26 = vpop.permute.xlu2 %1903 }
 0x338   : > { %8869 = vst [vmem:[#allocation237_spill] sm:$0xff] %v6348_v32  ;;  %2255 = vperm.xlu0 %4876, %v6353_v14   ;;  %v6367_v32 = vld [vmem:[%s5363_s30 + $0x40] sm:$0xff] }
 0x339   : > { %8870 = vst [vmem:[#allocation238_spill] sm:$0xff] %v6350_v26  ;;  %v6356_v10 = vpop.permute.xlu0 %1974 }
 0x33a   : > { %8871 = vst [vmem:[#allocation239_spill] sm:$0xff] %v6356_v10 }
 0x33e   : > { %2103 = vperm.xlu1 %4874, %v6359_v22   ;;  %4875 = vset.pattern.permute.xlu2 %v8872_v56 }
 0x33f   : > { %v6363_v53 = vpop.permute.xlu1 %1875  ;;  %2139 = vperm.xlu2 %4875, %v6178_v28  }
 0x340   : > { %8873 = vst [vmem:[#allocation240_spill] sm:$0xff] %v6363_v53  ;;  %2267 = vperm.xlu0 %4876, %v6367_v32   ;;  %v6370_v26 = vpop.permute.xlu2 %1947  ;;  %v6380_v53 = vld [vmem:[%s5363_s30 + $0x58] sm:$0xff] }
 0x341   : > { %8874 = vst [vmem:[#allocation241_spill] sm:$0xff] %v6370_v26  ;;  %v6372_v30 = vpop.permute.xlu0 %1983 }
 0x342   : > { %8875 = vst [vmem:[#allocation242_spill] sm:$0xff] %v6372_v30 }
 0x346   : > { %4877 = vset.pattern.permute.xlu1 %v8872_v56  ;;  %v6392_v56 = vld [vmem:[%s5363_s30 + $0x70] sm:$0xff] }
 0x347   : > { %2145 = vperm.xlu1 %4877, %v6187_v23   ;;  %v6376_v10 = vpop.permute.xlu1 %1887  ;;  %2148 = vperm.xlu2 %4875, %v6193_v25  }
 0x348   : > { %8876 = vst [vmem:[#allocation243_spill] sm:$0xff] %v6376_v10  ;;  %2279 = vperm.xlu0 %4876, %v6380_v53   ;;  %v6383_v12 = vpop.permute.xlu2 %1956 }
 0x349   : > { %8877 = vst [vmem:[#allocation244_spill] sm:$0xff] %v6383_v12  ;;  %v6385_v20 = vpop.permute.xlu0 %1992  ;;  %v5240_v12 = vmov 10  }
 0x34a   : > { %8878 = vst [vmem:[#allocation245_spill] sm:$0xff] %v6385_v20 }
 0x34f   : > { %2151 = vperm.xlu1 %4877, %v6202_v21   ;;  %v6388_v26 = vpop.permute.xlu1 %1899  ;;  %2154 = vperm.xlu2 %4875, %v6208_v16  }
 0x350   : > { %8879 = vst [vmem:[#allocation246_spill] sm:$0xff] %v6388_v26  ;;  %2291 = vperm.xlu0 %4876, %v6392_v56   ;;  %v6395_v30 = vpop.permute.xlu2 %1962 }
 0x351   : > { %8880 = vst [vmem:[#allocation247_spill] sm:$0xff] %v6395_v30  ;;  %v6397_v10 = vpop.permute.xlu0 %2051 }
 0x352   : > { %8881 = vst [vmem:[#allocation248_spill] sm:$0xff] %v6397_v10 }
 0x357   : > { %2160 = vperm.xlu1 %4877, %v6217_v11   ;;  %v6400_v6 = vpop.permute.xlu1 %1911  ;;  %2163 = vperm.xlu2 %4875, %v6223_v13  }
 0x358   : > { %8882 = vst [vmem:[#allocation249_spill] sm:$0xff] %v6400_v6  ;;  %4879 = vset.pattern.permute.xlu0 %v5240_v12  ;;  %v6403_v20 = vpop.permute.xlu2 %1971 }
 0x359   : > { %8883 = vst [vmem:[#allocation250_spill] sm:$0xff] %v6403_v20  ;;  %2334 = vperm.xlu0 %4879, %v6245_v7   ;;  %v6406_v26 = vpop.permute.xlu0 %2063 }
 0x35a   : > { %8884 = vst [vmem:[#allocation251_spill] sm:$0xff] %v6406_v26 }
 0x35f   : > { %2169 = vperm.xlu1 %4877, %v6232_v35   ;;  %2172 = vperm.xlu2 %4875, %v6236_v17  }
 0x360   : > { %v6410_v30 = vpop.permute.xlu1 %1953  ;;  %v6412_v10 = vpop.permute.xlu2 %1980 }
 0x361   : > { %8885 = vst [vmem:[#allocation252_spill] sm:$0xff] %v6410_v30  ;;  %2349 = vperm.xlu0 %4879, %v6263_v2   ;;  %v6415_v6 = vpop.permute.xlu0 %2075 }
 0x362   : > { %8886 = vst [vmem:[#allocation253_spill] sm:$0xff] %v6412_v10 }
 0x363   : > { %8887 = vst [vmem:[#allocation254_spill] sm:$0xff] %v6415_v6 }
 0x367   : > { %2178 = vperm.xlu1 %4877, %v6251_v24   ;;  %2181 = vperm.xlu2 %4875, %v6255_v27  }
 0x368   : > { %v6419_v20 = vpop.permute.xlu1 %1959  ;;  %v6421_v55 = vpop.permute.xlu2 %1989 }
 0x369   : > { %8888 = vst [vmem:[#allocation255_spill] sm:$0xff] %v6419_v20  ;;  %2358 = vperm.xlu0 %4879, %v6281_v33   ;;  %v6424_v26 = vpop.permute.xlu0 %2087 }
 0x36a   : > { %8889 = vst [vmem:[#allocation256_spill] sm:$0xff] %v6421_v55 }
 0x36b   : > { %8890 = vst [vmem:[#allocation257_spill] sm:$0xff] %v6424_v26 }
 0x36f   : > { %2235 = vperm.xlu1 %4877, %v6269_v4   ;;  %2239 = vperm.xlu2 %4875, %v6273_v18  }
 0x370   : > { %v6428_v10 = vpop.permute.xlu1 %1968  ;;  %v6430_v30 = vpop.permute.xlu2 %2047 }
 0x371   : > { %8891 = vst [vmem:[#allocation258_spill] sm:$0xff] %v6428_v10  ;;  %2367 = vperm.xlu0 %4879, %v6299_v29   ;;  %v6433_v6 = vpop.permute.xlu0 %2099 }
 0x372   : > { %8892 = vst [vmem:[#allocation259_spill] sm:$0xff] %v6430_v30 }
 0x373   : > { %8893 = vst [vmem:[#allocation260_spill] sm:$0xff] %v6433_v6 }
 0x377   : > { %2247 = vperm.xlu1 %4877, %v6287_v31   ;;  %2251 = vperm.xlu2 %4875, %v6291_v43  }
 0x378   : > { %v6437_v20 = vpop.permute.xlu1 %1977  ;;  %v6439_v55 = vpop.permute.xlu2 %2059 }
 0x379   : > { %8894 = vst [vmem:[#allocation261_spill] sm:$0xff] %v6437_v20  ;;  %2376 = vperm.xlu0 %4879, %v6317_v34  }
 0x37a   : > { %8895 = vst [vmem:[#allocation262_spill] sm:$0xff] %v6439_v55  ;;  %v6442_v26 = vpop.permute.xlu0 %2142 }
 0x37b   : > { %8896 = vst [vmem:[#allocation263_spill] sm:$0xff] %v6442_v26 }
 0x37f   : > { %2259 = vperm.xlu1 %4877, %v6305_v50   ;;  %2263 = vperm.xlu2 %4875, %v6309_v8  }
 0x380   : > { %v6446_v10 = vpop.permute.xlu1 %1986  ;;  %v6448_v30 = vpop.permute.xlu2 %2071 }
 0x381   : > { %8897 = vst [vmem:[#allocation264_spill] sm:$0xff] %v6446_v10  ;;  %2435 = vperm.xlu0 %4879, %v6335_v3  }
 0x382   : > { %8898 = vst [vmem:[#allocation265_spill] sm:$0xff] %v6448_v30  ;;  %v6451_v6 = vpop.permute.xlu0 %2157 }
 0x383   : > { %8899 = vst [vmem:[#allocation266_spill] sm:$0xff] %v6451_v6 }
 0x387   : > { %2271 = vperm.xlu1 %4877, %v6323_v19   ;;  %2275 = vperm.xlu2 %4875, %v6327_v9  }
 0x388   : > { %v6455_v20 = vpop.permute.xlu1 %2043  ;;  %v6457_v55 = vpop.permute.xlu2 %2083 }
 0x389   : > { %8900 = vst [vmem:[#allocation267_spill] sm:$0xff] %v6455_v20  ;;  %2447 = vperm.xlu0 %4879, %v6353_v14  }
 0x38a   : > { %8901 = vst [vmem:[#allocation268_spill] sm:$0xff] %v6457_v55  ;;  %v6460_v26 = vpop.permute.xlu0 %2166 }
 0x38b   : > { %8902 = vst [vmem:[#allocation269_spill] sm:$0xff] %v6460_v26 }
 0x38f   : > { %2283 = vperm.xlu1 %4877, %v6341_v5   ;;  %2287 = vperm.xlu2 %4875, %v6345_v15  }
 0x390   : > { %v6464_v10 = vpop.permute.xlu1 %2055  ;;  %v6466_v30 = vpop.permute.xlu2 %2095 }
 0x391   : > { %8903 = vst [vmem:[#allocation270_spill] sm:$0xff] %v6464_v10  ;;  %2459 = vperm.xlu0 %4879, %v6367_v32  }
 0x392   : > { %8904 = vst [vmem:[#allocation271_spill] sm:$0xff] %v6466_v30  ;;  %v6469_v6 = vpop.permute.xlu0 %2175 }
 0x393   : > { %8905 = vst [vmem:[#allocation272_spill] sm:$0xff] %v6469_v6 }
 0x397   : > { %2295 = vperm.xlu1 %4877, %v6359_v22   ;;  %4878 = vset.pattern.permute.xlu2 %v5240_v12 }
 0x398   : > { %v6472_v55 = vpop.permute.xlu1 %2067  ;;  %2331 = vperm.xlu2 %4878, %v6178_v28  }
 0x399   : > { %8906 = vst [vmem:[#allocation273_spill] sm:$0xff] %v6472_v55  ;;  %2471 = vperm.xlu0 %4879, %v6380_v53   ;;  %v6476_v20 = vpop.permute.xlu2 %2139 }
 0x39a   : > { %8907 = vst [vmem:[#allocation274_spill] sm:$0xff] %v6476_v20  ;;  %v6478_v26 = vpop.permute.xlu0 %2184  ;;  %v5241_v20 = vmov 11  }
 0x39b   : > { %8908 = vst [vmem:[#allocation275_spill] sm:$0xff] %v6478_v26 }
 0x39f   : > { %4880 = vset.pattern.permute.xlu1 %v5240_v12 }
 0x3a0   : > { %2337 = vperm.xlu1 %4880, %v6187_v23   ;;  %v6481_v30 = vpop.permute.xlu1 %2079  ;;  %2340 = vperm.xlu2 %4878, %v6193_v25  }
 0x3a1   : > { %8909 = vst [vmem:[#allocation276_spill] sm:$0xff] %v6481_v30  ;;  %2483 = vperm.xlu0 %4879, %v6392_v56   ;;  %v6485_v10 = vpop.permute.xlu2 %2148 }
 0x3a2   : > { %8910 = vst [vmem:[#allocation277_spill] sm:$0xff] %v6485_v10  ;;  %v6487_v55 = vpop.permute.xlu0 %2243 }
 0x3a3   : > { %8911 = vst [vmem:[#allocation278_spill] sm:$0xff] %v6487_v55 }
 0x3a8   : > { %2343 = vperm.xlu1 %4880, %v6202_v21   ;;  %v6490_v6 = vpop.permute.xlu1 %2091  ;;  %2346 = vperm.xlu2 %4878, %v6208_v16  }
 0x3a9   : > { %8912 = vst [vmem:[#allocation279_spill] sm:$0xff] %v6490_v6  ;;  %4882 = vset.pattern.permute.xlu0 %v5241_v20  ;;  %v6493_v12 = vpop.permute.xlu2 %2154 }
 0x3aa   : > { %8913 = vst [vmem:[#allocation280_spill] sm:$0xff] %v6493_v12  ;;  %2526 = vperm.xlu0 %4882, %v6245_v7   ;;  %v6496_v26 = vpop.permute.xlu0 %2255 }
 0x3ab   : > { %8914 = vst [vmem:[#allocation281_spill] sm:$0xff] %v6496_v26 }
 0x3b0   : > { %2352 = vperm.xlu1 %4880, %v6217_v11   ;;  %v6499_v30 = vpop.permute.xlu1 %2103  ;;  %2355 = vperm.xlu2 %4878, %v6223_v13  }
 0x3b1   : > { %8915 = vst [vmem:[#allocation282_spill] sm:$0xff] %v6499_v30  ;;  %v6502_v10 = vpop.permute.xlu2 %2163 }
 0x3b2   : > { %2541 = vperm.xlu0 %4882, %v6263_v2   ;;  %v6505_v6 = vpop.permute.xlu0 %2267 }
 0x3b3   : > { %8916 = vst [vmem:[#allocation283_spill] sm:$0xff] %v6505_v6 }
 0x3b8   : > { %2361 = vperm.xlu1 %4880, %v6232_v35   ;;  %2364 = vperm.xlu2 %4878, %v6236_v17  }
 0x3b9   : > { %v6509_v55 = vpop.permute.xlu1 %2145  ;;  %v6511_v12 = vpop.permute.xlu2 %2172 }
 0x3ba   : > { %8917 = vst [vmem:[#allocation284_spill] sm:$0xff] %v6511_v12  ;;  %2550 = vperm.xlu0 %4882, %v6281_v33   ;;  %v6514_v26 = vpop.permute.xlu0 %2279 }
 0x3bb   : > { %8918 = vst [vmem:[#allocation285_spill] sm:$0xff] %v6514_v26 }
 0x3c0   : > { %2370 = vperm.xlu1 %4880, %v6251_v24   ;;  %2373 = vperm.xlu2 %4878, %v6255_v27  }
 0x3c1   : > { %v6518_v30 = vpop.permute.xlu1 %2151  ;;  %v6520_v2 = vpop.permute.xlu2 %2181 }
 0x3c2   : > { %8919 = vst [vmem:[#allocation286_spill] sm:$0xff] %v6518_v30  ;;  %2559 = vperm.xlu0 %4882, %v6299_v29   ;;  %v6523_v6 = vpop.permute.xlu0 %2291 }
 0x3c3   : > { %8920 = vst [vmem:[#allocation287_spill] sm:$0xff] %v6520_v2 }
 0x3c4   : > { %8921 = vst [vmem:[#allocation288_spill] sm:$0xff] %v6523_v6 }
 0x3c8   : > { %2427 = vperm.xlu1 %4880, %v6269_v4   ;;  %2431 = vperm.xlu2 %4878, %v6273_v18  }
 0x3c9   : > { %v6527_v12 = vpop.permute.xlu1 %2160  ;;  %v6529_v33 = vpop.permute.xlu2 %2239 }
 0x3ca   : > { %8922 = vst [vmem:[#allocation289_spill] sm:$0xff] %v6527_v12  ;;  %2568 = vperm.xlu0 %4882, %v6317_v34  }
 0x3cb   : > { %8923 = vst [vmem:[#allocation290_spill] sm:$0xff] %v6529_v33  ;;  %v6532_v26 = vpop.permute.xlu0 %2334 }
 0x3cc   : > { %8924 = vst [vmem:[#allocation291_spill] sm:$0xff] %v6532_v26 }
 0x3d0   : > { %2439 = vperm.xlu1 %4880, %v6287_v31   ;;  %2443 = vperm.xlu2 %4878, %v6291_v43  }
 0x3d1   : > { %v6536_v30 = vpop.permute.xlu1 %2169  ;;  %v6538_v2 = vpop.permute.xlu2 %2251 }
 0x3d2   : > { %8925 = vst [vmem:[#allocation292_spill] sm:$0xff] %v6536_v30  ;;  %2627 = vperm.xlu0 %4882, %v6335_v3  }
 0x3d3   : > { %8926 = vst [vmem:[#allocation293_spill] sm:$0xff] %v6538_v2  ;;  %v6541_v6 = vpop.permute.xlu0 %2349 }
 0x3d4   : > { %8927 = vst [vmem:[#allocation294_spill] sm:$0xff] %v6541_v6 }
 0x3d8   : > { %2451 = vperm.xlu1 %4880, %v6305_v50   ;;  %2455 = vperm.xlu2 %4878, %v6309_v8  }
 0x3d9   : > { %v6545_v12 = vpop.permute.xlu1 %2178  ;;  %v6547_v34 = vpop.permute.xlu2 %2263 }
 0x3da   : > { %8928 = vst [vmem:[#allocation295_spill] sm:$0xff] %v6545_v12  ;;  %2639 = vperm.xlu0 %4882, %v6353_v14  }
 0x3db   : > { %8929 = vst [vmem:[#allocation296_spill] sm:$0xff] %v6547_v34  ;;  %v6550_v33 = vpop.permute.xlu0 %2358 }
 0x3e0   : > { %2463 = vperm.xlu1 %4880, %v6323_v19   ;;  %2467 = vperm.xlu2 %4878, %v6327_v9  }
 0x3e1   : > { %v6554_v30 = vpop.permute.xlu1 %2235  ;;  %v6556_v2 = vpop.permute.xlu2 %2275 }
 0x3e2   : > { %8930 = vst [vmem:[#allocation297_spill] sm:$0xff] %v6554_v30  ;;  %2651 = vperm.xlu0 %4882, %v6367_v32  }
 0x3e3   : > { %8931 = vst [vmem:[#allocation298_spill] sm:$0xff] %v6556_v2  ;;  %v6559_v6 = vpop.permute.xlu0 %2367 }
 0x3e4   : > { %8932 = vst [vmem:[#allocation299_spill] sm:$0xff] %v6559_v6 }
 0x3e8   : > { %2475 = vperm.xlu1 %4880, %v6341_v5   ;;  %2479 = vperm.xlu2 %4878, %v6345_v15  }
 0x3e9   : > { %v6563_v12 = vpop.permute.xlu1 %2247  ;;  %v6565_v14 = vpop.permute.xlu2 %2287 }
 0x3ea   : > { %8933 = vst [vmem:[#allocation300_spill] sm:$0xff] %v6563_v12  ;;  %2663 = vperm.xlu0 %4882, %v6380_v53   ;;  %v8627_v53 = vmov 14  }
 0x3eb   : > { %8934 = vst [vmem:[#allocation301_spill] sm:$0xff] %v6565_v14  ;;  %v6568_v34 = vpop.permute.xlu0 %2376 }
 0x3ec   : > { %8935 = vst [vmem:[#allocation302_spill] sm:$0xff] %v6568_v34  ;;  %v8629_v34 = vmov 15  }
 0x3f0   : > { %2487 = vperm.xlu1 %4880, %v6359_v22   ;;  %4881 = vset.pattern.permute.xlu2 %v5241_v20 }
 0x3f1   : > { %v6571_v2 = vpop.permute.xlu1 %2259  ;;  %2523 = vperm.xlu2 %4881, %v6178_v28  }
 0x3f2   : > { %8936 = vst [vmem:[#allocation303_spill] sm:$0xff] %v6571_v2  ;;  %2675 = vperm.xlu0 %4882, %v6392_v56   ;;  %v6575_v30 = vpop.permute.xlu2 %2331 }
 0x3f3   : > { %8937 = vst [vmem:[#allocation304_spill] sm:$0xff] %v6575_v30  ;;  %v6577_v26 = vpop.permute.xlu0 %2435 }
 0x3f8   : > { %4883 = vset.pattern.permute.xlu1 %v5241_v20 }
 0x3f9   : > { %2529 = vperm.xlu1 %4883, %v6187_v23   ;;  %v6580_v14 = vpop.permute.xlu1 %2271  ;;  %2532 = vperm.xlu2 %4881, %v6193_v25  }
 0x3fa   : > { %8938 = vst [vmem:[#allocation305_spill] sm:$0xff] %v6580_v14  ;;  %4890 = vset.pattern.permute.xlu0 %v8627_v53  ;;  %v6584_v12 = vpop.permute.xlu2 %2340  ;;  %v8632_v14 = vlaneseq }
 0x3fb   : > { %8939 = vst [vmem:[#allocation306_spill] sm:$0xff] %v6584_v12  ;;  %3195 = vperm.xlu0 %4890, %v6269_v4   ;;  %v6587_v2 = vpop.permute.xlu0 %2447 }
 0x401   : > { %2535 = vperm.xlu1 %4883, %v6202_v21   ;;  %v6590_v56 = vpop.permute.xlu1 %2283  ;;  %2538 = vperm.xlu2 %4881, %v6208_v16  }
 0x402   : > { %8940 = vst [vmem:[#allocation307_spill] sm:$0xff] %v6590_v56  ;;  %v6593_v20 = vpop.permute.xlu2 %2346 }
 0x403   : > { %3203 = vperm.xlu0 %4890, %v6335_v3   ;;  %v6596_v25 = vpop.permute.xlu0 %2459 }
 0x409   : > { %2544 = vperm.xlu1 %4883, %v6217_v11   ;;  %v6599_v53 = vpop.permute.xlu1 %2295  ;;  %2547 = vperm.xlu2 %4881, %v6223_v13  }
 0x40a   : > { %8941 = vst [vmem:[#allocation308_spill] sm:$0xff] %v6599_v53  ;;  %v6602_v12 = vpop.permute.xlu2 %2355 }
 0x40b   : > { %3114 = vperm.xlu0 %4890, %v6208_v16   ;;  %v6605_v21 = vpop.permute.xlu0 %2471 }
 0x411   : > { %2553 = vperm.xlu1 %4883, %v6232_v35   ;;  %2556 = vperm.xlu2 %4881, %v6236_v17  }
 0x412   : > { %v6609_v30 = vpop.permute.xlu1 %2337  ;;  %v6611_v3 = vpop.permute.xlu2 %2364 }
 0x413   : > { %4906 = vset.pattern.permute.xlu0 %v8629_v34  ;;  %v6614_v53 = vpop.permute.xlu0 %2483 }
 0x414   : > { %3391 = vperm.xlu0 %4906, %v6273_v18  }
 0x419   : > { %2562 = vperm.xlu1 %4883, %v6251_v24   ;;  %2565 = vperm.xlu2 %4881, %v6255_v27  }
 0x41a   : > { %v6619_v16 = vpop.permute.xlu1 %2343  ;;  %v6621_v35 = vpop.permute.xlu2 %2373 }
 0x41b   : > { %8942 = vst [vmem:[#allocation309_spill] sm:$0xff] %v6619_v16 }
 0x41c   : > { %3399 = vperm.xlu0 %4906, %v6287_v31   ;;  %v6624_v56 = vpop.permute.xlu0 %2526 }
 0x41d   : > { %8943 = vst [vmem:[#allocation310_spill] sm:$0xff] %v6624_v56 }
 0x421   : > { %2619 = vperm.xlu1 %4883, %v6269_v4   ;;  %2623 = vperm.xlu2 %4881, %v6273_v18  }
 0x422   : > { %v6628_v34 = vpop.permute.xlu1 %2352  ;;  %v6630_v6 = vpop.permute.xlu2 %2431 }
 0x423   : > { %8944 = vst [vmem:[#allocation311_spill] sm:$0xff] %v6628_v34  ;;  %v6647_v34 = vand.u32 127, %v8632_v14 }
 0x424   : > { %3403 = vperm.xlu0 %4906, %v6291_v43   ;;  %v6633_v24 = vpop.permute.xlu0 %2541 }
 0x425   : > { %8945 = vst [vmem:[#allocation312_spill] sm:$0xff] %v6633_v24  ;;  %vm447_vm1 = vcmp.eq.s32.totalorder %v5509_v37, %v6647_v34  ;;  %vm450_vm2 = vcmp.eq.s32.totalorder %v5514_v38, %v6647_v34  ;;  %vm453_vm3 = vcmp.eq.s32.totalorder %v5519_v39, %v6647_v34  ;;  %vm444_vm4 = vcmp.eq.s32.totalorder %v5522_v40, %v6647_v34 }
 0x426   : > { %vm456_vm5 = vcmp.eq.s32.totalorder %v5528_v42, %v6647_v34  ;;  %vm652_vm6 = vcmp.eq.s32.totalorder %v5619_v61, %v6647_v34  ;;  %v5244_v37 = vmov 0.0   ;;  %vm655_vm7 = vcmp.eq.s32.totalorder %v5605_v60, %v6647_v34 }
 0x427   : > { %v4389_v38 = vsel %vm450_vm2, 1.0, %v5244_v37  ;;  %vm658_vm8 = vcmp.eq.s32.totalorder %v5614_v49, %v6647_v34  ;;  %v4383_v39 = vsel %vm444_vm4, 1.0, %v5244_v37  ;;  %v4392_v40 = vsel %vm453_vm3, 1.0, %v5244_v37 }
 0x428   : > { %v4395_v42 = vsel %vm456_vm5, 1.0, %v5244_v37  ;;  %vm661_vm9 = vcmp.eq.s32.totalorder %v5621_v51, %v6647_v34  ;;  %v572_v61 = vmul.f32 %v4383_v39, %v5578_v59  ;;  %vm664_vm10 = vcmp.eq.s32.totalorder %v5630_v48, %v6647_v34 }
 0x429   : > { %2631 = vperm.xlu1 %4883, %v6287_v31   ;;  %2635 = vperm.xlu2 %4881, %v6291_v43   ;;  %v4405_v14 = vsel %vm658_vm8, 1.0, %v5244_v37  ;;  %v4408_v39 = vsel %vm661_vm9, 1.0, %v5244_v37  ;;  %vm847_vm11 = vcmp.eq.s32.totalorder %v5704_v46, %v6647_v34  ;;  %vm850_vm12 = vcmp.eq.s32.totalorder %v5711_v36, %v6647_v34  ;;  %v8952_v46 = vld [vmem:[#allocation74_spill] sm:$0xff]  ;;  %v8954_v36 = vld [vmem:[#allocation85_spill] sm:$0xff] }
 0x42a   : > { %v6637_v27 = vpop.permute.xlu1 %2361  ;;  %v6639_v16 = vpop.permute.xlu2 %2443  ;;  %vm844_vm13 = vcmp.eq.s32.totalorder %v5718_v52, %v6647_v34  ;;  %v581_v52 = vmul.f32 %v4392_v40, %v5602_v57  ;;  %v4418_v48 = vsel %vm847_vm11, 1.0, %v5244_v37  ;;  %vm853_vm14 = vcmp.eq.s32.totalorder %v5720_v41, %v6647_v34 }
 0x42b   : > { %8946 = vst [vmem:[#allocation313_spill] sm:$0xff] %v6637_v27  ;;  %vm856_vm15 = vcmp.eq.s32.totalorder %v5729_v0, %v6647_v34  ;;  %v4424_v41 = vsel %vm853_vm14, 1.0, %v5244_v37 }
 0x42c   : > { %3312 = vperm.xlu0 %4906, %v6217_v11   ;;  %v6642_v56 = vpop.permute.xlu0 %2550  ;;  %v4402_v11 = vsel %vm655_vm7, 1.0, %v5244_v37  ;;  %v4427_v0 = vsel %vm856_vm15, 1.0, %v5244_v37 }
 0x431   : > { %2643 = vperm.xlu1 %4883, %v6305_v50   ;;  %2647 = vperm.xlu2 %4881, %v6309_v8   ;;  %v4386_v50 = vsel %vm447_vm1, 1.0, %v5244_v37  ;;  %vm1042_vm1 = vcmp.eq.s32.totalorder %v8954_v36, %v6647_v34  ;;  %v8965_v36 = vld [vmem:[#allocation118_spill] sm:$0xff] }
 0x432   : > { %v6649_v24 = vpop.permute.xlu1 %2370  ;;  %v6651_v31 = vpop.permute.xlu2 %2455  ;;  %v575_v49 = vmul.f32 %v4386_v50, %v5584_v62  ;;  %v767_v62 = vmul.f32 %v4402_v11, %v5677_v44  ;;  %v8633_v50 = vmov 12   ;;  %v584_v44 = vmul.f32 %v4395_v42, %v5611_v54  ;;  %v8950_v54 = vld [vmem:[#allocation68_spill] sm:$0xff] }
 0x433   : > { %8947 = vst [vmem:[#allocation314_spill] sm:$0xff] %v6649_v24  ;;  %v578_v24 = vmul.f32 %v4389_v38, %v5593_v1  ;;  %v4421_v1 = vsel %vm850_vm12, 1.0, %v5244_v37  ;;  %vm1234_vm7 = vcmp.eq.s32.totalorder %v8965_v36, %v6647_v34 }
 0x434   : > { %8948 = vst [vmem:[#allocation315_spill] sm:$0xff] %v6651_v31  ;;  %3315 = vperm.xlu0 %4906, %v6223_v13   ;;  %v6658_v43 = vpop.permute.xlu0 %2559  ;;  %v4399_v13 = vsel %vm652_vm6, 1.0, %v5244_v37  ;;  %v783_v40 = vadd.f32 %v767_v62, %v575_v49  ;;  %v8956_v49 = vld [vmem:[#allocation88_spill] sm:$0xff] }
 0x435   : > { %v764_v60 = vmul.f32 %v4399_v13, %v5668_v63  ;;  %v770_v63 = vmul.f32 %v4405_v14, %v5684_v47  ;;  %v4415_v14 = vsel %vm844_vm13, 1.0, %v5244_v37  ;;  %vm1045_vm3 = vcmp.eq.s32.totalorder %v8956_v49, %v6647_v34  ;;  %v8967_v49 = vld [vmem:[#allocation107_spill] sm:$0xff] }
 0x436   : > { %v956_v57 = vmul.f32 %v4415_v14, %v8950_v54 }
 0x437   : > { %v786_v42 = vadd.f32 %v770_v63, %v578_v24  ;;  %v8955_v24 = vld [vmem:[#allocation87_spill] sm:$0xff] }
 0x438   : > { %vm1036_vm2 = vcmp.eq.s32.totalorder %v8955_v24, %v6647_v34 }
 0x439   : > { %2655 = vperm.xlu1 %4883, %v6323_v19   ;;  %2659 = vperm.xlu2 %4881, %v6327_v9   ;;  %v773_v19 = vmul.f32 %v4408_v39, %v5693_v45  ;;  %v4411_v9 = vsel %vm664_vm10, 1.0, %v5244_v37  ;;  %v780_v45 = vadd.f32 %v764_v60, %v572_v61  ;;  %v962_v60 = vmul.f32 %v4421_v1, %v8952_v46  ;;  %v8953_v39 = vld [vmem:[#allocation82_spill] sm:$0xff]  ;;  %v8964_v46 = vld [vmem:[#allocation101_spill] sm:$0xff] }
 0x43a   : > { %v6689_v51 = vpop.permute.xlu1 %2427  ;;  %v6691_v59 = vpop.permute.xlu2 %2467  ;;  %v776_v47 = vmul.f32 %v4411_v9, %v5702_v58  ;;  %v8951_v58 = vld [vmem:[#allocation71_spill] sm:$0xff]  ;;  %vm1039_vm0 = vcmp.eq.s32.totalorder %v8953_v39, %v6647_v34  ;;  %v4437_v1 = vsel %vm1042_vm1, 1.0, %v5244_v37  ;;  %v4431_v54 = vsel %vm1036_vm2, 1.0, %v5244_v37 }
 0x43b   : > { %8949 = vst [vmem:[#allocation316_spill] sm:$0xff] %v6691_v59  ;;  %v959_v38 = vmul.f32 %v4418_v48, %v8951_v58  ;;  %v789_v61 = vadd.f32 %v773_v19, %v581_v52  ;;  %v972_v19 = vadd.f32 %v956_v57, %v780_v45  ;;  %v8958_v52 = vld [vmem:[#allocation76_spill] sm:$0xff]  ;;  %v4434_v48 = vsel %vm1039_vm0, 1.0, %v5244_v37  ;;  %v8961_v58 = vld [vmem:[#allocation115_spill] sm:$0xff] }
 0x43c   : > { %4924 = vset.pattern.permute.xlu0 %v8633_v50  ;;  %v6708_v13 = vpop.permute.xlu0 %2568  ;;  %v792_v11 = vadd.f32 %v776_v47, %v584_v44  ;;  %v978_v44 = vadd.f32 %v962_v60, %v786_v42  ;;  %v8960_v47 = vld [vmem:[#allocation79_spill] sm:$0xff]  ;;  %v4440_v57 = vsel %vm1045_vm3, 1.0, %v5244_v37  ;;  %vm1231_vm5 = vcmp.eq.s32.totalorder %v8961_v58, %v6647_v34 }
 0x43d   : > { %2718 = vperm.xlu0 %4924, %v6245_v7   ;;  %v975_v9 = vadd.f32 %v959_v38, %v783_v40  ;;  %v968_v14 = vmul.f32 %v4427_v0, %v8960_v47  ;;  %v8962_v38 = vld [vmem:[#allocation120_spill] sm:$0xff]  ;;  %v8963_v40 = vld [vmem:[#allocation98_spill] sm:$0xff]  ;;  %v1151_v60 = vmul.f32 %v4434_v48, %v8964_v46  ;;  %v4450_v48 = vsel %vm1231_vm5, 1.0, %v5244_v37 }
 0x43e   : > { %vm1228_vm6 = vcmp.eq.s32.totalorder %v8962_v38, %v6647_v34  ;;  %v1148_v42 = vmul.f32 %v4431_v54, %v8963_v40  ;;  %v8966_v0 = vld [vmem:[#allocation104_spill] sm:$0xff]  ;;  %v8969_v38 = vld [vmem:[#allocation121_spill] sm:$0xff] }
 0x43f   : > { %v1154_v24 = vmul.f32 %v4437_v1, %v8966_v0  ;;  %v984_v58 = vadd.f32 %v968_v14, %v792_v11  ;;  %vm1237_vm8 = vcmp.eq.s32.totalorder %v8969_v38, %v6647_v34  ;;  %v8970_v54 = vld [vmem:[#allocation124_spill] sm:$0xff]  ;;  %v4453_v1 = vsel %vm1234_vm7, 1.0, %v5244_v37 }
 0x440   : > { %vm1240_vm9 = vcmp.eq.s32.totalorder %v8970_v54, %v6647_v34  ;;  %v8971_v40 = vld [vmem:[#allocation128_spill] sm:$0xff]  ;;  %v1164_v11 = vadd.f32 %v1148_v42, %v972_v19  ;;  %v1167_v14 = vadd.f32 %v1151_v60, %v975_v9  ;;  %v8980_v54 = vld [vmem:[#allocation154_spill] sm:$0xff] }
 0x441   : > { %2667 = vperm.xlu1 %4883, %v6341_v5   ;;  %2671 = vperm.xlu2 %4881, %v6345_v15   ;;  %v965_v5 = vmul.f32 %v4424_v41, %v8958_v52  ;;  %v8959_v15 = vld [vmem:[#allocation91_spill] sm:$0xff]  ;;  %v1157_v52 = vmul.f32 %v4440_v57, %v8967_v49  ;;  %v8973_v57 = vld [vmem:[#allocation134_spill] sm:$0xff]  ;;  %v1170_v0 = vadd.f32 %v1154_v24, %v978_v44  ;;  %v4459_v19 = vsel %vm1240_vm9, 1.0, %v5244_v37  ;;  %v8976_v9 = vld [vmem:[#allocation148_spill] sm:$0xff] }
 0x442   : > { %v6743_v62 = vpop.permute.xlu1 %2439  ;;  %v6745_v63 = vpop.permute.xlu2 %2479  ;;  %vm1048_vm4 = vcmp.eq.s32.totalorder %v8959_v15, %v6647_v34  ;;  %v8968_v15 = vld [vmem:[#allocation109_spill] sm:$0xff]  ;;  %vm1423_vm11 = vcmp.eq.s32.totalorder %v8976_v9, %v6647_v34  ;;  %v8977_v44 = vld [vmem:[#allocation151_spill] sm:$0xff]  ;;  %vm1429_vm13 = vcmp.eq.s32.totalorder %v8980_v54, %v6647_v34  ;;  %vm2194_vm9 = vcmp.eq.s32.totalorder %v6502_v10, %v6647_v34  ;;  %v9007_v10 = vld [vmem:[#allocation220_spill] sm:$0xff] }
 0x443   : > { %8957 = vst [vmem:[#allocation68_spill] sm:$0xff] %v6745_v63  ;;  %v4443_v39 = vsel %vm1048_vm4, 1.0, %v5244_v37  ;;  %v981_v41 = vadd.f32 %v965_v5, %v789_v61  ;;  %v8972_v61 = vld [vmem:[#allocation131_spill] sm:$0xff]  ;;  %vm1426_vm12 = vcmp.eq.s32.totalorder %v8977_v44, %v6647_v34  ;;  %v8978_v24 = vld [vmem:[#allocation137_spill] sm:$0xff]  ;;  %v4472_v44 = vsel %vm1429_vm13, 1.0, %v5244_v37 }
 0x444   : > { %v6759_v45 = vpop.permute.xlu0 %2627  ;;  %v1160_v47 = vmul.f32 %v4443_v39, %v8968_v15  ;;  %v1343_v5 = vmul.f32 %v4450_v48, %v8972_v61  ;;  %v1346_v39 = vmul.f32 %v4453_v1, %v8973_v57  ;;  %v8981_v61 = vld [vmem:[#allocation181_spill] sm:$0xff]  ;;  %v8988_v54 = vld [vmem:[#allocation191_spill] sm:$0xff]  ;;  %vm2383_vm4 = vcmp.eq.s32.totalorder %v6593_v20, %v6647_v34 }
 0x445   : > { %2839 = vperm.xlu0 %4924, %v6309_v8   ;;  %v4447_v8 = vsel %vm1228_vm6, 1.0, %v5244_v37  ;;  %v1173_v49 = vadd.f32 %v1157_v52, %v981_v41  ;;  %vm1615_vm14 = vcmp.eq.s32.totalorder %v8981_v61, %v6647_v34  ;;  %v8982_v1 = vld [vmem:[#allocation157_spill] sm:$0xff]  ;;  %v8989_v61 = vld [vmem:[#allocation247_spill] sm:$0xff] }
 0x446   : > { %v1340_v46 = vmul.f32 %v4447_v8, %v8971_v40  ;;  %v1176_v15 = vadd.f32 %v1160_v47, %v984_v58  ;;  %v8975_v8 = vld [vmem:[#allocation153_spill] sm:$0xff]  ;;  %v1359_v41 = vadd.f32 %v1343_v5, %v1167_v14  ;;  %v8979_v47 = vld [vmem:[#allocation140_spill] sm:$0xff]  ;;  %v1362_v38 = vadd.f32 %v1346_v39, %v1170_v0  ;;  %v8995_v20 = vld [vmem:[#allocation187_spill] sm:$0xff] }
 0x447   : > { %vm1420_vm10 = vcmp.eq.s32.totalorder %v8975_v8, %v6647_v34  ;;  %v1352_v58 = vmul.f32 %v4459_v19, %v8979_v47  ;;  %vm1432_vm15 = vcmp.eq.s32.totalorder %v8982_v1, %v6647_v34  ;;  %v4469_v14 = vsel %vm1426_vm12, 1.0, %v5244_v37  ;;  %v8984_v57 = vld [vmem:[#allocation161_spill] sm:$0xff]  ;;  %v8985_v39 = vld [vmem:[#allocation164_spill] sm:$0xff]  ;;  %v8986_v8 = vld [vmem:[#allocation186_spill] sm:$0xff] }
 0x448   : > { %v1356_v60 = vadd.f32 %v1340_v46, %v1164_v11  ;;  %v4463_v40 = vsel %vm1420_vm10, 1.0, %v5244_v37  ;;  %v8983_v46 = vld [vmem:[#allocation158_spill] sm:$0xff]  ;;  %v4466_v11 = vsel %vm1423_vm11, 1.0, %v5244_v37  ;;  %v1538_v0 = vmul.f32 %v4469_v14, %v8985_v39  ;;  %v8990_v1 = vld [vmem:[#allocation280_spill] sm:$0xff]  ;;  %v8992_v39 = vld [vmem:[#allocation221_spill] sm:$0xff] }
 0x449   : > { %2679 = vperm.xlu1 %4883, %v6359_v22   ;;  %4884 = vset.pattern.permute.xlu2 %v8633_v50  ;;  %v4456_v22 = vsel %vm1237_vm8, 1.0, %v5244_v37  ;;  %v1532_v5 = vmul.f32 %v4463_v40, %v8983_v46  ;;  %vm1612_vm0 = vcmp.eq.s32.totalorder %v8986_v8, %v6647_v34  ;;  %v1368_v9 = vadd.f32 %v1352_v58, %v1176_v15  ;;  %v8994_v8 = vld [vmem:[#allocation184_spill] sm:$0xff]  ;;  %v9053_v63 = vld [vmem:[#allocation55_spill] sm:$0xff] }
 0x44a   : > { %v6788_v36 = vpop.permute.xlu1 %2451  ;;  %2715 = vperm.xlu2 %4884, %v6178_v28   ;;  %v1349_v52 = vmul.f32 %v4456_v22, %v8978_v24  ;;  %v8987_v22 = vld [vmem:[#allocation214_spill] sm:$0xff]  ;;  %v4482_v24 = vsel %vm1615_vm14, 1.0, %v5244_v37  ;;  %v4475_v47 = vsel %vm1432_vm15, 1.0, %v5244_v37  ;;  %vm1999_vm2 = vcmp.eq.s32.totalorder %v8989_v61, %v6647_v34 }
 0x44b   : > { %8974 = vst [vmem:[#allocation71_spill] sm:$0xff] %v6788_v36  ;;  %v6793_v48 = vpop.permute.xlu2 %2523  ;;  %vm1807_vm1 = vcmp.eq.s32.totalorder %v8987_v22, %v6647_v34  ;;  %v1727_v40 = vmul.f32 %v4482_v24, %v8988_v54  ;;  %vm2191_vm3 = vcmp.eq.s32.totalorder %v8990_v1, %v6647_v34  ;;  %v1548_v15 = vadd.f32 %v1532_v5, %v1356_v60  ;;  %v8993_v5 = vld [vmem:[#allocation170_spill] sm:$0xff]  ;;  %v9086_v36 = vld [vmem:[#allocation272_spill] sm:$0xff] }
 0x44c   : > { %v6807_v42 = vpop.permute.xlu0 %2639  ;;  %v1365_v19 = vadd.f32 %v1349_v52, %v1173_v49  ;;  %v8991_v52 = vld [vmem:[#allocation167_spill] sm:$0xff]  ;;  %v4479_v46 = vsel %vm1612_vm0, 1.0, %v5244_v37  ;;  %vm1618_vm5 = vcmp.eq.s32.totalorder %v8994_v8, %v6647_v34  ;;  %v4514_v22 = vsel %vm1999_vm2, 1.0, %v5244_v37 }
 0x44d   : > { %2843 = vperm.xlu0 %4924, %v6367_v32   ;;  %v1535_v32 = vmul.f32 %v4466_v11, %v8984_v57  ;;  %v1541_v58 = vmul.f32 %v4472_v44, %v8991_v52  ;;  %v4498_v11 = vsel %vm1807_vm1, 1.0, %v5244_v37  ;;  %v1554_v57 = vadd.f32 %v1538_v0, %v1362_v38  ;;  %v8996_v38 = vld [vmem:[#allocation188_spill] sm:$0xff] }
 0x44e   : > { %v1919_v24 = vmul.f32 %v4498_v11, %v8992_v39  ;;  %v1544_v44 = vmul.f32 %v4475_v47, %v8993_v5  ;;  %vm1621_vm6 = vcmp.eq.s32.totalorder %v8995_v20, %v6647_v34  ;;  %v8997_v47 = vld [vmem:[#allocation251_spill] sm:$0xff]  ;;  %v8998_v11 = vld [vmem:[#allocation217_spill] sm:$0xff]  ;;  %v4546_v61 = vsel %vm2383_vm4, 1.0, %v5244_v37  ;;  %v8999_v5 = vld [vmem:[#allocation250_spill] sm:$0xff] }
 0x44f   : > { %v2111_v54 = vmul.f32 %v4514_v22, %v8997_v47  ;;  %v1557_v52 = vadd.f32 %v1541_v58, %v1365_v19  ;;  %vm1810_vm7 = vcmp.eq.s32.totalorder %v8998_v11, %v6647_v34  ;;  %v4485_v39 = vsel %vm1618_vm5, 1.0, %v5244_v37 }
 0x450   : > { %vm2002_vm8 = vcmp.eq.s32.totalorder %v8999_v5, %v6647_v34  ;;  %v6880_v20 = vadd.f32 %v1544_v44, %v1368_v9  ;;  %v4501_v58 = vsel %vm1810_vm7, 1.0, %v5244_v37  ;;  %v9002_v9 = vld [vmem:[#allocation190_spill] sm:$0xff]  ;;  %v9003_v44 = vld [vmem:[#allocation219_spill] sm:$0xff]  ;;  %vm2386_vm12 = vcmp.eq.s32.totalorder %v6602_v12, %v6647_v34 }
 0x451   : > { %4885 = vset.pattern.permute.xlu1 %v8633_v50  ;;  %vm1624_vm10 = vcmp.eq.s32.totalorder %v9002_v9, %v6647_v34  ;;  %vm1804_vm11 = vcmp.eq.s32.totalorder %v9003_v44, %v6647_v34  ;;  %v9006_v5 = vld [vmem:[#allocation254_spill] sm:$0xff]  ;;  %vm1813_vm14 = vcmp.eq.s32.totalorder %v9007_v10, %v6647_v34  ;;  %v9010_v44 = vld [vmem:[#allocation253_spill] sm:$0xff]  ;;  %vm2188_vm1 = vcmp.eq.s32.totalorder %v6509_v55, %v6647_v34 }
 0x452   : > { %2721 = vperm.xlu1 %4885, %v6187_v23   ;;  %v6838_v49 = vpop.permute.xlu1 %2463  ;;  %2811 = vperm.xlu2 %4884, %v6269_v4   ;;  %v1551_v23 = vadd.f32 %v1535_v32, %v1359_v41  ;;  %v4530_v41 = vsel %vm2191_vm3, 1.0, %v5244_v37  ;;  %v1724_v32 = vmul.f32 %v4479_v46, %v8996_v38  ;;  %v9001_v46 = vld [vmem:[#allocation194_spill] sm:$0xff]  ;;  %vm2005_vm0 = vcmp.eq.s32.totalorder %v9010_v44, %v6647_v34 }
 0x453   : > { %v6850_v14 = vpop.permute.xlu2 %2532  ;;  %vm2380_vm3 = vcmp.eq.s32.totalorder %v6609_v30, %v6647_v34  ;;  %vm2389_vm4 = vcmp.eq.s32.totalorder %v6611_v3, %v6647_v34  ;;  %v9018_v44 = vld [vmem:[#allocation278_spill] sm:$0xff]  ;;  %v9022_v30 = vld [vmem:[#allocation287_spill] sm:$0xff] }
 0x454   : > { %v6855_v60 = vpop.permute.xlu0 %2651  ;;  %v1743_v0 = vadd.f32 %v1727_v40, %v1551_v23  ;;  %v1730_v40 = vmul.f32 %v4485_v39, %v9001_v46  ;;  %v4488_v23 = vsel %vm1621_vm6, 1.0, %v5244_v37  ;;  %v1740_v19 = vadd.f32 %v1724_v32, %v1548_v15  ;;  %v9005_v39 = vld [vmem:[#allocation197_spill] sm:$0xff] }
 0x455   : > { %2748 = vperm.xlu0 %4924, %v6236_v17   ;;  %v9000_v17 = vld [vmem:[#allocation281_spill] sm:$0xff] }
 0x456   : > { %v1935_v1 = vadd.f32 %v1919_v24, %v1743_v0  ;;  %v2303_v8 = vmul.f32 %v4530_v41, %v9000_v17  ;;  %v2495_v24 = vmul.f32 %v4546_v61, %v6587_v2  ;;  %v8635_v41 = vmov 13   ;;  %v9004_v0 = vld [vmem:[#allocation224_spill] sm:$0xff] }
 0x457   : > { %v1922_v15 = vmul.f32 %v4501_v58, %v9004_v0  ;;  %v4517_v2 = vsel %vm2002_vm8, 1.0, %v5244_v37  ;;  %v1746_v61 = vadd.f32 %v1730_v40, %v1554_v57  ;;  %v9009_v57 = vld [vmem:[#allocation283_spill] sm:$0xff]  ;;  %vm2200_vm8 = vcmp.eq.s32.totalorder %v9022_v30, %v6647_v34 }
 0x458   : > { %v2127_v22 = vadd.f32 %v2111_v54, %v1935_v1  ;;  %v4533_v54 = vsel %vm2194_vm9, 1.0, %v5244_v37  ;;  %v1733_v1 = vmul.f32 %v4488_v23, %v9005_v39  ;;  %v2114_v17 = vmul.f32 %v4517_v2, %v9006_v5  ;;  %v9014_v5 = vld [vmem:[#allocation200_spill] sm:$0xff] }
 0x459   : > { %v1938_v58 = vadd.f32 %v1922_v15, %v1746_v61  ;;  %v2306_v40 = vmul.f32 %v4533_v54, %v9009_v57  ;;  %v4549_v23 = vsel %vm2386_vm12, 1.0, %v5244_v37  ;;  %v4504_v15 = vsel %vm1813_vm14, 1.0, %v5244_v37  ;;  %v9013_v54 = vld [vmem:[#allocation227_spill] sm:$0xff] }
 0x45a   : > { %2815 = vperm.xlu1 %4885, %v6273_v18   ;;  %v6889_v38 = vpop.permute.xlu1 %2475  ;;  %4886 = vset.pattern.permute.xlu2 %v8635_v41  ;;  %v2319_v47 = vadd.f32 %v2303_v8, %v2127_v22  ;;  %v4495_v8 = vsel %vm1804_vm11, 1.0, %v5244_v37  ;;  %v9008_v22 = vld [vmem:[#allocation252_spill] sm:$0xff]  ;;  %v1925_v9 = vmul.f32 %v4504_v15, %v9013_v54  ;;  %v2498_v39 = vmul.f32 %v4549_v23, %v6596_v25  ;;  %v9017_v57 = vld [vmem:[#allocation223_spill] sm:$0xff] }
 0x45b   : > { %2907 = vperm.xlu2 %4886, %v6178_v28   ;;  %v2539_v32 = vpop.permute.xlu2 %2538  ;;  %vm1996_vm15 = vcmp.eq.s32.totalorder %v9008_v22, %v6647_v34  ;;  %v2130_v2 = vadd.f32 %v2114_v17, %v1938_v58  ;;  %v4527_v17 = vsel %vm2188_vm1, 1.0, %v5244_v37  ;;  %v9016_v22 = vld [vmem:[#allocation257_spill] sm:$0xff]  ;;  %vm1816_vm6 = vcmp.eq.s32.totalorder %v9017_v57, %v6647_v34  ;;  %v9021_v54 = vld [vmem:[#allocation256_spill] sm:$0xff] }
 0x45c   : > { %vm2575_vm13 = vcmp.eq.s32.totalorder %v2539_v32, %v6647_v34  ;;  %v6909_v11 = vpop.permute.xlu0 %2663  ;;  %v2511_v46 = vadd.f32 %v2495_v24, %v2319_v47  ;;  %v9011_v24 = vld [vmem:[#allocation218_spill] sm:$0xff]  ;;  %v9012_v32 = vld [vmem:[#allocation284_spill] sm:$0xff]  ;;  %v1749_v47 = vadd.f32 %v1733_v1, %v1557_v52  ;;  %v4511_v61 = vsel %vm1996_vm15, 1.0, %v5244_v37 }
 0x45d   : > { %v4562_v28 = vsel %vm2575_vm13, 1.0, %v5244_v37  ;;  %2751 = vperm.xlu0 %4924, %v6299_v29   ;;  %v4491_v29 = vsel %vm1624_vm10, 1.0, %v5244_v37  ;;  %v1916_v0 = vmul.f32 %v4495_v8, %v9011_v24  ;;  %vm2197_vm2 = vcmp.eq.s32.totalorder %v9012_v32, %v6647_v34 }
 0x45e   : > { %v2687_v12 = vmul.f32 %v4562_v28, %v6807_v42  ;;  %v1736_v28 = vmul.f32 %v4491_v29, %v9014_v5  ;;  %v4520_v8 = vsel %vm2005_vm0, 1.0, %v5244_v37  ;;  %v2322_v10 = vadd.f32 %v2306_v40, %v2130_v2  ;;  %v9023_v5 = vld [vmem:[#allocation230_spill] sm:$0xff] }
 0x45f   : > { %v4536_v1 = vsel %vm2197_vm2, 1.0, %v5244_v37  ;;  %v1941_v40 = vadd.f32 %v1925_v9, %v1749_v47  ;;  %v2300_v24 = vmul.f32 %v4527_v17, %v9018_v44  ;;  %v4543_v15 = vsel %vm2380_vm3, 1.0, %v5244_v37 }
 0x460   : > { %v6931_v42 = vadd.f32 %v2687_v12, %v2511_v46  ;;  %v1932_v46 = vadd.f32 %v1916_v0, %v1740_v19  ;;  %v9015_v12 = vld [vmem:[#allocation248_spill] sm:$0xff]  ;;  %v2514_v23 = vadd.f32 %v2498_v39, %v2322_v10  ;;  %v9019_v19 = vld [vmem:[#allocation285_spill] sm:$0xff]  ;;  %v4552_v2 = vsel %vm2389_vm4, 1.0, %v5244_v37 }
 0x461   : > { %v2108_v58 = vmul.f32 %v4511_v61, %v9015_v12  ;;  %v2309_v0 = vmul.f32 %v4536_v1, %v9019_v19  ;;  %vm2008_vm7 = vcmp.eq.s32.totalorder %v9021_v54, %v6647_v34  ;;  %v4507_v61 = vsel %vm1816_vm6, 1.0, %v5244_v37 }
 0x462   : > { %4887 = vset.pattern.permute.xlu1 %v8635_v41  ;;  %v6941_v55 = vpop.permute.xlu1 %2487  ;;  %v2492_v39 = vmul.f32 %v4543_v15, %v6577_v26  ;;  %v2501_v3 = vmul.f32 %v4552_v2, %v6605_v21  ;;  %v4523_v1 = vsel %vm2008_vm7, 1.0, %v5244_v37  ;;  %vm2392_vm9 = vcmp.eq.s32.totalorder %v6621_v35, %v6647_v34  ;;  %v5056_v26 = vld [vmem:[%s5358_s27] sm:$0xff]  ;;  %v9025_v21 = vld [vmem:[#allocation260_spill] sm:$0xff]  ;;  %v5058_v35 = vld [vmem:[%s5363_s30 + $0x8] sm:$0xff] }
 0x463   : > { %3003 = vperm.xlu1 %4887, %v6269_v4   ;;  %3007 = vperm.xlu2 %4886, %v6273_v18   ;;  %v2548_v52 = vpop.permute.xlu2 %2547  ;;  %v2117_v4 = vmul.f32 %v4520_v8, %v9016_v22  ;;  %v2124_v47 = vadd.f32 %v2108_v58, %v1932_v46  ;;  %v1928_v8 = vmul.f32 %v4507_v61, %v9023_v5  ;;  %v4539_v12 = vsel %vm2200_vm8, 1.0, %v5244_v37 }
 0x464   : > { %vm2578_vm5 = vcmp.eq.s32.totalorder %v2548_v52, %v6647_v34  ;;  %v6954_v25 = vpop.permute.xlu0 %2675  ;;  %v2120_v46 = vmul.f32 %v4523_v1, %v9025_v21 }
 0x465   : > { %v4565_v18 = vsel %vm2578_vm5, 1.0, %v5244_v37  ;;  %4935 = vset.pattern.permute.xlu0 %v8635_v41  ;;  %v2133_v9 = vadd.f32 %v2117_v4, %v1941_v40  ;;  %v2316_v10 = vadd.f32 %v2300_v24, %v2124_v47  ;;  %v9026_v24 = vld [vmem:[#allocation288_spill] sm:$0xff] }
 0x466   : > { %v2690_v29 = vmul.f32 %v4565_v18, %v6855_v60  ;;  %2910 = vperm.xlu0 %4935, %v6245_v7   ;;  %v1752_v60 = vadd.f32 %v1736_v28, %v6880_v20  ;;  %v9024_v20 = vmov 14   ;;  %v2312_v19 = vmul.f32 %v4539_v12, %v9026_v24  ;;  %v9037_v24 = vld [vmem:[#allocation22_spill] sm:$0xff] }
 0x467   : > { %v2325_v17 = vadd.f32 %v2309_v0, %v2133_v9  ;;  %v2508_v18 = vadd.f32 %v2492_v39, %v2316_v10  ;;  %v7029_v39 = vld [vmem:[%s5358_s27 + $0x20] sm:$0xff]  ;;  %v5060_v10 = vld [vmem:[%s5358_s27 + $0x8] sm:$0xff]  ;;  %vm454_vm0 = vcmp.eq.s32.totalorder %v9037_v24, %v6647_v34 }
 0x468   : > { %v6974_v32 = vadd.f32 %v2690_v29, %v2514_v23  ;;  %v7006_v23 = vld [vmem:[%s5358_s27 + $0x18] sm:$0xff]  ;;  %v4555_v29 = vsel %vm2392_vm9, 1.0, %v5244_v37  ;;  %v1944_v44 = vadd.f32 %v1928_v8, %v1752_v60  ;;  %v9028_v60 = vmov 15   ;;  %v9045_v24 = vld [vmem:[#allocation119_spill] sm:$0xff] }
 0x469   : > { %v2517_v57 = vadd.f32 %v2501_v3, %v2325_v17  ;;  %v5061_v17 = vld [vmem:[%s5363_s30] sm:$0xff]  ;;  %vm1235_vm5 = vcmp.eq.s32.totalorder %v9045_v24, %v6647_v34 }
 0x46a   : > { %9020 = vst [vmem:[#allocation74_spill] sm:$0xff] %v6974_v32 }
 0x46b   : > { %4888 = vset.pattern.permute.xlu1 %v9024_v20  ;;  %v2530_v28 = vpop.permute.xlu1 %2529  ;;  %4889 = vset.pattern.permute.xlu2 %v9024_v20  ;;  %v2557_v52 = vpop.permute.xlu2 %2556 }
 0x46c   : > { %vm2572_vm10 = vcmp.eq.s32.totalorder %v2530_v28, %v6647_v34  ;;  %vm2581_vm11 = vcmp.eq.s32.totalorder %v2557_v52, %v6647_v34  ;;  %3099 = vperm.xlu1 %4888, %v5056_v26   ;;  %3102 = vperm.xlu2 %4889, %v6245_v7   ;;  %v7044_v28 = vld [vmem:[%s5363_s30 + $0x48] sm:$0xff] }
 0x46d   : > { %v4559_v58 = vsel %vm2572_vm10, 1.0, %v5244_v37  ;;  %v4568_v22 = vsel %vm2581_vm11, 1.0, %v5244_v37  ;;  %v7001_v4 = vpop.permute.xlu0 %3195 }
 0x46e   : > { %v2684_v40 = vmul.f32 %v4559_v58, %v6759_v45  ;;  %v2693_v7 = vmul.f32 %v4568_v22, %v6909_v11  ;;  %2916 = vperm.xlu0 %4935, %v7006_v23   ;;  %v2136_v45 = vadd.f32 %v2120_v46, %v1944_v44  ;;  %v2504_v11 = vmul.f32 %v4555_v29, %v6614_v53  ;;  %v5064_v46 = vld [vmem:[%s5363_s30 + $0x50] sm:$0xff]  ;;  %v7066_v22 = vld [vmem:[%s5363_s30 + $0x18] sm:$0xff]  ;;  %v9036_v44 = vld [vmem:[#allocation42_spill] sm:$0xff] }
 0x46f   : > { %v9035_v29 = vld [vmem:[#allocation19_spill] sm:$0xff]  ;;  %vm662_vm15 = vcmp.eq.s32.totalorder %v9036_v44, %v6647_v34 }
 0x470   : > { %v7014_v0 = vadd.f32 %v2684_v40, %v2508_v18  ;;  %v7016_v15 = vadd.f32 %v2693_v7, %v2517_v57  ;;  %v2328_v54 = vadd.f32 %v2312_v19, %v2136_v45  ;;  %v9034_v57 = vld [vmem:[#allocation39_spill] sm:$0xff]  ;;  %vm451_vm14 = vcmp.eq.s32.totalorder %v9035_v29, %v6647_v34 }
 0x471   : > { %vm659_vm13 = vcmp.eq.s32.totalorder %v9034_v57, %v6647_v34  ;;  %v7075_v40 = vld [vmem:[%s5358_s27 + $0x10] sm:$0xff]  ;;  %v5067_v7 = vld [vmem:[%s5358_s27 + $0x68] sm:$0xff] }
 0x472   : > { %9027 = vst [vmem:[#allocation82_spill] sm:$0xff] %v7016_v15  ;;  %v2520_v30 = vadd.f32 %v2504_v11, %v2328_v54  ;;  %v4406_v19 = vsel %vm659_vm13, 1.0, %v5244_v37  ;;  %v9038_v45 = vld [vmem:[#allocation59_spill] sm:$0xff]  ;;  %v4390_v11 = vsel %vm451_vm14, 1.0, %v5244_v37  ;;  %v9060_v15 = vld [vmem:[#allocation209_spill] sm:$0xff] }
 0x473   : > { %v7019_v2 = vpop.permute.xlu1 %2535  ;;  %v2566_v47 = vpop.permute.xlu2 %2565  ;;  %vm851_vm1 = vcmp.eq.s32.totalorder %v9038_v45, %v6647_v34  ;;  %vm1811_vm11 = vcmp.eq.s32.totalorder %v9060_v15, %v6647_v34  ;;  %v9067_v15 = vld [vmem:[#allocation95_spill] sm:$0xff] }
 0x474   : > { %vm2584_vm12 = vcmp.eq.s32.totalorder %v2566_v47, %v6647_v34  ;;  %3199 = vperm.xlu1 %4888, %v5058_v35   ;;  %4891 = vset.pattern.permute.xlu2 %v9028_v60  ;;  %v9039_v47 = vld [vmem:[#allocation45_spill] sm:$0xff]  ;;  %v4422_v57 = vsel %vm851_vm1, 1.0, %v5244_v37  ;;  %vm1049_vm14 = vcmp.eq.s32.totalorder %v9067_v15, %v6647_v34  ;;  %v9077_v15 = vld [vmem:[#allocation276_spill] sm:$0xff] }
 0x475   : > { %v4571_v9 = vsel %vm2584_vm12, 1.0, %v5244_v37  ;;  %3291 = vperm.xlu2 %4891, %v5056_v26   ;;  %v7025_v61 = vpop.permute.xlu0 %3203  ;;  %v7055_v26 = vld [vmem:[%s5363_s30 + $0x10] sm:$0xff]  ;;  %vm665_vm2 = vcmp.eq.s32.totalorder %v9039_v47, %v6647_v34  ;;  %v9047_v47 = vld [vmem:[#allocation54_spill] sm:$0xff] }
 0x476   : > { %v2696_v53 = vmul.f32 %v4571_v9, %v6954_v25  ;;  %2919 = vperm.xlu0 %4935, %v7029_v39   ;;  %v4409_v9 = vsel %vm662_vm15, 1.0, %v5244_v37  ;;  %v4412_v44 = vsel %vm665_vm2, 1.0, %v5244_v37  ;;  %vm2387_vm2 = vcmp.eq.s32.totalorder %v6550_v33, %v6647_v34 }
 0x478   : > { %v7032_v3 = vadd.f32 %v2696_v53, %v2520_v30  ;;  %v9041_v30 = vld [vmem:[#allocation89_spill] sm:$0xff] }
 0x479   : > { %vm1043_vm3 = vcmp.eq.s32.totalorder %v9041_v30, %v6647_v34  ;;  %v9042_v53 = vld [vmem:[#allocation25_spill] sm:$0xff]  ;;  %v774_v30 = vmul.f32 %v4409_v9, %v9047_v47  ;;  %v9051_v9 = vld [vmem:[#allocation78_spill] sm:$0xff] }
 0x47a   : > { %9029 = vst [vmem:[#allocation85_spill] sm:$0xff] %v7032_v3  ;;  %vm457_vm4 = vcmp.eq.s32.totalorder %v9042_v53, %v6647_v34  ;;  %v963_v47 = vmul.f32 %v4422_v57, %v9051_v9  ;;  %v5068_v3 = vld [vmem:[%s5358_s27 + $0x70] sm:$0xff] }
 0x47b   : > { %v7034_v5 = vpop.permute.xlu1 %2544  ;;  %v7036_v8 = vpop.permute.xlu2 %2623 }
 0x47c   : > { %9030 = vst [vmem:[#allocation87_spill] sm:$0xff] %v7034_v5  ;;  %4892 = vset.pattern.permute.xlu1 %v9028_v60  ;;  %v9137_v5 = vld [vmem:[#allocation160_spill] sm:$0xff] }
 0x47d   : > { %3294 = vperm.xlu1 %4892, %v5060_v10   ;;  %3387 = vperm.xlu2 %4891, %v5061_v17   ;;  %v7041_v25 = vpop.permute.xlu0 %3114  ;;  %v4393_v10 = vsel %vm454_vm0, 1.0, %v5244_v37  ;;  %v9043_v17 = vld [vmem:[#allocation52_spill] sm:$0xff] }
 0x47e   : > { %3039 = vperm.xlu0 %4935, %v7044_v28  }
 0x483   : > { %v7047_v52 = vpop.permute.xlu1 %2553  ;;  %v7049_v1 = vpop.permute.xlu2 %2635 }
 0x484   : > { %9031 = vst [vmem:[#allocation88_spill] sm:$0xff] %v7047_v52  ;;  %v9059_v52 = vld [vmem:[#allocation144_spill] sm:$0xff] }
 0x485   : > { %4893 = vset.pattern.permute.xlu1 %v8633_v50  ;;  %4894 = vset.pattern.permute.xlu2 %v8633_v50  ;;  %v9048_v50 = vld [vmem:[#allocation62_spill] sm:$0xff] }
 0x486   : > { %2724 = vperm.xlu1 %4893, %v7006_v23   ;;  %2819 = vperm.xlu2 %4894, %v7055_v26   ;;  %v7058_v21 = vpop.permute.xlu0 %3391  ;;  %vm854_vm6 = vcmp.eq.s32.totalorder %v9048_v50, %v6647_v34  ;;  %v9052_v50 = vld [vmem:[#allocation149_spill] sm:$0xff] }
 0x487   : > { %3043 = vperm.xlu0 %4935, %v5064_v46   ;;  %v771_v46 = vmul.f32 %v4406_v19, %v9043_v17  ;;  %v9049_v19 = vld [vmem:[#allocation65_spill] sm:$0xff]  ;;  %v4438_v17 = vsel %vm1043_vm3, 1.0, %v5244_v37  ;;  %vm1427_vm8 = vcmp.eq.s32.totalorder %v9052_v50, %v6647_v34  ;;  %v4425_v53 = vsel %vm854_vm6, 1.0, %v5244_v37  ;;  %v9056_v50 = vld [vmem:[#allocation179_spill] sm:$0xff] }
 0x488   : > { %vm857_vm7 = vcmp.eq.s32.totalorder %v9049_v19, %v6647_v34  ;;  %vm1619_vm10 = vcmp.eq.s32.totalorder %v9056_v50, %v6647_v34  ;;  %v9062_v50 = vld [vmem:[#allocation84_spill] sm:$0xff] }
 0x489   : > { %v4428_v57 = vsel %vm857_vm7, 1.0, %v5244_v37  ;;  %vm2579_vm7 = vcmp.eq.s32.totalorder %v6642_v56, %v6647_v34 }
 0x48a   : > { %v969_v32 = vmul.f32 %v4428_v57, %v9062_v50  ;;  %v9069_v57 = vld [vmem:[#allocation152_spill] sm:$0xff]  ;;  %v9072_v50 = vld [vmem:[#allocation182_spill] sm:$0xff] }
 0x48b   : > { %v7061_v12 = vpop.permute.xlu1 %2562  ;;  %v7063_v58 = vpop.permute.xlu2 %2647  ;;  %vm1430_vm15 = vcmp.eq.s32.totalorder %v9069_v57, %v6647_v34  ;;  %vm1622_vm1 = vcmp.eq.s32.totalorder %v9072_v50, %v6647_v34  ;;  %v9081_v50 = vld [vmem:[#allocation242_spill] sm:$0xff] }
 0x48c   : > { %9032 = vst [vmem:[#allocation76_spill] sm:$0xff] %v7061_v12  ;;  %v777_v12 = vmul.f32 %v4412_v44, %v9053_v63  ;;  %vm2006_vm6 = vcmp.eq.s32.totalorder %v9081_v50, %v6647_v34 }
 0x48d   : > { %9033 = vst [vmem:[#allocation91_spill] sm:$0xff] %v7063_v58 }
 0x48e   : > { %2823 = vperm.xlu1 %4893, %v7066_v22   ;;  %4895 = vset.pattern.permute.xlu2 %v8635_v41  ;;  %v7070_v18 = vpop.permute.xlu0 %3399 }
 0x48f   : > { %2913 = vperm.xlu2 %4895, %v7075_v40   ;;  %2946 = vperm.xlu0 %4935, %v5067_v7   ;;  %v9044_v7 = vld [vmem:[#allocation30_spill] sm:$0xff] }
 0x490   : > { %v579_v29 = vmul.f32 %v4390_v11, %v9044_v7  ;;  %v9050_v11 = vld [vmem:[#allocation32_spill] sm:$0xff] }
 0x491   : > { %v582_v7 = vmul.f32 %v4393_v10, %v9050_v11  ;;  %v4454_v10 = vsel %vm1235_vm5, 1.0, %v5244_v37  ;;  %v9055_v11 = vld [vmem:[#allocation111_spill] sm:$0xff] }
 0x492   : > { %v787_v19 = vadd.f32 %v771_v46, %v579_v29  ;;  %v1155_v9 = vmul.f32 %v4438_v17, %v9055_v11  ;;  %v4470_v29 = vsel %vm1427_vm8, 1.0, %v5244_v37  ;;  %v1347_v27 = vmul.f32 %v4454_v10, %v9059_v52  ;;  %v9061_v17 = vld [vmem:[#allocation81_spill] sm:$0xff]  ;;  %v9068_v10 = vld [vmem:[#allocation114_spill] sm:$0xff] }
 0x493   : > { %v7091_v54 = vpop.permute.xlu1 %2619  ;;  %v7093_v35 = vpop.permute.xlu2 %2659  ;;  %v790_v63 = vadd.f32 %v774_v30, %v582_v7  ;;  %v966_v11 = vmul.f32 %v4425_v53, %v9061_v17  ;;  %v4486_v30 = vsel %vm1619_vm10, 1.0, %v5244_v37  ;;  %v4502_v17 = vsel %vm1811_vm11, 1.0, %v5244_v37 }
 0x494   : > { %9040 = vst [vmem:[#allocation79_spill] sm:$0xff] %v7093_v35  ;;  %v9054_v35 = vld [vmem:[#allocation92_spill] sm:$0xff]  ;;  %v979_v24 = vadd.f32 %v963_v47, %v787_v19  ;;  %v9065_v19 = vld [vmem:[#allocation239_spill] sm:$0xff]  ;;  %vm2198_vm8 = vcmp.eq.s32.totalorder %v9086_v36, %v6647_v34  ;;  %v9095_v36 = vld [vmem:[#allocation245_spill] sm:$0xff] }
 0x495   : > { %vm1046_vm9 = vcmp.eq.s32.totalorder %v9054_v35, %v6647_v34  ;;  %vm2003_vm13 = vcmp.eq.s32.totalorder %v9065_v19, %v6647_v34 }
 0x496   : > { %4896 = vset.pattern.permute.xlu1 %v8635_v41  ;;  %v7108_v45 = vpop.permute.xlu0 %3403  ;;  %v4396_v41 = vsel %vm457_vm4, 1.0, %v5244_v37  ;;  %v4441_v59 = vsel %vm1046_vm9, 1.0, %v5244_v37 }
 0x497   : > { %9046 = vst [vmem:[#allocation115_spill] sm:$0xff] %v7108_v45  ;;  %3011 = vperm.xlu1 %4896, %v7055_v26   ;;  %3015 = vperm.xlu2 %4895, %v7066_v22   ;;  %v1158_v53 = vmul.f32 %v4441_v59, %v9068_v10  ;;  %v982_v59 = vadd.f32 %v966_v11, %v790_v63  ;;  %v4444_v11 = vsel %vm1049_vm14, 1.0, %v5244_v37 }
 0x498   : > { %2949 = vperm.xlu0 %4935, %v5068_v3   ;;  %v9057_v3 = vld [vmem:[#allocation33_spill] sm:$0xff] }
 0x499   : > { %v585_v46 = vmul.f32 %v4396_v41, %v9057_v3  ;;  %v9063_v41 = vld [vmem:[#allocation122_spill] sm:$0xff]  ;;  %v1171_v3 = vadd.f32 %v1155_v9, %v979_v24  ;;  %v1174_v63 = vadd.f32 %v1158_v53, %v982_v59  ;;  %v4489_v53 = vsel %vm1622_vm1, 1.0, %v5244_v37 }
 0x49a   : > { %vm1238_vm12 = vcmp.eq.s32.totalorder %v9063_v41, %v6647_v34 }
 0x49b   : > { %v7141_v35 = vpop.permute.xlu1 %2631  ;;  %v7143_v44 = vpop.permute.xlu2 %2671  ;;  %v793_v7 = vadd.f32 %v777_v12, %v585_v46  ;;  %v1363_v12 = vadd.f32 %v1347_v27, %v1171_v3  ;;  %v4457_v9 = vsel %vm1238_vm12, 1.0, %v5244_v37  ;;  %v9070_v46 = vld [vmem:[#allocation210_spill] sm:$0xff]  ;;  %v4518_v27 = vsel %vm2003_vm13, 1.0, %v5244_v37  ;;  %v9073_v3 = vld [vmem:[#allocation243_spill] sm:$0xff] }
 0x49c   : > { %9058 = vst [vmem:[#allocation120_spill] sm:$0xff] %v7143_v44  ;;  %v9064_v44 = vld [vmem:[#allocation177_spill] sm:$0xff]  ;;  %v1923_v10 = vmul.f32 %v4502_v17, %v9073_v3  ;;  %v9080_v3 = vld [vmem:[#allocation180_spill] sm:$0xff]  ;;  %vm2009_vm12 = vcmp.eq.s32.totalorder %v9095_v36, %v6647_v34  ;;  %vm2582_vm13 = vcmp.eq.s32.totalorder %v6658_v43, %v6647_v34 }
 0x49d   : > { %v1539_v47 = vmul.f32 %v4470_v29, %v9064_v44  ;;  %v1731_v29 = vmul.f32 %v4486_v30, %v9070_v46  ;;  %v9071_v44 = vld [vmem:[#allocation269_spill] sm:$0xff]  ;;  %v985_v24 = vadd.f32 %v969_v32, %v793_v7  ;;  %v4473_v30 = vsel %vm1430_vm15, 1.0, %v5244_v37  ;;  %v7188_v32 = vld [vmem:[%s5358_s27 + $0x30] sm:$0xff] }
 0x49e   : > { %v7157_v52 = vpop.permute.xlu0 %3312  ;;  %vm2195_vm0 = vcmp.eq.s32.totalorder %v9071_v44, %v6647_v34  ;;  %v9074_v7 = vld [vmem:[#allocation147_spill] sm:$0xff]  ;;  %v2115_v46 = vmul.f32 %v4518_v27, %v9077_v15  ;;  %v9082_v27 = vld [vmem:[#allocation305_spill] sm:$0xff]  ;;  %v4569_v43 = vsel %vm2582_vm13, 1.0, %v5244_v37 }
 0x49f   : > { %9066 = vst [vmem:[#allocation98_spill] sm:$0xff] %v7157_v52  ;;  %4897 = vset.pattern.permute.xlu1 %v9024_v20  ;;  %4898 = vset.pattern.permute.xlu2 %v9024_v20  ;;  %v1555_v41 = vadd.f32 %v1539_v47, %v1363_v12  ;;  %v1350_v47 = vmul.f32 %v4457_v9, %v9074_v7  ;;  %v4534_v19 = vsel %vm2195_vm0, 1.0, %v5244_v37  ;;  %v9076_v12 = vld [vmem:[#allocation212_spill] sm:$0xff]  ;;  %v9078_v9 = vld [vmem:[#allocation125_spill] sm:$0xff]  ;;  %v9079_v44 = vld [vmem:[#allocation155_spill] sm:$0xff] }
 0x4a0   : > { %3105 = vperm.xlu1 %4897, %v7075_v40   ;;  %3108 = vperm.xlu2 %4898, %v7006_v23   ;;  %vm1814_vm3 = vcmp.eq.s32.totalorder %v9076_v12, %v6647_v34  ;;  %vm1241_vm4 = vcmp.eq.s32.totalorder %v9078_v9, %v6647_v34  ;;  %vm1433_vm5 = vcmp.eq.s32.totalorder %v9079_v44, %v6647_v34  ;;  %v9083_v15 = vld [vmem:[#allocation117_spill] sm:$0xff]  ;;  %v9091_v44 = vld [vmem:[#allocation150_spill] sm:$0xff] }
 0x4a1   : > { %4946 = vset.pattern.permute.xlu0 %v9024_v20  ;;  %v1747_v17 = vadd.f32 %v1731_v29, %v1555_v41  ;;  %v1542_v29 = vmul.f32 %v4473_v30, %v9080_v3  ;;  %v4550_v41 = vsel %vm2387_vm2, 1.0, %v5244_v37  ;;  %v2307_v12 = vmul.f32 %v4534_v19, %v9082_v27  ;;  %v9093_v27 = vld [vmem:[#allocation279_spill] sm:$0xff] }
 0x4a2   : > { %3117 = vperm.xlu0 %4946, %v7188_v32   ;;  %v1161_v9 = vmul.f32 %v4444_v11, %v9083_v15  ;;  %v1366_v52 = vadd.f32 %v1350_v47, %v1174_v63  ;;  %v4505_v30 = vsel %vm1814_vm3, 1.0, %v5244_v37  ;;  %v4460_v33 = vsel %vm1241_vm4, 1.0, %v5244_v37 }
 0x4a3   : > { %v7200_v57 = vpop.permute.xlu1 %2643  ;;  %v1939_v7 = vadd.f32 %v1923_v10, %v1747_v17  ;;  %v2499_v19 = vmul.f32 %v4550_v41, %v6838_v49  ;;  %v4476_v63 = vsel %vm1433_vm5, 1.0, %v5244_v37  ;;  %v4521_v11 = vsel %vm2006_vm6, 1.0, %v5244_v37  ;;  %v9087_v49 = vld [vmem:[#allocation185_spill] sm:$0xff] }
 0x4a4   : > { %9075 = vst [vmem:[#allocation101_spill] sm:$0xff] %v7200_v57  ;;  %v7209_v59 = vpop.permute.xlu2 %2715  ;;  %v9084_v57 = vld [vmem:[#allocation213_spill] sm:$0xff]  ;;  %v1558_v56 = vadd.f32 %v1542_v29, %v1366_v52  ;;  %v4566_v47 = vsel %vm2579_vm7, 1.0, %v5244_v37  ;;  %vm1625_vm9 = vcmp.eq.s32.totalorder %v9087_v49, %v6647_v34  ;;  %v9089_v52 = vld [vmem:[#allocation299_spill] sm:$0xff]  ;;  %v1353_v29 = vmul.f32 %v4460_v33, %v9091_v44  ;;  %v9098_v49 = vld [vmem:[#allocation216_spill] sm:$0xff] }
 0x4a5   : > { %v1734_v58 = vmul.f32 %v4489_v53, %v9084_v57  ;;  %v2131_v10 = vadd.f32 %v2115_v46, %v1939_v7  ;;  %vm2390_vm10 = vcmp.eq.s32.totalorder %v9089_v52, %v6647_v34  ;;  %v7252_v53 = vld [vmem:[%s5363_s30 + $0x58] sm:$0xff]  ;;  %v1177_v46 = vadd.f32 %v1161_v9, %v985_v24  ;;  %v9092_v7 = vld [vmem:[#allocation215_spill] sm:$0xff] }
 0x4a6   : > { %v7228_v3 = vpop.permute.xlu0 %3315  ;;  %9090 = vst [vmem:[#allocation104_spill] sm:$0xff] %v7252_v53  ;;  %vm1817_vm11 = vcmp.eq.s32.totalorder %v9092_v7, %v6647_v34  ;;  %v2118_v15 = vmul.f32 %v4521_v11, %v9093_v27  ;;  %v4553_v9 = vsel %vm2390_vm10, 1.0, %v5244_v37  ;;  %v9099_v44 = vld [vmem:[#allocation275_spill] sm:$0xff]  ;;  %v9101_v7 = vld [vmem:[#allocation302_spill] sm:$0xff]  ;;  %vm2585_vm0 = vcmp.eq.s32.totalorder %v6708_v13, %v6647_v34 }
 0x4a7   : > { %9085 = vst [vmem:[#allocation118_spill] sm:$0xff] %v7228_v3  ;;  %v2323_v17 = vadd.f32 %v2307_v12, %v2131_v10  ;;  %v1750_v41 = vadd.f32 %v1734_v58, %v1558_v56  ;;  %v4492_v58 = vsel %vm1625_vm9, 1.0, %v5244_v37  ;;  %v1369_v11 = vadd.f32 %v1353_v29, %v1177_v46  ;;  %v9100_v29 = vld [vmem:[#allocation249_spill] sm:$0xff] }
 0x4a8   : > { %3207 = vperm.xlu1 %4897, %v7066_v22   ;;  %4899 = vset.pattern.permute.xlu2 %v9028_v60  ;;  %v9088_v22 = vld [vmem:[#allocation246_spill] sm:$0xff]  ;;  %vm2201_vm14 = vcmp.eq.s32.totalorder %v9099_v44, %v6647_v34  ;;  %v2502_v52 = vmul.f32 %v4553_v9, %v6889_v38  ;;  %vm2393_vm15 = vcmp.eq.s32.totalorder %v9101_v7, %v6647_v34  ;;  %v9105_v44 = vmov 12  }
 0x4a9   : > { %3297 = vperm.xlu2 %4899, %v7075_v40   ;;  %v1926_v57 = vmul.f32 %v4505_v30, %v9088_v22  ;;  %v4537_v40 = vsel %vm2198_vm8, 1.0, %v5244_v37  ;;  %v2515_v12 = vadd.f32 %v2499_v19, %v2323_v17  ;;  %v9094_v22 = vld [vmem:[#allocation183_spill] sm:$0xff]  ;;  %v1737_v17 = vmul.f32 %v4492_v58, %v9098_v49  ;;  %v5071_v38 = vld [vmem:[%s5363_s30 + $0x60] sm:$0xff] }
 0x4aa   : > { %3239 = vperm.xlu0 %4946, %v7252_v53   ;;  %v1545_v24 = vmul.f32 %v4476_v63, %v9094_v22  ;;  %v9096_v19 = vld [vmem:[#allocation307_spill] sm:$0xff]  ;;  %v9102_v22 = vld [vmem:[#allocation282_spill] sm:$0xff]  ;;  %v4556_v9 = vsel %vm2393_vm15, 1.0, %v5244_v37 }
 0x4ab   : > { %v2656_v50 = vpop.permute.xlu1 %2655  ;;  %v1942_v33 = vadd.f32 %v1926_v57, %v1750_v41  ;;  %v2310_v56 = vmul.f32 %v4537_v40, %v9096_v19  ;;  %v4524_v57 = vsel %vm2009_vm12, 1.0, %v5244_v37  ;;  %v9103_v19 = vld [vmem:[#allocation308_spill] sm:$0xff]  ;;  %v2505_v49 = vmul.f32 %v4556_v9, %v6941_v55  ;;  %v7324_v7 = vld [vmem:[%s5363_s30 + $0x20] sm:$0xff] }
 0x4ac   : > { %v2691_v30 = vmul.f32 %v4566_v47, %v2656_v50  ;;  %v7263_v10 = vpop.permute.xlu2 %2811  ;;  %v4508_v47 = vsel %vm1817_vm11, 1.0, %v5244_v37  ;;  %v1561_v46 = vadd.f32 %v1545_v24, %v1369_v11  ;;  %v2121_v58 = vmul.f32 %v4524_v57, %v9102_v22  ;;  %v5073_v55 = vld [vmem:[%s5358_s27 + $0x78] sm:$0xff]  ;;  %v9109_v22 = vld [vmem:[#allocation34_spill] sm:$0xff] }
 0x4ad   : > { %v2134_v50 = vadd.f32 %v2118_v15, %v1942_v33  ;;  %v1929_v40 = vmul.f32 %v4508_v47, %v9100_v29  ;;  %v4540_v15 = vsel %vm2201_vm14, 1.0, %v5244_v37  ;;  %vm651_vm1 = vcmp.eq.s32.totalorder %v9109_v22, %v6647_v34  ;;  %v9118_v22 = vld [vmem:[#allocation14_spill] sm:$0xff] }
 0x4ae   : > { %v7279_v63 = vadd.f32 %v2691_v30, %v2515_v12  ;;  %v1753_v30 = vadd.f32 %v1737_v17, %v1561_v46  ;;  %v2313_v11 = vmul.f32 %v4540_v15, %v9103_v19  ;;  %v4572_v17 = vsel %vm2585_vm0, 1.0, %v5244_v37  ;;  %v5076_v15 = vld [vmem:[%s5363_s30 + $0x68] sm:$0xff] }
 0x4af   : > { %v7289_v41 = vpop.permute.xlu0 %2718  ;;  %v2326_v27 = vadd.f32 %v2310_v56, %v2134_v50  ;;  %v4398_v9 = vsel %vm651_vm1, 1.0, %v5244_v37  ;;  %v9113_v19 = vld [vmem:[#allocation11_spill] sm:$0xff] }
 0x4b0   : > { %9097 = vst [vmem:[#allocation107_spill] sm:$0xff] %v7279_v63  ;;  %4900 = vset.pattern.permute.xlu1 %v9028_v60  ;;  %v1945_v33 = vadd.f32 %v1929_v40, %v1753_v30  ;;  %vm442_vm4 = vcmp.eq.s32.totalorder %v9113_v19, %v6647_v34  ;;  %v9121_v63 = vld [vmem:[#allocation113_spill] sm:$0xff] }
 0x4b1   : > { %3300 = vperm.xlu1 %4900, %v7006_v23   ;;  %3395 = vperm.xlu2 %4899, %v7055_v26   ;;  %v2518_v36 = vadd.f32 %v2502_v52, %v2326_v27  ;;  %v7313_v52 = vld [vmem:[%s5358_s27 + $0x28] sm:$0xff]  ;;  %vm1227_vm8 = vcmp.eq.s32.totalorder %v9121_v63, %v6647_v34 }
 0x4b2   : > { %3243 = vperm.xlu0 %4946, %v5071_v38   ;;  %v2137_v47 = vadd.f32 %v2121_v58, %v1945_v33  ;;  %v7328_v27 = vld [vmem:[%s5363_s30 + $0x28] sm:$0xff]  ;;  %v9110_v58 = vld [vmem:[#allocation13_spill] sm:$0xff]  ;;  %v9112_v33 = vmov 13  }
 0x4b3   : > { %v2668_v12 = vpop.permute.xlu1 %2667  ;;  %vm443_vm2 = vcmp.eq.s32.totalorder %v9110_v58, %v6647_v34  ;;  %v9126_v63 = vld [vmem:[#allocation94_spill] sm:$0xff] }
 0x4b4   : > { %v2694_v23 = vmul.f32 %v4569_v43, %v2668_v12  ;;  %v2329_v50 = vadd.f32 %v2313_v11, %v2137_v47  ;;  %v4382_v11 = vsel %vm443_vm2, 1.0, %v5244_v37  ;;  %v9114_v47 = vld [vmem:[#allocation29_spill] sm:$0xff] }
 0x4b5   : > { %v7300_v24 = vpop.permute.xlu2 %2907  ;;  %vm650_vm5 = vcmp.eq.s32.totalorder %v9114_v47, %v6647_v34  ;;  %v571_v58 = vmul.f32 %v4382_v11, %v9118_v22  ;;  %v9119_v47 = vld [vmem:[#allocation46_spill] sm:$0xff]  ;;  %v9123_v11 = vld [vmem:[#allocation77_spill] sm:$0xff] }
 0x4b6   : > { %v7305_v56 = vadd.f32 %v2694_v23, %v2518_v36  ;;  %v2521_v43 = vadd.f32 %v2505_v49, %v2329_v50  ;;  %v4736_v36 = vld [vmem:[%s8592_s2 + $0x18] sm:$0xff]  ;;  %v4397_v19 = vsel %vm650_vm5, 1.0, %v5244_v37  ;;  %vm1034_vm9 = vcmp.eq.s32.totalorder %v9123_v11, %v6647_v34 }
 0x4b7   : > { %v7316_v13 = vpop.permute.xlu0 %2839  ;;  %v9111_v23 = vld [vmem:[#allocation56_spill] sm:$0xff]  ;;  %3616 = vmatpush.bf16.msra.mxu0 %v4736_v36  ;;  %v9120_v36 = vld [vmem:[#allocation61_spill] sm:$0xff]  ;;  %v4429_v31 = vsel %vm1034_vm9, 1.0, %v5244_v37  ;;  %vm2762_vm9 = vcmp.eq.s32.totalorder %v7209_v59, %v6647_v34 }
 0x4b8   : > { %9104 = vst [vmem:[#allocation109_spill] sm:$0xff] %v7305_v56  ;;  %vm843_vm3 = vcmp.eq.s32.totalorder %v9111_v23, %v6647_v34  ;;  %v4381_v23 = vsel %vm442_vm4, 1.0, %v5244_v37 }
 0x4b9   : > { %4901 = vset.pattern.permute.xlu1 %v9105_v44  ;;  %4902 = vset.pattern.permute.xlu2 %v9105_v44  ;;  %9106 = vst [vmem:[#allocation121_spill] sm:$0xff] %v7316_v13  ;;  %v4414_v49 = vsel %vm843_vm3, 1.0, %v5244_v37  ;;  %v9128_v13 = vld [vmem:[#allocation143_spill] sm:$0xff] }
 0x4ba   : > { %2727 = vperm.xlu1 %4901, %v7029_v39   ;;  %2730 = vperm.xlu2 %4902, %v7313_v52   ;;  %vm1419_vm11 = vcmp.eq.s32.totalorder %v9128_v13, %v6647_v34  ;;  %v4733_v13 = vld [vmem:[%s8592_s2] sm:$0xff] }
 0x4bb   : > { %v2680_v57 = vpop.permute.xlu1 %2679  ;;  %3144 = vperm.xlu0 %4946, %v5073_v55   ;;  %v5077_v55 = vld [vmem:[%s5363_s30 + $0x70] sm:$0xff] }
 0x4bc   : > { %v2697_v46 = vmul.f32 %v4572_v17, %v2680_v57  ;;  %v9115_v17 = vld [vmem:[#allocation83_spill] sm:$0xff] }
 0x4bd   : > { %v7321_v40 = vpop.permute.xlu2 %3007  ;;  %vm1035_vm6 = vcmp.eq.s32.totalorder %v9115_v17, %v6647_v34  ;;  %v4735_v57 = vld [vmem:[%s8592_s2 + $0x10] sm:$0xff]  ;;  %v762_v17 = vmul.f32 %v4397_v19, %v9119_v47  ;;  %v9125_v47 = vld [vmem:[#allocation69_spill] sm:$0xff] }
 0x4be   : > { %v7319_v29 = vadd.f32 %v2697_v46, %v2521_v43  ;;  %v9116_v43 = vld [vmem:[#allocation38_spill] sm:$0xff]  ;;  %v4430_v56 = vsel %vm1035_vm6, 1.0, %v5244_v37  ;;  %3617 = vmatpush.bf16.msra.mxu0 %v4735_v57 }
 0x4bf   : > { %v7335_v12 = vpop.permute.xlu0 %2843  ;;  %v763_v46 = vmul.f32 %v4398_v9, %v9116_v43  ;;  %v1147_v3 = vmul.f32 %v4430_v56, %v9126_v63  ;;  %v9130_v56 = vld [vmem:[#allocation142_spill] sm:$0xff] }
 0x4c0   : > { %9107 = vst [vmem:[#allocation124_spill] sm:$0xff] %v7319_v29  ;;  %v955_v29 = vmul.f32 %v4414_v49, %v9120_v36  ;;  %v9124_v49 = vld [vmem:[#allocation24_spill] sm:$0xff]  ;;  %vm1418_vm12 = vcmp.eq.s32.totalorder %v9130_v56, %v6647_v34 }
 0x4c1   : > { %9108 = vst [vmem:[#allocation128_spill] sm:$0xff] %v7335_v12  ;;  %v570_v22 = vmul.f32 %v4381_v23, %v9124_v49  ;;  %v779_v19 = vadd.f32 %v763_v46, %v571_v58  ;;  %v4446_v12 = vsel %vm1227_vm8, 1.0, %v5244_v37  ;;  %v9129_v46 = vld [vmem:[#allocation102_spill] sm:$0xff]  ;;  %v9131_v23 = vld [vmem:[#allocation173_spill] sm:$0xff]  ;;  %v9133_v49 = vmov 0  }
 0x4c2   : > { %2827 = vperm.xlu1 %4901, %v7324_v7   ;;  %2831 = vperm.xlu2 %4902, %v7328_v27   ;;  %v1146_v58 = vmul.f32 %v4429_v31, %v9129_v46  ;;  %vm1611_vm13 = vcmp.eq.s32.totalorder %v9131_v23, %v6647_v34  ;;  %v9135_v46 = vld [vmem:[#allocation175_spill] sm:$0xff]  ;;  %vm2570_vm8 = vcmp.eq.s32.totalorder %v6793_v48, %v6647_v34 }
 0x4c3   : > { %4950 = vset.pattern.permute.xlu0 %v9028_v60  ;;  %v778_v57 = vadd.f32 %v762_v17, %v570_v22  ;;  %v971_v11 = vadd.f32 %v955_v29, %v779_v19  ;;  %v9132_v29 = vld [vmem:[#allocation127_spill] sm:$0xff]  ;;  %vm1610_vm14 = vcmp.eq.s32.totalorder %v9135_v46, %v6647_v34  ;;  %v4478_v56 = vsel %vm1611_vm13, 1.0, %v5244_v37  ;;  %v9141_v46 = vld [vmem:[#allocation193_spill] sm:$0xff] }
 0x4c4   : > { %v7332_v38 = vpop.permute.xlu1 %2721  ;;  %3439 = vperm.xlu0 %4950, %v5076_v15   ;;  %v9117_v15 = vld [vmem:[#allocation51_spill] sm:$0xff]  ;;  %v1339_v17 = vmul.f32 %v4446_v12, %v9132_v29  ;;  %v4477_v45 = vsel %vm1610_vm14, 1.0, %v5244_v37 }
 0x4c5   : > { %vm842_vm7 = vcmp.eq.s32.totalorder %v9117_v15, %v6647_v34  ;;  %v4734_v15 = vld [vmem:[%s8592_s2 + $0x8] sm:$0xff]  ;;  %v1163_v19 = vadd.f32 %v1147_v3, %v971_v11  ;;  %v9140_v11 = vld [vmem:[#allocation233_spill] sm:$0xff] }
 0x4c6   : > { %v7337_v30 = vpop.permute.xlu2 %3102  ;;  %v4413_v43 = vsel %vm842_vm7, 1.0, %v5244_v37  ;;  %3618 = vmatpush.bf16.msra.mxu0 %v4734_v15  ;;  %v4461_v15 = vsel %vm1418_vm12, 1.0, %v5244_v37  ;;  %v9136_v12 = vld [vmem:[#allocation203_spill] sm:$0xff]  ;;  %vm1995_vm1 = vcmp.eq.s32.totalorder %v9140_v11, %v6647_v34 }
 0x4c7   : > { %v954_v36 = vmul.f32 %v4413_v43, %v9125_v47  ;;  %v4462_v43 = vsel %vm1419_vm11, 1.0, %v5244_v37  ;;  %v9134_v47 = vld [vmem:[#allocation135_spill] sm:$0xff]  ;;  %vm1803_vm15 = vcmp.eq.s32.totalorder %v9136_v12, %v6647_v34  ;;  %v1355_v3 = vadd.f32 %v1339_v17, %v1163_v19 }
 0x4c8   : > { %v1531_v53 = vmul.f32 %v4462_v43, %v9137_v5  ;;  %v1723_v12 = vmul.f32 %v4478_v56, %v9141_v46  ;;  %v9142_v5 = vld [vmem:[#allocation201_spill] sm:$0xff]  ;;  %vm2954_vm11 = vcmp.eq.s32.totalorder %v7300_v24, %v6647_v34  ;;  %vm3147_vm14 = vcmp.eq.s32.totalorder %v7337_v30, %v6647_v34 }
 0x4c9   : > { %v970_v22 = vadd.f32 %v954_v36, %v778_v57  ;;  %v9139_v57 = vld [vmem:[#allocation208_spill] sm:$0xff]  ;;  %v1722_v43 = vmul.f32 %v4477_v45, %v9142_v5  ;;  %v9146_v45 = vld [vmem:[#allocation263_spill] sm:$0xff] }
 0x4ca   : > { %4903 = vset.pattern.permute.xlu1 %v9112_v33  ;;  %4904 = vset.pattern.permute.xlu2 %v9112_v33  ;;  %vm1802_vm0 = vcmp.eq.s32.totalorder %v9139_v57, %v6647_v34  ;;  %v1547_v17 = vadd.f32 %v1531_v53, %v1355_v3  ;;  %vm2187_vm3 = vcmp.eq.s32.totalorder %v9146_v45, %v6647_v34  ;;  %v9147_v57 = vld [vmem:[#allocation274_spill] sm:$0xff]  ;;  %v9152_v45 = vld [vmem:[#allocation297_spill] sm:$0xff] }
 0x4cb   : > { %2922 = vperm.xlu1 %4903, %v7313_v52   ;;  %3019 = vperm.xlu2 %4904, %v7324_v7   ;;  %v1162_v29 = vadd.f32 %v1146_v58, %v970_v22  ;;  %v4494_v58 = vsel %vm1803_vm15, 1.0, %v5244_v37  ;;  %v4493_v19 = vsel %vm1802_vm0, 1.0, %v5244_v37  ;;  %vm2186_vm4 = vcmp.eq.s32.totalorder %v9147_v57, %v6647_v34 }
 0x4cc   : > { %v7361_v50 = vpop.permute.xlu1 %2815  ;;  %3443 = vperm.xlu0 %4950, %v5077_v55   ;;  %v7378_v55 = vpop.permute.xlu0 %2748  ;;  %3619 = vmatpush.bf16.msra.mxu0 %v4733_v13  ;;  %v9143_v13 = vld [vmem:[#allocation241_spill] sm:$0xff]  ;;  %v1739_v53 = vadd.f32 %v1723_v12, %v1547_v17 }
 0x4cd   : > { %9122 = vst [vmem:[#allocation131_spill] sm:$0xff] %v7378_v55  ;;  %v9127_v55 = vld [vmem:[#allocation110_spill] sm:$0xff]  ;;  %vm1994_vm2 = vcmp.eq.s32.totalorder %v9143_v13, %v6647_v34  ;;  %v9150_v13 = vld [vmem:[#allocation291_spill] sm:$0xff] }
 0x4ce   : > { %vm1226_vm10 = vcmp.eq.s32.totalorder %v9127_v55, %v6647_v34  ;;  %vm2379_vm5 = vcmp.eq.s32.totalorder %v9150_v13, %v6647_v34 }
 0x4cf   : > { %v7380_v9 = vpop.permute.xlu2 %3291  ;;  %v4445_v55 = vsel %vm1226_vm10, 1.0, %v5244_v37  ;;  %vm2763_vm10 = vcmp.eq.s32.totalorder %v7289_v41, %v6647_v34 }
 0x4d0   : > { %v1338_v63 = vmul.f32 %v4445_v55, %v9134_v47  ;;  %vm3338_vm15 = vcmp.eq.s32.totalorder %v7380_v9, %v6647_v34 }
 0x4d2   : > { %v1354_v47 = vadd.f32 %v1338_v63, %v1162_v29  ;;  %v9144_v63 = vld [vmem:[#allocation226_spill] sm:$0xff] }
 0x4d3   : > { %3023 = vperm.xlu1 %4903, %v7328_v27   ;;  %4905 = vset.pattern.permute.xlu2 %v9024_v20  ;;  %v1915_v56 = vmul.f32 %v4494_v58, %v9144_v63  ;;  %v9145_v29 = vld [vmem:[#allocation234_spill] sm:$0xff]  ;;  %v4526_v58 = vsel %vm2187_vm3, 1.0, %v5244_v37  ;;  %v9151_v63 = vld [vmem:[#allocation304_spill] sm:$0xff]  ;;  %vm3482_vm3 = vcmask 130048  }
 0x4d4   : > { %3111 = vperm.xlu2 %4905, %v7029_v39   ;;  %4954 = vset.pattern.permute.xlu0 %v9133_v49  ;;  %v9138_v49 = vld [vmem:[#allocation168_spill] sm:$0xff]  ;;  %v7429_v55 = vpop.permute.xlu0 %2751  ;;  %vm2378_vm6 = vcmp.eq.s32.totalorder %v9151_v63, %v6647_v34 }
 0x4d5   : > { %v7411_v31 = vpop.permute.xlu1 %3003  ;;  %v1530_v36 = vmul.f32 %v4461_v15, %v9138_v49  ;;  %v4510_v15 = vsel %vm1995_vm1, 1.0, %v5244_v37  ;;  %v1914_v49 = vmul.f32 %v4493_v19, %v9145_v29  ;;  %v4525_v19 = vsel %vm2186_vm4, 1.0, %v5244_v37 }
 0x4d6   : > { %v1931_v12 = vadd.f32 %v1915_v56, %v1739_v53  ;;  %v4541_v13 = vsel %vm2378_vm6, 1.0, %v5244_v37  ;;  %vm3587_vm1 = vcmask 523264  }
 0x4d7   : > { %v7421_v23 = vpop.permute.xlu2 %3387  ;;  %v1546_v22 = vadd.f32 %v1530_v36, %v1354_v47  ;;  %v4509_v36 = vsel %vm1994_vm2, 1.0, %v5244_v37  ;;  %v9148_v47 = vld [vmem:[#allocation259_spill] sm:$0xff]  ;;  %v2490_v56 = vmul.f32 %v4541_v13, %v6689_v51 }
 0x4d8   : > { %v2107_v46 = vmul.f32 %v4510_v15, %v9148_v47  ;;  %v4542_v15 = vsel %vm2379_vm5, 1.0, %v5244_v37  ;;  %v9154_v47 = vld [vmem:[#allocation290_spill] sm:$0xff] }
 0x4d9   : > { %v1738_v11 = vadd.f32 %v1722_v43, %v1546_v22  ;;  %v2298_v43 = vmul.f32 %v4525_v19, %v9152_v45  ;;  %v9153_v22 = vld [vmem:[#allocation310_spill] sm:$0xff]  ;;  %v2491_v53 = vmul.f32 %v4542_v15, %v6630_v6  ;;  %v4573_v6 = vsel %vm2762_vm9, 1.0, %v5244_v37 }
 0x4da   : > { %vm2571_vm7 = vcmp.eq.s32.totalorder %v9153_v22, %v6647_v34  ;;  %v2123_v57 = vadd.f32 %v2107_v46, %v1931_v12  ;;  %v2874_v24 = vmul.f32 %v4573_v6, %v7263_v10  ;;  %v4606_v15 = vsel %vm3147_vm14, 1.0, %v5244_v37 }
 0x4db   : > { %4907 = vset.pattern.permute.xlu1 %v9024_v20  ;;  %v1930_v17 = vadd.f32 %v1914_v49, %v1738_v11  ;;  %v4558_v49 = vsel %vm2571_vm7, 1.0, %v5244_v37  ;;  %v4557_v11 = vsel %vm2570_vm8, 1.0, %v5244_v37  ;;  %vm2573_vm14 = vcmp.eq.s32.totalorder %v6850_v14, %v6647_v34 }
 0x4dc   : > { %3211 = vperm.xlu1 %4907, %v7324_v7   ;;  %3215 = vperm.xlu2 %4905, %v7328_v27   ;;  %v9149_v7 = vld [vmem:[#allocation267_spill] sm:$0xff]  ;;  %v2911_v63 = vpop.permute.xlu0 %2910  ;;  %v2682_v51 = vmul.f32 %v4557_v11, %v7091_v54 }
 0x4dd   : > { %v2106_v5 = vmul.f32 %v4509_v36, %v9149_v7  ;;  %v2299_v7 = vmul.f32 %v4526_v58, %v9154_v47  ;;  %vm2955_vm12 = vcmp.eq.s32.totalorder %v2911_v63, %v6647_v34 }
 0x4de   : > { %v3100_v3 = vpop.permute.xlu1 %3099  ;;  %v4590_v19 = vsel %vm2955_vm12, 1.0, %v5244_v37 }
 0x4df   : > { %v2122_v36 = vadd.f32 %v2106_v5, %v1930_v17  ;;  %vm3146_vm13 = vcmp.eq.s32.totalorder %v3100_v3, %v6647_v34  ;;  %v2315_v5 = vadd.f32 %v2299_v7, %v2123_v57  ;;  %v4589_v3 = vsel %vm2954_vm11, 1.0, %v5244_v37 }
 0x4e0   : > { %v7457_v29 = vpop.permute.xlu2 %2819  ;;  %v4605_v12 = vsel %vm3146_vm13, 1.0, %v5244_v37  ;;  %v3066_v45 = vmul.f32 %v4589_v3, %v7411_v31  ;;  %v3067_v10 = vmul.f32 %v4590_v19, %v7321_v40 }
 0x4e1   : > { %v2314_v48 = vadd.f32 %v2298_v43, %v2122_v36  ;;  %v2507_v58 = vadd.f32 %v2491_v53, %v2315_v5  ;;  %v3258_v22 = vmul.f32 %v4605_v12, %v7001_v4  ;;  %v4621_v4 = vsel %vm3338_vm15, 1.0, %v5244_v37  ;;  %v9157_v5 = vld [vmem:[#allocation53_spill] sm:$0xff]  ;;  %v9160_v12 = vld [vmem:[#allocation27_spill] sm:$0xff] }
 0x4e2   : > { %v3450_v47 = vmul.f32 %v4621_v4, %v7421_v23  ;;  %vm845_vm5 = vcmp.eq.s32.totalorder %v9157_v5, %v6647_v34  ;;  %v9166_v4 = vld [vmem:[#allocation178_spill] sm:$0xff]  ;;  %vm2764_vm15 = vcmp.eq.s32.totalorder %v7332_v38, %v6647_v34 }
 0x4e3   : > { %v2506_v54 = vadd.f32 %v2490_v56, %v2314_v48  ;;  %v5078_v48 = vld [vmem:[%s5358_s27 + $0x38] sm:$0xff]  ;;  %v4416_v19 = vsel %vm845_vm5, 1.0, %v5244_v37  ;;  %vm1613_vm9 = vcmp.eq.s32.totalorder %v9166_v4, %v6647_v34  ;;  %v4575_v38 = vsel %vm2764_vm15, 1.0, %v5244_v37 }
 0x4e4   : > { %4908 = vset.pattern.permute.xlu1 %v9028_v60  ;;  %4909 = vset.pattern.permute.xlu2 %v9028_v60  ;;  %vm3151_vm15 = vcmp.eq.s32.totalorder %v7041_v25, %v6647_v34 }
 0x4e5   : > { %3303 = vperm.xlu1 %4908, %v7029_v39   ;;  %3306 = vperm.xlu2 %4909, %v7313_v52   ;;  %v4574_v39 = vsel %vm2763_vm10, 1.0, %v5244_v37  ;;  %v2683_v52 = vmul.f32 %v4558_v49, %v7036_v8  ;;  %v2698_v59 = vadd.f32 %v2682_v51, %v2506_v54  ;;  %v7521_v49 = vld [vmem:[%s5363_s30 + $0x30] sm:$0xff] }
 0x4e6   : > { %v3200_v46 = vpop.permute.xlu1 %3199  ;;  %v2875_v41 = vmul.f32 %v4574_v39, %v7361_v50  ;;  %v9155_v51 = vld [vmem:[#allocation31_spill] sm:$0xff]  ;;  %v3489_v39 = vsel %vm3482_vm3, %v7055_v26, 0.0  ;;  %v7556_v26 = vld [vmem:[%s5363_s30 + $0x38] sm:$0xff] }
 0x4e7   : > { %v2699_v8 = vadd.f32 %v2683_v52, %v2507_v58  ;;  %v2890_v43 = vadd.f32 %v2874_v24, %v2698_v59  ;;  %v3259_v50 = vmul.f32 %v4606_v15, %v3200_v46  ;;  %vm653_vm2 = vcmp.eq.s32.totalorder %v9155_v51, %v6647_v34  ;;  %v9156_v46 = vld [vmem:[#allocation12_spill] sm:$0xff] }
 0x4e8   : > { %vm445_vm4 = vcmp.eq.s32.totalorder %v9156_v46, %v6647_v34  ;;  %v4400_v54 = vsel %vm653_vm2, 1.0, %v5244_v37  ;;  %v9158_v52 = vld [vmem:[#allocation48_spill] sm:$0xff] }
 0x4e9   : > { %v7497_v17 = vpop.permute.xlu2 %2913  ;;  %v2891_v57 = vadd.f32 %v2875_v41, %v2699_v8  ;;  %v3082_v30 = vadd.f32 %v3066_v45, %v2890_v43  ;;  %v765_v24 = vmul.f32 %v4400_v54, %v9158_v52  ;;  %v9159_v58 = vld [vmem:[#allocation80_spill] sm:$0xff]  ;;  %v4384_v3 = vsel %vm445_vm4, 1.0, %v5244_v37 }
 0x4ea   : > { %vm1037_vm6 = vcmp.eq.s32.totalorder %v9159_v58, %v6647_v34  ;;  %v573_v59 = vmul.f32 %v4384_v3, %v9160_v12  ;;  %v9161_v41 = vld [vmem:[#allocation72_spill] sm:$0xff]  ;;  %vm2956_vm2 = vcmp.eq.s32.totalorder %v7497_v17, %v6647_v34 }
 0x4eb   : > { %v3083_v40 = vadd.f32 %v3067_v10, %v2891_v57  ;;  %v3274_v36 = vadd.f32 %v3258_v22, %v3082_v30  ;;  %v957_v45 = vmul.f32 %v4416_v19, %v9161_v41  ;;  %v9162_v8 = vld [vmem:[#allocation112_spill] sm:$0xff]  ;;  %v4432_v43 = vsel %vm1037_vm6, 1.0, %v5244_v37  ;;  %v9163_v22 = vld [vmem:[#allocation105_spill] sm:$0xff]  ;;  %v9173_v41 = vld [vmem:[#allocation270_spill] sm:$0xff] }
 0x4ec   : > { %vm1229_vm7 = vcmp.eq.s32.totalorder %v9162_v8, %v6647_v34  ;;  %v781_v10 = vadd.f32 %v765_v24, %v573_v59  ;;  %v1149_v15 = vmul.f32 %v4432_v43, %v9163_v22  ;;  %v9164_v57 = vld [vmem:[#allocation145_spill] sm:$0xff]  ;;  %v9169_v46 = vld [vmem:[#allocation204_spill] sm:$0xff]  ;;  %v9174_v8 = vld [vmem:[#allocation306_spill] sm:$0xff] }
 0x4ed   : > { %3407 = vperm.xlu1 %4908, %v7328_v27   ;;  %4910 = vset.pattern.permute.xlu2 %v9105_v44  ;;  %v3275_v7 = vadd.f32 %v3259_v50, %v3083_v40  ;;  %v3466_v56 = vadd.f32 %v3450_v47, %v3274_v36  ;;  %vm1421_vm8 = vcmp.eq.s32.totalorder %v9164_v57, %v6647_v34  ;;  %v4448_v50 = vsel %vm1229_vm7, 1.0, %v5244_v37  ;;  %v9165_v40 = vld [vmem:[#allocation138_spill] sm:$0xff]  ;;  %v9171_v24 = vld [vmem:[#allocation237_spill] sm:$0xff]  ;;  %v9175_v22 = vld [vmem:[#allocation300_spill] sm:$0xff] }
 0x4ee   : > { %2733 = vperm.xlu2 %4910, %v7188_v32   ;;  %v1341_v36 = vmul.f32 %v4448_v50, %v9165_v40  ;;  %v4464_v47 = vsel %vm1421_vm8, 1.0, %v5244_v37  ;;  %v9172_v19 = vld [vmem:[#allocation277_spill] sm:$0xff]  ;;  %vm2381_vm13 = vcmp.eq.s32.totalorder %v9174_v8, %v6647_v34  ;;  %v4560_v40 = vsel %vm2573_vm14, 1.0, %v5244_v37  ;;  %v9176_v8 = vld [vmem:[#allocation35_spill] sm:$0xff] }
 0x4ef   : > { %v3295_v31 = vpop.permute.xlu1 %3294  ;;  %vm2189_vm12 = vcmp.eq.s32.totalorder %v9172_v19, %v6647_v34  ;;  %v4544_v50 = vsel %vm2381_vm13, 1.0, %v5244_v37  ;;  %v2685_v4 = vmul.f32 %v4560_v40, %v7141_v35  ;;  %v5081_v19 = vld [vmem:[%s5358_s27 + $0x40] sm:$0xff] }
 0x4f0   : > { %vm3339_vm0 = vcmp.eq.s32.totalorder %v3295_v31, %v6647_v34  ;;  %v973_v31 = vadd.f32 %v957_v45, %v781_v10  ;;  %v4528_v10 = vsel %vm2189_vm12, 1.0, %v5244_v37 }
 0x4f1   : > { %v4622_v27 = vsel %vm3339_vm0, 1.0, %v5244_v37  ;;  %v7516_v13 = vpop.permute.xlu2 %3015 }
 0x4f2   : > { %v3451_v9 = vmul.f32 %v4622_v27, %v7058_v21 }
 0x4f4   : > { %v3467_v63 = vadd.f32 %v3451_v9, %v3275_v7  ;;  %v1165_v7 = vadd.f32 %v1149_v15, %v973_v31  ;;  %v9167_v9 = vld [vmem:[#allocation171_spill] sm:$0xff]  ;;  %v2301_v15 = vmul.f32 %v4528_v10, %v9175_v22  ;;  %v2493_v31 = vmul.f32 %v4544_v50, %v6743_v62  ;;  %v9177_v10 = vld [vmem:[#allocation10_spill] sm:$0xff]  ;;  %v9180_v50 = vld [vmem:[#allocation41_spill] sm:$0xff] }
 0x4f5   : > { %4911 = vset.pattern.permute.xlu1 %v9105_v44 }
 0x4f6   : > { %2736 = vperm.xlu1 %4911, %v5078_v48   ;;  %2835 = vperm.xlu2 %4910, %v7521_v49   ;;  %v3547_v53 = vpack.c.bf16 %v3467_v63, %v3466_v56  ;;  %v1533_v63 = vmul.f32 %v4464_v47, %v9167_v9  ;;  %v9168_v56 = vld [vmem:[#allocation211_spill] sm:$0xff]  ;;  %v1357_v51 = vadd.f32 %v1341_v36, %v1165_v7  ;;  %v2917_v36 = vpop.permute.xlu0 %2916  ;;  %v4591_v9 = vsel %vm2956_vm2, 1.0, %v5244_v37 }
 0x4f7   : > { %3490 = vadd.xlane.f32.xlu0 %v3489_v39  ;;  %vm1805_vm10 = vcmp.eq.s32.totalorder %v9168_v56, %v6647_v34  ;;  %v9170_v39 = vld [vmem:[#allocation244_spill] sm:$0xff]  ;;  %v2876_v7 = vmul.f32 %v4575_v38, %v7457_v29  ;;  %vm2957_vm5 = vcmp.eq.s32.totalorder %v2917_v36, %v6647_v34 }
 0x4f8   : > { %v7524_v11 = vpop.permute.xlu1 %2724  ;;  %4653 = vmatmul.msk.bf16.vlgmr.msra.gmra.mxu0 %vm3587_vm1, %v3547_v53  ;;  %v4480_v53 = vsel %vm1613_vm9, 1.0, %v5244_v37  ;;  %vm1997_vm11 = vcmp.eq.s32.totalorder %v9170_v39, %v6647_v34  ;;  %v4496_v54 = vsel %vm1805_vm10, 1.0, %v5244_v37  ;;  %v1549_v52 = vadd.f32 %v1533_v63, %v1357_v51  ;;  %v9182_v38 = vld [vmem:[#allocation64_spill] sm:$0xff] }
 0x4f9   : > { %v1725_v5 = vmul.f32 %v4480_v53, %v9169_v46  ;;  %v1917_v58 = vmul.f32 %v4496_v54, %v9171_v24  ;;  %v4512_v3 = vsel %vm1997_vm11, 1.0, %v5244_v37  ;;  %vm2765_vm0 = vcmp.eq.s32.totalorder %v7524_v11, %v6647_v34 }
 0x4fa   : > { %v7527_v23 = vpop.permute.xlu2 %3108  ;;  %v2109_v45 = vmul.f32 %v4512_v3, %v9173_v41  ;;  %v4576_v11 = vsel %vm2765_vm0, 1.0, %v5244_v37  ;;  %v4592_v53 = vsel %vm2957_vm5, 1.0, %v5244_v37  ;;  %v2892_v51 = vadd.f32 %v2876_v7, %v7014_v0 }
 0x4fb   : > { %v1741_v59 = vadd.f32 %v1725_v5, %v1549_v52  ;;  %vm3149_vm6 = vcmp.eq.s32.totalorder %v7527_v23, %v6647_v34  ;;  %v3069_v5 = vmul.f32 %v4592_v53, %v7516_v13  ;;  %vm654_vm9 = vcmp.eq.s32.totalorder %v9176_v8, %v6647_v34 }
 0x4fc   : > { %vm446_vm10 = vcmp.eq.s32.totalorder %v9177_v10, %v6647_v34 }
 0x4fd   : > { %v4385_v36 = vsel %vm446_vm10, 1.0, %v5244_v37 }
 0x4fe   : > { %4912 = vset.pattern.permute.xlu1 %v9112_v33  ;;  %4913 = vset.pattern.permute.xlu2 %v9112_v33 }
 0x4ff   : > { %2925 = vperm.xlu1 %4912, %v7188_v32   ;;  %2928 = vperm.xlu2 %4913, %v5078_v48  }
 0x500   : > { %v7532_v21 = vpop.permute.xlu1 %2823 }
 0x503   : > { %v7540_v6 = vpop.permute.xlu2 %3297 }
 0x504   : > { %vm3340_vm7 = vcmp.eq.s32.totalorder %v7540_v6, %v6647_v34 }
 0x505   : > { %v4623_v54 = vsel %vm3340_vm7, 1.0, %v5244_v37 }
 0x507   : > { %3027 = vperm.xlu1 %4912, %v7521_v49   ;;  %3031 = vperm.xlu2 %4913, %v7556_v26  }
 0x509   : > { %v3012_v30 = vpop.permute.xlu1 %3011 }
 0x50a   : > { %v3068_v56 = vmul.f32 %v4591_v9, %v3012_v30 }
 0x50b   : > { %v7567_v27 = vpop.permute.xlu2 %3395 }
 0x50c   : > { %v3084_v23 = vadd.f32 %v3068_v56, %v2892_v51  ;;  %v3452_v13 = vmul.f32 %v4623_v54, %v7567_v27  ;;  %v9185_v56 = vld [vmem:[#allocation156_spill] sm:$0xff] }
 0x50d   : > { %vm1422_vm2 = vcmp.eq.s32.totalorder %v9185_v56, %v6647_v34  ;;  %v2920_v56 = vpop.permute.xlu0 %2919 }
 0x50f   : > { %4914 = vset.pattern.permute.xlu1 %v9024_v20  ;;  %4915 = vset.pattern.permute.xlu2 %v9024_v20 }
 0x510   : > { %3120 = vperm.xlu1 %4914, %v5078_v48   ;;  %3219 = vperm.xlu2 %4915, %v7521_v49   ;;  %v1933_v48 = vadd.f32 %v1917_v58, %v1741_v59 }
 0x512   : > { %v3106_v12 = vpop.permute.xlu1 %3105  ;;  %v2125_v57 = vadd.f32 %v2109_v45, %v1933_v48  ;;  %v7657_v48 = vld [vmem:[%s5363_s30 + $0x40] sm:$0xff] }
 0x513   : > { %vm3148_vm4 = vcmp.eq.s32.totalorder %v3106_v12, %v6647_v34  ;;  %v7640_v12 = vld [vmem:[%s5358_s27 + $0x48] sm:$0xff] }
 0x514   : > { %v7588_v43 = vpop.permute.xlu2 %2730  ;;  %v2317_v14 = vadd.f32 %v2301_v15, %v2125_v57  ;;  %v4607_v35 = vsel %vm3148_vm4, 1.0, %v5244_v37  ;;  %v4401_v15 = vsel %vm654_vm9, 1.0, %v5244_v37  ;;  %v9179_v57 = vld [vmem:[#allocation90_spill] sm:$0xff]  ;;  %vm2574_vm9 = vcmp.eq.s32.totalorder %v7019_v2, %v6647_v34 }
 0x515   : > { %v3260_v46 = vmul.f32 %v4607_v35, %v7025_v61  ;;  %vm1038_vm12 = vcmp.eq.s32.totalorder %v9179_v57, %v6647_v34  ;;  %vm2767_vm13 = vcmp.eq.s32.totalorder %v7588_v43, %v6647_v34  ;;  %v9184_v35 = vld [vmem:[#allocation97_spill] sm:$0xff]  ;;  %v9193_v57 = vld [vmem:[#allocation286_spill] sm:$0xff] }
 0x516   : > { %v2509_v47 = vadd.f32 %v2493_v31, %v2317_v14  ;;  %v766_v31 = vmul.f32 %v4401_v15, %v9180_v50  ;;  %v4578_v7 = vsel %vm2767_vm13, 1.0, %v5244_v37  ;;  %vm2190_vm7 = vcmp.eq.s32.totalorder %v9193_v57, %v6647_v34 }
 0x517   : > { %v3276_v39 = vadd.f32 %v3260_v46, %v3084_v23  ;;  %v9186_v46 = vld [vmem:[#allocation130_spill] sm:$0xff] }
 0x518   : > { %3223 = vperm.xlu1 %4914, %v7556_v26   ;;  %4916 = vset.pattern.permute.xlu2 %v9028_v60  ;;  %v2701_v17 = vadd.f32 %v2685_v4, %v2509_v47  ;;  %v9181_v4 = vld [vmem:[#allocation17_spill] sm:$0xff]  ;;  %v4433_v47 = vsel %vm1038_vm12, 1.0, %v5244_v37 }
 0x519   : > { %3309 = vperm.xlu2 %4916, %v7188_v32   ;;  %v2877_v32 = vmul.f32 %v4576_v11, %v7532_v21  ;;  %v4608_v21 = vsel %vm3149_vm6, 1.0, %v5244_v37  ;;  %v3468_v3 = vadd.f32 %v3452_v13, %v3276_v39  ;;  %v4465_v39 = vsel %vm1422_vm2, 1.0, %v5244_v37 }
 0x51a   : > { %v3208_v62 = vpop.permute.xlu1 %3207 }
 0x51b   : > { %v2893_v29 = vadd.f32 %v2877_v32, %v2701_v17  ;;  %v3261_v30 = vmul.f32 %v4608_v21, %v3208_v62  ;;  %v574_v62 = vmul.f32 %v4385_v36, %v9181_v4  ;;  %v9183_v32 = vld [vmem:[#allocation123_spill] sm:$0xff]  ;;  %v1150_v17 = vmul.f32 %v4433_v47, %v9184_v35  ;;  %v9194_v36 = vld [vmem:[#allocation262_spill] sm:$0xff]  ;;  %v9195_v4 = vld [vmem:[#allocation309_spill] sm:$0xff] }
 0x51c   : > { %v7615_v63 = vpop.permute.xlu2 %2831  ;;  %vm1230_vm14 = vcmp.eq.s32.totalorder %v9183_v32, %v6647_v34  ;;  %v9196_v47 = vld [vmem:[#allocation293_spill] sm:$0xff] }
 0x51d   : > { %v3085_v61 = vadd.f32 %v3069_v5, %v2893_v29  ;;  %v2879_v43 = vmul.f32 %v4578_v7, %v7615_v63  ;;  %v782_v9 = vadd.f32 %v766_v31, %v574_v62  ;;  %v4449_v25 = vsel %vm1230_vm14, 1.0, %v5244_v37  ;;  %v9187_v5 = vld [vmem:[#allocation189_spill] sm:$0xff] }
 0x51e   : > { %v4610_v63 = vsel %vm3151_vm15, 1.0, %v5244_v37  ;;  %v1342_v21 = vmul.f32 %v4449_v25, %v9186_v46  ;;  %vm1614_vm4 = vcmp.eq.s32.totalorder %v9187_v5, %v6647_v34  ;;  %v9197_v5 = vld [vmem:[#allocation115_spill] sm:$0xff] }
 0x51f   : > { %v3277_v24 = vadd.f32 %v3261_v30, %v3085_v61  ;;  %v2895_v23 = vadd.f32 %v2879_v43, %v6931_v42  ;;  %v9188_v61 = vld [vmem:[#allocation163_spill] sm:$0xff] }
 0x520   : > { %4917 = vset.pattern.permute.xlu1 %v9028_v60  ;;  %v1534_v54 = vmul.f32 %v4465_v39, %v9188_v61  ;;  %v9191_v42 = vld [vmem:[#allocation255_spill] sm:$0xff] }
 0x521   : > { %3411 = vperm.xlu1 %4917, %v7521_v49   ;;  %3415 = vperm.xlu2 %4916, %v7556_v26   ;;  %vm1998_vm6 = vcmp.eq.s32.totalorder %v9191_v42, %v6647_v34  ;;  %v9200_v42 = vld [vmem:[#allocation16_spill] sm:$0xff] }
 0x522   : > { %v4513_v50 = vsel %vm1998_vm6, 1.0, %v5244_v37 }
 0x523   : > { %v3301_v0 = vpop.permute.xlu1 %3300 }
 0x524   : > { %vm3341_vm8 = vcmp.eq.s32.totalorder %v3301_v0, %v6647_v34 }
 0x525   : > { %v4624_v49 = vsel %vm3341_vm8, 1.0, %v5244_v37  ;;  %v7632_v52 = vpop.permute.xlu2 %3019  ;;  %vm2382_vm8 = vcmp.eq.s32.totalorder %v9195_v4, %v6647_v34 }
 0x526   : > { %v3453_v6 = vmul.f32 %v4624_v49, %v7070_v18  ;;  %v9189_v49 = vld [vmem:[#allocation222_spill] sm:$0xff]  ;;  %v4545_v43 = vsel %vm2382_vm8, 1.0, %v5244_v37 }
 0x527   : > { %vm1806_vm5 = vcmp.eq.s32.totalorder %v9189_v49, %v6647_v34  ;;  %v2494_v35 = vmul.f32 %v4545_v43, %v6639_v16  ;;  %v9209_v43 = vld [vmem:[#allocation20_spill] sm:$0xff] }
 0x528   : > { %v3469_v58 = vadd.f32 %v3453_v6, %v3277_v24  ;;  %v4497_v10 = vsel %vm1806_vm5, 1.0, %v5244_v37 }
 0x529   : > { %4918 = vset.pattern.permute.xlu1 %v9105_v44  ;;  %4919 = vset.pattern.permute.xlu2 %v9105_v44 }
 0x52a   : > { %2739 = vperm.xlu1 %4918, %v5081_v19   ;;  %2742 = vperm.xlu2 %4919, %v7640_v12   ;;  %v3548_v59 = vpack.c.bf16 %v3469_v58, %v3468_v3  ;;  %v4481_v58 = vsel %vm1614_vm4, 1.0, %v5244_v37 }
 0x52c   : > { %v7643_v41 = vpop.permute.xlu1 %2727  ;;  %4654 = vmatmul.msk.bf16.gmra.mxu0 %vm3587_vm1, %v3548_v59 }
 0x52d   : > { %vm2766_vm10 = vcmp.eq.s32.totalorder %v7643_v41, %v6647_v34 }
 0x52e   : > { %v7646_v27 = vpop.permute.xlu2 %3111  ;;  %v4577_v2 = vsel %vm2766_vm10, 1.0, %v5244_v37 }
 0x52f   : > { %vm3150_vm12 = vcmp.eq.s32.totalorder %v7646_v27, %v6647_v34 }
 0x532   : > { %2847 = vperm.xlu1 %4918, %v7044_v28   ;;  %4920 = vset.pattern.permute.xlu2 %v9112_v33  ;;  %v9178_v28 = vld [vmem:[#allocation58_spill] sm:$0xff] }
 0x533   : > { %2931 = vperm.xlu2 %4920, %v5081_v19   ;;  %vm846_vm11 = vcmp.eq.s32.totalorder %v9178_v28, %v6647_v34 }
 0x534   : > { %v7650_v18 = vpop.permute.xlu1 %2827  ;;  %v4417_v14 = vsel %vm846_vm11, 1.0, %v5244_v37  ;;  %vm2958_vm11 = vcmp.eq.s32.totalorder %v2920_v56, %v6647_v34 }
 0x535   : > { %v958_v11 = vmul.f32 %v4417_v14, %v9182_v38  ;;  %v2110_v14 = vmul.f32 %v4513_v50, %v9194_v36  ;;  %v4529_v38 = vsel %vm2190_vm7, 1.0, %v5244_v37  ;;  %v2878_v41 = vmul.f32 %v4577_v2, %v7650_v18  ;;  %v9204_v50 = vld [vmem:[#allocation60_spill] sm:$0xff]  ;;  %v9212_v2 = vld [vmem:[#allocation67_spill] sm:$0xff] }
 0x536   : > { %v3216_v45 = vpop.permute.xlu2 %3215  ;;  %v2302_v7 = vmul.f32 %v4529_v38, %v9196_v47  ;;  %vm849_vm6 = vcmp.eq.s32.totalorder %v9204_v50, %v6647_v34  ;;  %v9207_v38 = vld [vmem:[#allocation86_spill] sm:$0xff] }
 0x537   : > { %v974_v53 = vadd.f32 %v958_v11, %v782_v9  ;;  %v3263_v13 = vmul.f32 %v4610_v63, %v3216_v45  ;;  %v5084_v45 = vld [vmem:[%s5363_s30 + $0x48] sm:$0xff]  ;;  %vm1040_vm7 = vcmp.eq.s32.totalorder %v9207_v38, %v6647_v34  ;;  %v4420_v56 = vsel %vm849_vm6, 1.0, %v5244_v37 }
 0x538   : > { %v9223_v50 = vld [vmem:[#allocation166_spill] sm:$0xff] }
 0x539   : > { %v1166_v0 = vadd.f32 %v1150_v17, %v974_v53  ;;  %v4561_v17 = vsel %vm2574_vm9, 1.0, %v5244_v37 }
 0x53a   : > { %4921 = vset.pattern.permute.xlu1 %v9112_v33  ;;  %v2686_v25 = vmul.f32 %v4561_v17, %v7049_v1  ;;  %v4593_v1 = vsel %vm2958_vm11, 1.0, %v5244_v37 }
 0x53b   : > { %2934 = vperm.xlu1 %4921, %v7640_v12   ;;  %3035 = vperm.xlu2 %4920, %v7657_v48   ;;  %v1358_v3 = vadd.f32 %v1342_v21, %v1166_v0  ;;  %v3070_v21 = vmul.f32 %v4593_v1, %v7632_v52  ;;  %v9214_v1 = vld [vmem:[#allocation126_spill] sm:$0xff] }
 0x53c   : > { %vm1233_vm10 = vcmp.eq.s32.totalorder %v9214_v1, %v6647_v34  ;;  %v9229_v1 = vld [vmem:[#allocation236_spill] sm:$0xff] }
 0x53d   : > { %v2923_v22 = vpop.permute.xlu1 %2922  ;;  %v1550_v28 = vadd.f32 %v1534_v54, %v1358_v3  ;;  %v9198_v3 = vld [vmem:[#allocation104_spill] sm:$0xff] }
 0x53e   : > { %vm2959_vm0 = vcmp.eq.s32.totalorder %v2923_v22, %v6647_v34  ;;  %v9192_v22 = vld [vmem:[#allocation229_spill] sm:$0xff] }
 0x53f   : > { %v7670_v40 = vpop.permute.xlu2 %3306  ;;  %v4594_v51 = vsel %vm2959_vm0, 1.0, %v5244_v37  ;;  %v1918_v15 = vmul.f32 %v4497_v10, %v9192_v22  ;;  %vm448_vm0 = vcmp.eq.s32.totalorder %v9200_v42, %v6647_v34  ;;  %v9220_v42 = vld [vmem:[#allocation192_spill] sm:$0xff] }
 0x540   : > { %vm3343_vm14 = vcmp.eq.s32.totalorder %v7670_v40, %v6647_v34  ;;  %v4387_v57 = vsel %vm448_vm0, 1.0, %v5244_v37 }
 0x541   : > { %v4626_v39 = vsel %vm3343_vm14, 1.0, %v5244_v37 }
 0x543   : > { %4922 = vset.pattern.permute.xlu1 %v9024_v20  ;;  %4923 = vset.pattern.permute.xlu2 %v9024_v20 }
 0x544   : > { %3123 = vperm.xlu1 %4922, %v5081_v19   ;;  %3126 = vperm.xlu2 %4923, %v7640_v12   ;;  %v9190_v19 = vld [vmem:[#allocation196_spill] sm:$0xff] }
 0x545   : > { %v3024_v29 = vpop.permute.xlu1 %3023  ;;  %v1726_v59 = vmul.f32 %v4481_v58, %v9190_v19  ;;  %v7760_v58 = vld [vmem:[%s5363_s30 + $0x50] sm:$0xff] }
 0x546   : > { %v3071_v30 = vmul.f32 %v4594_v51, %v3024_v29  ;;  %v9199_v19 = vld [vmem:[#allocation36_spill] sm:$0xff] }
 0x547   : > { %v1742_v31 = vadd.f32 %v1726_v59, %v1550_v28  ;;  %vm656_vm15 = vcmp.eq.s32.totalorder %v9199_v19, %v6647_v34  ;;  %v9202_v28 = vld [vmem:[#allocation57_spill] sm:$0xff] }
 0x548   : > { %v3087_v24 = vadd.f32 %v3071_v30, %v2895_v23  ;;  %v7701_v6 = vpop.permute.xlu2 %2733  ;;  %v7750_v30 = vld [vmem:[%s5358_s27 + $0x50] sm:$0xff]  ;;  %v4403_v10 = vsel %vm656_vm15, 1.0, %v5244_v37  ;;  %vm848_vm4 = vcmp.eq.s32.totalorder %v9202_v28, %v6647_v34 }
 0x549   : > { %v1934_v11 = vadd.f32 %v1918_v15, %v1742_v31  ;;  %v9203_v15 = vld [vmem:[#allocation15_spill] sm:$0xff]  ;;  %v9205_v31 = vld [vmem:[#allocation44_spill] sm:$0xff] }
 0x54a   : > { %v3279_v8 = vadd.f32 %v3263_v13, %v3087_v24  ;;  %v7756_v13 = vpop.permute.xlu0 %3039  ;;  %vm449_vm5 = vcmp.eq.s32.totalorder %v9203_v15, %v6647_v34 }
 0x54b   : > { %v2126_v9 = vadd.f32 %v2110_v14, %v1934_v11  ;;  %v9206_v14 = vld [vmem:[#allocation50_spill] sm:$0xff]  ;;  %v4388_v47 = vsel %vm449_vm5, 1.0, %v5244_v37 }
 0x54c   : > { %3227 = vperm.xlu1 %4922, %v7657_v48   ;;  %3231 = vperm.xlu2 %4923, %v5084_v45   ;;  %v768_v4 = vmul.f32 %v4403_v10, %v9206_v14 }
 0x54d   : > { %v2318_v53 = vadd.f32 %v2302_v7, %v2126_v9  ;;  %v9208_v7 = vld [vmem:[#allocation93_spill] sm:$0xff]  ;;  %v577_v9 = vmul.f32 %v4388_v47, %v9209_v43  ;;  %v9226_v43 = vld [vmem:[#allocation174_spill] sm:$0xff] }
 0x54e   : > { %v3212_v62 = vpop.permute.xlu1 %3211  ;;  %vm1041_vm8 = vcmp.eq.s32.totalorder %v9208_v7, %v6647_v34  ;;  %v7844_v47 = vld [vmem:[%s5363_s30 + $0x58] sm:$0xff] }
 0x54f   : > { %v2510_v16 = vadd.f32 %v2494_v35, %v2318_v53  ;;  %v9210_v35 = vld [vmem:[#allocation28_spill] sm:$0xff] }
 0x550   : > { %v7721_v32 = vpop.permute.xlu2 %2835  ;;  %v576_v17 = vmul.f32 %v4387_v57, %v9210_v35  ;;  %v9211_v53 = vld [vmem:[#allocation116_spill] sm:$0xff]  ;;  %v9227_v35 = vld [vmem:[#allocation199_spill] sm:$0xff] }
 0x551   : > { %v2702_v51 = vadd.f32 %v2686_v25, %v2510_v16  ;;  %vm1232_vm9 = vcmp.eq.s32.totalorder %v9211_v53, %v6647_v34  ;;  %v7803_v25 = vld [vmem:[%s5358_s27 + $0x58] sm:$0xff]  ;;  %v961_v16 = vmul.f32 %v4420_v56, %v9212_v2  ;;  %v9228_v2 = vld [vmem:[#allocation258_spill] sm:$0xff] }
 0x552   : > { %v7789_v11 = vpop.permute.xlu0 %3043  ;;  %v9222_v57 = vld [vmem:[#allocation176_spill] sm:$0xff] }
 0x553   : > { %vm1616_vm14 = vcmp.eq.s32.totalorder %v9222_v57, %v6647_v34  ;;  %v9238_v57 = vld [vmem:[#allocation273_spill] sm:$0xff] }
 0x554   : > { %4925 = vset.pattern.permute.xlu1 %v9028_v60  ;;  %4926 = vset.pattern.permute.xlu2 %v9028_v60  ;;  %v4483_v56 = vsel %vm1616_vm14, 1.0, %v5244_v37 }
 0x555   : > { %3318 = vperm.xlu1 %4925, %v7640_v12   ;;  %3419 = vperm.xlu2 %4926, %v7657_v48   ;;  %v2894_v12 = vadd.f32 %v2878_v41, %v2702_v51  ;;  %v4609_v48 = vsel %vm3150_vm12, 1.0, %v5244_v37  ;;  %v9213_v41 = vld [vmem:[#allocation75_spill] sm:$0xff]  ;;  %v4435_v51 = vsel %vm1040_vm7, 1.0, %v5244_v37 }
 0x556   : > { %v3262_v18 = vmul.f32 %v4609_v48, %v3212_v62  ;;  %v4419_v62 = vsel %vm848_vm4, 1.0, %v5244_v37  ;;  %v784_v48 = vadd.f32 %v768_v4, %v576_v17  ;;  %v9224_v4 = vld [vmem:[#allocation206_spill] sm:$0xff]  ;;  %vm2000_vm4 = vcmp.eq.s32.totalorder %v9229_v1, %v6647_v34 }
 0x557   : > { %v3304_v63 = vpop.permute.xlu1 %3303  ;;  %v3086_v27 = vadd.f32 %v3070_v21, %v2894_v12  ;;  %vm1808_vm15 = vcmp.eq.s32.totalorder %v9224_v4, %v6647_v34 }
 0x558   : > { %vm3342_vm13 = vcmp.eq.s32.totalorder %v3304_v63, %v6647_v34  ;;  %v960_v63 = vmul.f32 %v4419_v62, %v9213_v41  ;;  %v9225_v62 = vld [vmem:[#allocation225_spill] sm:$0xff]  ;;  %v3504_v41 = vsel %vm3482_vm3, %v7556_v26, 0.0 }
 0x559   : > { %v7740_v29 = vpop.permute.xlu2 %2928  ;;  %v4625_v46 = vsel %vm3342_vm13, 1.0, %v5244_v37  ;;  %v3278_v61 = vadd.f32 %v3262_v18, %v3086_v27  ;;  %v9215_v18 = vld [vmem:[#allocation100_spill] sm:$0xff]  ;;  %vm1617_vm13 = vcmp.eq.s32.totalorder %v9220_v42, %v6647_v34  ;;  %vm1809_vm0 = vcmp.eq.s32.totalorder %v9225_v62, %v6647_v34  ;;  %3505 = vadd.xlane.f32.xlu0 %v3504_v41  ;;  %v9236_v42 = vld [vmem:[#allocation311_spill] sm:$0xff] }
 0x55a   : > { %v3454_v23 = vmul.f32 %v4625_v46, %v9197_v5  ;;  %v4436_v46 = vsel %vm1041_vm8, 1.0, %v5244_v37  ;;  %v4451_v5 = vsel %vm1232_vm9, 1.0, %v5244_v37  ;;  %v4484_v14 = vsel %vm1617_vm13, 1.0, %v5244_v37  ;;  %v7841_v38 = vpop.permute.xlu0 %2946 }
 0x55b   : > { %v1153_v27 = vmul.f32 %v4436_v46, %v9215_v18  ;;  %v1729_v17 = vmul.f32 %v4484_v14, %v9227_v35  ;;  %v9231_v18 = vld [vmem:[#allocation232_spill] sm:$0xff]  ;;  %vm2385_vm7 = vcmp.eq.s32.totalorder %v9236_v42, %v6647_v34  ;;  %v9241_v35 = vld [vmem:[#allocation87_spill] sm:$0xff]  ;;  %vm2961_vm14 = vcmp.eq.s32.totalorder %v7740_v29, %v6647_v34 }
 0x55c   : > { %v3470_v54 = vadd.f32 %v3454_v23, %v3278_v61  ;;  %v9216_v23 = vld [vmem:[#allocation146_spill] sm:$0xff]  ;;  %v4548_v62 = vsel %vm2385_vm7, 1.0, %v5244_v37 }
 0x55d   : > { %3423 = vperm.xlu1 %4925, %v5084_v45   ;;  %4927 = vset.pattern.permute.xlu2 %v9105_v44  ;;  %vm1424_vm11 = vcmp.eq.s32.totalorder %v9216_v23, %v6647_v34 }
 0x55e   : > { %2745 = vperm.xlu2 %4927, %v7750_v30   ;;  %v4467_v15 = vsel %vm1424_vm11, 1.0, %v5244_v37 }
 0x55f   : > { %v3408_v0 = vpop.permute.xlu1 %3407 }
 0x560   : > { %v3455_v52 = vmul.f32 %v4626_v39, %v3408_v0  ;;  %v9217_v0 = vld [vmem:[#allocation159_spill] sm:$0xff]  ;;  %v9218_v39 = vld [vmem:[#allocation108_spill] sm:$0xff] }
 0x561   : > { %v7754_v40 = vpop.permute.xlu2 %3031  ;;  %vm1425_vm12 = vcmp.eq.s32.totalorder %v9217_v0, %v6647_v34  ;;  %v1152_v61 = vmul.f32 %v4435_v51, %v9218_v39  ;;  %v4500_v51 = vsel %vm1809_vm0, 1.0, %v5244_v37  ;;  %v9232_v0 = vld [vmem:[#allocation289_spill] sm:$0xff] }
 0x562   : > { %v3471_v49 = vadd.f32 %v3455_v52, %v3279_v8  ;;  %v9201_v8 = vld [vmem:[#allocation37_spill] sm:$0xff]  ;;  %v4452_v52 = vsel %vm1233_vm10, 1.0, %v5244_v37  ;;  %v4468_v28 = vsel %vm1425_vm12, 1.0, %v5244_v37  ;;  %vm2193_vm5 = vcmp.eq.s32.totalorder %v9232_v0, %v6647_v34 }
 0x563   : > { %vm657_vm2 = vcmp.eq.s32.totalorder %v9201_v8, %v6647_v34  ;;  %v9221_v8 = vld [vmem:[#allocation141_spill] sm:$0xff]  ;;  %vm2577_vm10 = vcmp.eq.s32.totalorder %v9241_v35, %v6647_v34  ;;  %vm2768_vm12 = vcmp.eq.s32.totalorder %v7701_v6, %v6647_v34 }
 0x564   : > { %v3549_v24 = vpack.c.bf16 %v3471_v49, %v3470_v54  ;;  %v4404_v45 = vsel %vm657_vm2, 1.0, %v5244_v37  ;;  %v1344_v10 = vmul.f32 %v4451_v5, %v9221_v8  ;;  %vm2001_vm2 = vcmp.eq.s32.totalorder %v9228_v2, %v6647_v34  ;;  %v9243_v2 = vld [vmem:[#allocation315_spill] sm:$0xff]  ;;  %v9246_v0 = vld [vmem:[#allocation101_spill] sm:$0xff] }
 0x565   : > { %4928 = vset.pattern.permute.xlu1 %v9105_v44  ;;  %v769_v36 = vmul.f32 %v4404_v45, %v9205_v31  ;;  %v1537_v31 = vmul.f32 %v4468_v28, %v9223_v50  ;;  %v4516_v26 = vsel %vm2001_vm2, 1.0, %v5244_v37  ;;  %v9237_v28 = vld [vmem:[#allocation294_spill] sm:$0xff]  ;;  %v9239_v50 = vld [vmem:[#allocation296_spill] sm:$0xff]  ;;  %v2497_v41 = vmul.f32 %v4548_v62, %v9243_v2 }
 0x566   : > { %2851 = vperm.xlu1 %4928, %v7760_v58   ;;  %2855 = vperm.xlu2 %4927, %v9198_v3   ;;  %v9219_v3 = vld [vmem:[#allocation133_spill] sm:$0xff]  ;;  %vm2384_vm8 = vcmp.eq.s32.totalorder %v9237_v28, %v6647_v34 }
 0x567   : > { %4655 = vmatmul.msk.bf16.gmra.mxu0 %vm3587_vm1, %v3549_v24  ;;  %v785_v12 = vadd.f32 %v769_v36, %v577_v9  ;;  %v976_v24 = vadd.f32 %v960_v63, %v784_v48  ;;  %v1345_v19 = vmul.f32 %v4452_v52, %v9219_v3  ;;  %v1536_v9 = vmul.f32 %v4467_v15, %v9226_v43  ;;  %v9230_v48 = vld [vmem:[#allocation207_spill] sm:$0xff]  ;;  %v9235_v3 = vld [vmem:[#allocation266_spill] sm:$0xff]  ;;  %v9240_v43 = vld [vmem:[#allocation312_spill] sm:$0xff] }
 0x568   : > { %v7767_v59 = vpop.permute.xlu1 %2736  ;;  %v1728_v46 = vmul.f32 %v4483_v56, %v9230_v48  ;;  %vm2192_vm6 = vcmp.eq.s32.totalorder %v9235_v3, %v6647_v34  ;;  %v4532_v15 = vsel %vm2193_vm5, 1.0, %v5244_v37  ;;  %vm2576_vm9 = vcmp.eq.s32.totalorder %v9240_v43, %v6647_v34  ;;  %v9242_v56 = vld [vmem:[#allocation303_spill] sm:$0xff] }
 0x569   : > { %v977_v49 = vadd.f32 %v961_v16, %v785_v12  ;;  %v1168_v36 = vadd.f32 %v1152_v61, %v976_v24  ;;  %v4499_v12 = vsel %vm1808_vm15, 1.0, %v5244_v37  ;;  %v9233_v61 = vld [vmem:[#allocation240_spill] sm:$0xff]  ;;  %vm2769_vm11 = vcmp.eq.s32.totalorder %v7767_v59, %v6647_v34  ;;  %v9244_v48 = vld [vmem:[#allocation71_spill] sm:$0xff] }
 0x56a   : > { %v7776_v22 = vpop.permute.xlu2 %3219  ;;  %v1920_v52 = vmul.f32 %v4499_v12, %v9233_v61  ;;  %v4563_v12 = vsel %vm2576_vm9, 1.0, %v5244_v37  ;;  %v4579_v3 = vsel %vm2768_vm12, 1.0, %v5244_v37 }
 0x56b   : > { %v1169_v45 = vadd.f32 %v1153_v27, %v977_v49  ;;  %v1360_v53 = vadd.f32 %v1344_v10, %v1168_v36  ;;  %v1921_v27 = vmul.f32 %v4500_v51, %v9231_v18  ;;  %v9234_v49 = vld [vmem:[#allocation265_spill] sm:$0xff]  ;;  %v4531_v36 = vsel %vm2192_vm6, 1.0, %v5244_v37 }
 0x56c   : > { %v2113_v24 = vmul.f32 %v4516_v26, %v9234_v49  ;;  %v4564_v18 = vsel %vm2577_vm10, 1.0, %v5244_v37  ;;  %v2688_v61 = vmul.f32 %v4563_v12, %v9246_v0  ;;  %v5092_v12 = vld [vmem:[%s5358_s27 + $0x60] sm:$0xff] }
 0x56d   : > { %v1361_v7 = vadd.f32 %v1345_v19, %v1169_v45  ;;  %v1552_v5 = vadd.f32 %v1536_v9, %v1360_v53  ;;  %v4515_v19 = vsel %vm2000_vm4, 1.0, %v5244_v37  ;;  %v4547_v9 = vsel %vm2384_vm8, 1.0, %v5244_v37 }
 0x56e   : > { %4929 = vset.pattern.permute.xlu1 %v9112_v33  ;;  %4930 = vset.pattern.permute.xlu2 %v9112_v33  ;;  %v2112_v45 = vmul.f32 %v4515_v19, %v9238_v57  ;;  %v2304_v53 = vmul.f32 %v4531_v36, %v9242_v56  ;;  %v2880_v19 = vmul.f32 %v4579_v3, %v7721_v32  ;;  %v9248_v57 = vld [vmem:[#allocation98_spill] sm:$0xff] }
 0x56f   : > { %2937 = vperm.xlu1 %4929, %v7750_v30   ;;  %2940 = vperm.xlu2 %4930, %v7803_v25   ;;  %v1553_v63 = vadd.f32 %v1537_v31, %v1361_v7  ;;  %v1744_v8 = vadd.f32 %v1728_v46, %v1552_v5  ;;  %v2305_v31 = vmul.f32 %v4532_v15, %v9239_v50  ;;  %v7889_v7 = vpop.permute.xlu0 %2949  ;;  %v9245_v5 = vld [vmem:[#allocation91_spill] sm:$0xff] }
 0x570   : > { %v2496_v46 = vmul.f32 %v4547_v9, %v9244_v48  ;;  %vm3345_vm2 = vcmp.eq.s32.totalorder %v9248_v57, %v6647_v34 }
 0x571   : > { %v7815_v21 = vpop.permute.xlu1 %2925  ;;  %v1745_v23 = vadd.f32 %v1729_v17, %v1553_v63  ;;  %v1936_v14 = vadd.f32 %v1920_v52, %v1744_v8  ;;  %v9247_v52 = vld [vmem:[#allocation121_spill] sm:$0xff] }
 0x572   : > { %vm2960_vm13 = vcmp.eq.s32.totalorder %v7815_v21, %v6647_v34 }
 0x573   : > { %v7825_v54 = vpop.permute.xlu2 %3309  ;;  %v1937_v10 = vadd.f32 %v1921_v27, %v1745_v23  ;;  %v2128_v63 = vadd.f32 %v2112_v45, %v1936_v14  ;;  %v4580_v27 = vsel %vm2769_vm11, 1.0, %v5244_v37  ;;  %v2689_v23 = vmul.f32 %v4564_v18, %v9245_v5 }
 0x574   : > { %v2881_v49 = vmul.f32 %v4580_v27, %v9247_v52  ;;  %v4595_v8 = vsel %vm2960_vm13, 1.0, %v5244_v37  ;;  %vm3344_vm4 = vcmp.eq.s32.totalorder %v7825_v54, %v6647_v34  ;;  %v9251_v52 = vld [vmem:[#allocation131_spill] sm:$0xff] }
 0x575   : > { %v2129_v4 = vadd.f32 %v2113_v24, %v1937_v10  ;;  %v2320_v59 = vadd.f32 %v2304_v53, %v2128_v63  ;;  %v4627_v43 = vsel %vm3344_vm4, 1.0, %v5244_v37  ;;  %vm2773_vm8 = vcmp.eq.s32.totalorder %v9251_v52, %v6647_v34 }
 0x577   : > { %3047 = vperm.xlu1 %4929, %v7844_v47   ;;  %4931 = vset.pattern.permute.xlu2 %v9024_v20  ;;  %v2321_v51 = vadd.f32 %v2305_v31, %v2129_v4  ;;  %v2512_v24 = vadd.f32 %v2496_v46, %v2320_v59  ;;  %v3118_v42 = vpop.permute.xlu0 %3117  ;;  %v9249_v59 = vld [vmem:[#allocation128_spill] sm:$0xff] }
 0x578   : > { %3129 = vperm.xlu2 %4931, %v7750_v30   ;;  %vm3152_vm0 = vcmp.eq.s32.totalorder %v3118_v42, %v6647_v34 }
 0x579   : > { %v7854_v16 = vpop.permute.xlu1 %3027  ;;  %v2513_v26 = vadd.f32 %v2497_v41, %v2321_v51  ;;  %v2704_v10 = vadd.f32 %v2688_v61, %v2512_v24  ;;  %v4611_v31 = vsel %vm3152_vm0, 1.0, %v5244_v37  ;;  %v5089_v41 = vld [vmem:[%s5358_s27 + $0x68] sm:$0xff] }
 0x57a   : > { %v3264_v4 = vmul.f32 %v4611_v31, %v7776_v22  ;;  %v7943_v22 = vld [vmem:[%s5363_s30 + $0x60] sm:$0xff]  ;;  %v7948_v51 = vld [vmem:[%s5363_s30 + $0x68] sm:$0xff] }
 0x57b   : > { %v7870_v39 = vpop.permute.xlu2 %3415  ;;  %v2705_v6 = vadd.f32 %v2689_v23, %v2513_v26  ;;  %v2896_v29 = vadd.f32 %v2880_v19, %v2704_v10  ;;  %v9250_v61 = vld [vmem:[#allocation118_spill] sm:$0xff] }
 0x57c   : > { %vm3346_vm7 = vcmp.eq.s32.totalorder %v9250_v61, %v6647_v34  ;;  %v9259_v61 = vld [vmem:[#allocation96_spill] sm:$0xff] }
 0x57d   : > { %v2897_v28 = vadd.f32 %v2881_v49, %v2705_v6  ;;  %v9252_v49 = vld [vmem:[#allocation74_spill] sm:$0xff]  ;;  %v4629_v19 = vsel %vm3346_vm7, 1.0, %v5244_v37 }
 0x57f   : > { %4932 = vset.pattern.permute.xlu1 %v9024_v20 }
 0x580   : > { %3132 = vperm.xlu1 %4932, %v7803_v25   ;;  %3235 = vperm.xlu2 %4931, %v7760_v58  }
 0x582   : > { %v3121_v17 = vpop.permute.xlu1 %3120 }
 0x583   : > { %vm3153_vm15 = vcmp.eq.s32.totalorder %v3121_v17, %v6647_v34 }
 0x584   : > { %v7900_v1 = vpop.permute.xlu2 %2742  ;;  %v4612_v15 = vsel %vm3153_vm15, 1.0, %v5244_v37 }
 0x585   : > { %vm2771_vm10 = vcmp.eq.s32.totalorder %v7900_v1, %v6647_v34 }
 0x588   : > { %4933 = vset.pattern.permute.xlu1 %v9028_v60  ;;  %4934 = vset.pattern.permute.xlu2 %v9028_v60 }
 0x589   : > { %3321 = vperm.xlu1 %4933, %v7750_v30   ;;  %3324 = vperm.xlu2 %4934, %v7803_v25   ;;  %v3072_v30 = vmul.f32 %v4595_v8, %v7854_v16  ;;  %v4596_v25 = vsel %vm2961_vm14, 1.0, %v5244_v37  ;;  %v4628_v16 = vsel %vm3345_vm2, 1.0, %v5244_v37  ;;  %v4584_v8 = vsel %vm2773_vm8, 1.0, %v5244_v37 }
 0x58a   : > { %v3224_v21 = vpop.permute.xlu1 %3223  ;;  %v3073_v45 = vmul.f32 %v4596_v25, %v7754_v40  ;;  %v3457_v9 = vmul.f32 %v4628_v16, %v7870_v39  ;;  %vm1044_vm2 = vcmp.eq.s32.totalorder %v9259_v61, %v6647_v34 }
 0x58b   : > { %v3265_v50 = vmul.f32 %v4612_v15, %v3224_v21  ;;  %v3088_v36 = vadd.f32 %v3072_v30, %v2896_v29  ;;  %v9253_v29 = vld [vmem:[#allocation82_spill] sm:$0xff] }
 0x58c   : > { %v3089_v14 = vadd.f32 %v3073_v45, %v2897_v28 }
 0x58d   : > { %v2932_v32 = vpop.permute.xlu2 %2931  ;;  %v3280_v54 = vadd.f32 %v3264_v4, %v3088_v36  ;;  %v9254_v4 = vld [vmem:[#allocation107_spill] sm:$0xff] }
 0x58e   : > { %v3281_v62 = vadd.f32 %v3265_v50, %v3089_v14  ;;  %vm2962_vm6 = vcmp.eq.s32.totalorder %v2932_v32, %v6647_v34  ;;  %v4582_v50 = vsel %vm2771_vm10, 1.0, %v5244_v37  ;;  %vm2774_vm10 = vcmp.eq.s32.totalorder %v7429_v55, %v6647_v34  ;;  %v9277_v55 = vld [vmem:[#allocation316_spill] sm:$0xff] }
 0x58f   : > { %v4597_v3 = vsel %vm2962_vm6, 1.0, %v5244_v37 }
 0x590   : > { %v3473_v56 = vadd.f32 %v3457_v9, %v3281_v62 }
 0x591   : > { %3427 = vperm.xlu1 %4933, %v7760_v58   ;;  %3431 = vperm.xlu2 %4934, %v7844_v47  }
 0x593   : > { %v3412_v40 = vpop.permute.xlu1 %3411 }
 0x594   : > { %v3456_v35 = vmul.f32 %v4627_v43, %v3412_v40 }
 0x595   : > { %v3036_v17 = vpop.permute.xlu2 %3035 }
 0x596   : > { %v3472_v53 = vadd.f32 %v3456_v35, %v3280_v54  ;;  %v3074_v6 = vmul.f32 %v4597_v3, %v3036_v17  ;;  %v7996_v54 = vld [vmem:[%s5358_s27 + $0x70] sm:$0xff] }
 0x597   : > { %v9260_v3 = vld [vmem:[#allocation23_spill] sm:$0xff] }
 0x598   : > { %v3550_v2 = vpack.c.bf16 %v3473_v56, %v3472_v53 }
 0x599   : > { %4936 = vset.pattern.permute.xlu1 %v9105_v44  ;;  %4937 = vset.pattern.permute.xlu2 %v9105_v44 }
 0x59a   : > { %2754 = vperm.xlu1 %4936, %v5089_v41   ;;  %2859 = vperm.xlu2 %4937, %v7943_v22  }
 0x59b   : > { %4656 = vmatmul.msk.bf16.gmra.mxu0 %vm3587_vm1, %v3550_v2 }
 0x59c   : > { %v2740_v39 = vpop.permute.xlu1 %2739 }
 0x59d   : > { %vm2770_vm5 = vcmp.eq.s32.totalorder %v2740_v39, %v6647_v34 }
 0x59e   : > { %v3127_v63 = vpop.permute.xlu2 %3126  ;;  %v4581_v5 = vsel %vm2770_vm5, 1.0, %v5244_v37 }
 0x59f   : > { %v2882_v26 = vmul.f32 %v4581_v5, %v9249_v59  ;;  %vm3155_vm12 = vcmp.eq.s32.totalorder %v3127_v63, %v6647_v34  ;;  %v8007_v63 = vld [vmem:[%s5363_s30 + $0x70] sm:$0xff] }
 0x5a0   : > { %v4614_v43 = vsel %vm3155_vm12, 1.0, %v5244_v37  ;;  %v9258_v59 = vld [vmem:[#allocation47_spill] sm:$0xff] }
 0x5a1   : > { %v2898_v24 = vadd.f32 %v2882_v26, %v9252_v49 }
 0x5a2   : > { %2863 = vperm.xlu1 %4936, %v7948_v51   ;;  %4938 = vset.pattern.permute.xlu2 %v9112_v33 }
 0x5a3   : > { %2943 = vperm.xlu2 %4938, %v5092_v12   ;;  %v3090_v10 = vadd.f32 %v3074_v6, %v2898_v24 }
 0x5a4   : > { %v2848_v48 = vpop.permute.xlu1 %2847 }
 0x5a5   : > { %v2883_v36 = vmul.f32 %v4582_v50, %v2848_v48 }
 0x5a6   : > { %v3232_v46 = vpop.permute.xlu2 %3231 }
 0x5a7   : > { %v2899_v62 = vadd.f32 %v2883_v36, %v9254_v4  ;;  %v3267_v9 = vmul.f32 %v4614_v43, %v3232_v46  ;;  %v9255_v46 = vld [vmem:[#allocation40_spill] sm:$0xff] }
 0x5a8   : > { %vm660_vm14 = vcmp.eq.s32.totalorder %v9255_v46, %v6647_v34  ;;  %v9268_v4 = vld [vmem:[#allocation228_spill] sm:$0xff] }
 0x5a9   : > { %vm1812_vm7 = vcmp.eq.s32.totalorder %v9268_v4, %v6647_v34  ;;  %v9272_v46 = vld [vmem:[#allocation292_spill] sm:$0xff]  ;;  %v3240_v4 = vpop.permute.xlu0 %3239 }
 0x5aa   : > { %4939 = vset.pattern.permute.xlu1 %v9112_v33 }
 0x5ab   : > { %3051 = vperm.xlu1 %4939, %v7943_v22   ;;  %3055 = vperm.xlu2 %4938, %v7948_v51  }
 0x5ad   : > { %v2935_v18 = vpop.permute.xlu1 %2934 }
 0x5ae   : > { %vm2963_vm11 = vcmp.eq.s32.totalorder %v2935_v18, %v6647_v34  ;;  %v9256_v18 = vld [vmem:[#allocation18_spill] sm:$0xff] }
 0x5af   : > { %v3420_v27 = vpop.permute.xlu2 %3419  ;;  %v4598_v31 = vsel %vm2963_vm11, 1.0, %v5244_v37  ;;  %vm452_vm15 = vcmp.eq.s32.totalorder %v9256_v18, %v6647_v34 }
 0x5b0   : > { %v3458_v25 = vmul.f32 %v4629_v19, %v3420_v27  ;;  %v3075_v1 = vmul.f32 %v4598_v31, %v7756_v13  ;;  %v8000_v13 = vld [vmem:[%s5358_s27 + $0x78] sm:$0xff]  ;;  %v9257_v27 = vld [vmem:[#allocation63_spill] sm:$0xff]  ;;  %v4391_v49 = vsel %vm452_vm15, 1.0, %v5244_v37  ;;  %v9261_v19 = vld [vmem:[#allocation70_spill] sm:$0xff] }
 0x5b1   : > { %vm852_vm0 = vcmp.eq.s32.totalorder %v9257_v27, %v6647_v34  ;;  %v580_v6 = vmul.f32 %v4391_v49, %v9260_v3  ;;  %v9276_v3 = vld [vmem:[#allocation88_spill] sm:$0xff] }
 0x5b2   : > { %v3091_v40 = vadd.f32 %v3075_v1, %v2899_v62  ;;  %v4423_v24 = vsel %vm852_vm0, 1.0, %v5244_v37  ;;  %vm2580_vm12 = vcmp.eq.s32.totalorder %v9276_v3, %v6647_v34  ;;  %v9285_v3 = vld [vmem:[#allocation26_spill] sm:$0xff] }
 0x5b3   : > { %4940 = vset.pattern.permute.xlu1 %v9024_v20  ;;  %4941 = vset.pattern.permute.xlu2 %v9024_v20 }
 0x5b4   : > { %3135 = vperm.xlu1 %4940, %v5092_v12   ;;  %3138 = vperm.xlu2 %4941, %v5089_v41   ;;  %v3283_v56 = vadd.f32 %v3267_v9, %v3091_v40  ;;  %v9269_v9 = vld [vmem:[#allocation202_spill] sm:$0xff] }
 0x5b6   : > { %v3124_v23 = vpop.permute.xlu1 %3123 }
 0x5b7   : > { %vm3154_vm9 = vcmp.eq.s32.totalorder %v3124_v23, %v6647_v34  ;;  %v3513_v23 = vsel %vm3482_vm3, %v7760_v58, 0.0  ;;  %v9262_v58 = vld [vmem:[#allocation129_spill] sm:$0xff] }
 0x5b8   : > { %v7961_v0 = vpop.permute.xlu2 %2745  ;;  %v4613_v21 = vsel %vm3154_vm9, 1.0, %v5244_v37  ;;  %3514 = vadd.xlane.f32.xlu0 %v3513_v23  ;;  %vm1236_vm4 = vcmp.eq.s32.totalorder %v9262_v58, %v6647_v34  ;;  %vm2196_vm9 = vcmp.eq.s32.totalorder %v9272_v46, %v6647_v34  ;;  %v9273_v23 = vld [vmem:[#allocation268_spill] sm:$0xff] }
 0x5bc   : > { %3247 = vperm.xlu1 %4940, %v7948_v51   ;;  %4942 = vset.pattern.permute.xlu2 %v9028_v60 }
 0x5bd   : > { %3327 = vperm.xlu2 %4942, %v5092_v12  }
 0x5be   : > { %v3228_v42 = vpop.permute.xlu1 %3227 }
 0x5bf   : > { %v3266_v28 = vmul.f32 %v4613_v21, %v3228_v42  ;;  %v964_v21 = vmul.f32 %v4423_v24, %v9261_v19  ;;  %v4439_v42 = vsel %vm1044_vm2, 1.0, %v5244_v37  ;;  %v4585_v19 = vsel %vm2774_vm10, 1.0, %v5244_v37 }
 0x5c0   : > { %v2856_v30 = vpop.permute.xlu2 %2855 }
 0x5c1   : > { %v3282_v15 = vadd.f32 %v3266_v28, %v3090_v10  ;;  %v2885_v32 = vmul.f32 %v4584_v8, %v2856_v30  ;;  %v9263_v10 = vld [vmem:[#allocation103_spill] sm:$0xff]  ;;  %v9264_v30 = vld [vmem:[#allocation162_spill] sm:$0xff] }
 0x5c2   : > { %v1156_v28 = vmul.f32 %v4439_v42, %v9263_v10  ;;  %vm1428_vm5 = vcmp.eq.s32.totalorder %v9264_v30, %v6647_v34  ;;  %v9278_v30 = vld [vmem:[#allocation109_spill] sm:$0xff] }
 0x5c3   : > { %v3474_v57 = vadd.f32 %v3458_v25, %v3282_v15  ;;  %v7980_v45 = vadd.f32 %v2885_v32, %v9253_v29  ;;  %v4455_v25 = vsel %vm1236_vm4, 1.0, %v5244_v37  ;;  %v9265_v32 = vld [vmem:[#allocation136_spill] sm:$0xff]  ;;  %v9266_v29 = vld [vmem:[#allocation195_spill] sm:$0xff]  ;;  %v4471_v31 = vsel %vm1428_vm5, 1.0, %v5244_v37 }
 0x5c4   : > { %4943 = vset.pattern.permute.xlu1 %v9028_v60  ;;  %vm1620_vm6 = vcmp.eq.s32.totalorder %v9266_v29, %v6647_v34 }
 0x5c5   : > { %3330 = vperm.xlu1 %4943, %v5089_v41   ;;  %3435 = vperm.xlu2 %4942, %v7943_v22   ;;  %v4487_v40 = vsel %vm1620_vm6, 1.0, %v5244_v37 }
 0x5c7   : > { %v3319_v14 = vpop.permute.xlu1 %3318 }
 0x5c8   : > { %vm3347_vm13 = vcmp.eq.s32.totalorder %v3319_v14, %v6647_v34  ;;  %v9267_v14 = vld [vmem:[#allocation169_spill] sm:$0xff] }
 0x5c9   : > { %v7987_v16 = vpop.permute.xlu2 %2940  ;;  %v4630_v35 = vsel %vm3347_vm13, 1.0, %v5244_v37  ;;  %v1540_v1 = vmul.f32 %v4471_v31, %v9267_v14  ;;  %vm2772_vm13 = vcmp.eq.s32.totalorder %v7961_v0, %v6647_v34 }
 0x5ca   : > { %vm2965_vm15 = vcmp.eq.s32.totalorder %v7987_v16, %v6647_v34  ;;  %v4583_v0 = vsel %vm2772_vm13, 1.0, %v5244_v37 }
 0x5cb   : > { %v4600_v31 = vsel %vm2965_vm15, 1.0, %v5244_v37 }
 0x5cd   : > { %4944 = vset.pattern.permute.xlu1 %v9105_v44  ;;  %4945 = vset.pattern.permute.xlu2 %v9105_v44  ;;  %v8011_v44 = vld [vmem:[%s5363_s30 + $0x78] sm:$0xff] }
 0x5ce   : > { %2757 = vperm.xlu1 %4944, %v7996_v54   ;;  %2760 = vperm.xlu2 %4945, %v8000_v13  }
 0x5cf   : > { %v3424_v17 = vpop.permute.xlu1 %3423 }
 0x5d0   : > { %v3459_v53 = vmul.f32 %v4630_v35, %v3424_v17  ;;  %v1732_v35 = vmul.f32 %v4487_v40, %v9269_v9  ;;  %v9270_v17 = vld [vmem:[#allocation261_spill] sm:$0xff] }
 0x5d1   : > { %vm2004_vm8 = vcmp.eq.s32.totalorder %v9270_v17, %v6647_v34 }
 0x5d2   : > { %v3475_v2 = vadd.f32 %v3459_v53, %v3283_v56  ;;  %v8004_v41 = vpop.permute.xlu2 %3129  ;;  %v4503_v56 = vsel %vm1812_vm7, 1.0, %v5244_v37  ;;  %v4519_v18 = vsel %vm2004_vm8, 1.0, %v5244_v37 }
 0x5d3   : > { %vm3156_vm2 = vcmp.eq.s32.totalorder %v8004_v41, %v6647_v34 }
 0x5d4   : > { %v3551_v39 = vpack.c.bf16 %v3475_v2, %v3474_v57  ;;  %v1348_v57 = vmul.f32 %v4455_v25, %v9265_v32  ;;  %v9271_v2 = vld [vmem:[#allocation235_spill] sm:$0xff] }
 0x5d6   : > { %2867 = vperm.xlu1 %4944, %v8007_v63   ;;  %2871 = vperm.xlu2 %4945, %v8011_v44  }
 0x5d7   : > { %4657 = vmatmul.msk.bf16.gmra.mxu0 %vm3587_vm1, %v3551_v39  ;;  %v1924_v39 = vmul.f32 %v4503_v56, %v9271_v2 }
 0x5d8   : > { %v8015_v12 = vpop.permute.xlu1 %2851 }
 0x5d9   : > { %v2884_v29 = vmul.f32 %v4583_v0, %v8015_v12  ;;  %v4615_v12 = vsel %vm3156_vm2, 1.0, %v5244_v37  ;;  %v5097_v0 = vld [vmem:[%s5363_s30] sm:$0xff] }
 0x5da   : > { %v8017_v48 = vpop.permute.xlu2 %3235 }
 0x5de   : > { %4947 = vset.pattern.permute.xlu1 %v9112_v33  ;;  %4948 = vset.pattern.permute.xlu2 %v9112_v33  ;;  %v4407_v33 = vsel %vm660_vm14, 1.0, %v5244_v37 }
 0x5df   : > { %2952 = vperm.xlu1 %4947, %v8000_v13   ;;  %3059 = vperm.xlu2 %4948, %v8007_v63   ;;  %v772_v26 = vmul.f32 %v4407_v33, %v9258_v59  ;;  %v2116_v33 = vmul.f32 %v4519_v18, %v9273_v23  ;;  %v4535_v59 = vsel %vm2196_vm9, 1.0, %v5244_v37 }
 0x5e1   : > { %v8029_v5 = vpop.permute.xlu1 %2937  ;;  %v788_v8 = vadd.f32 %v772_v26, %v580_v6  ;;  %v9274_v26 = vld [vmem:[#allocation313_spill] sm:$0xff] }
 0x5e2   : > { %vm2388_vm11 = vcmp.eq.s32.totalorder %v9274_v26, %v6647_v34  ;;  %vm2964_vm14 = vcmp.eq.s32.totalorder %v8029_v5, %v6647_v34  ;;  %v9283_v26 = vld [vmem:[#allocation49_spill] sm:$0xff] }
 0x5e3   : > { %v8037_v52 = vpop.permute.xlu2 %3324  ;;  %v980_v15 = vadd.f32 %v964_v21, %v788_v8  ;;  %v4551_v58 = vsel %vm2388_vm11, 1.0, %v5244_v37  ;;  %v4599_v5 = vsel %vm2964_vm14, 1.0, %v5244_v37 }
 0x5e4   : > { %v2500_v8 = vmul.f32 %v4551_v58, %v9277_v55  ;;  %vm3349_vm4 = vcmp.eq.s32.totalorder %v8037_v52, %v6647_v34  ;;  %v9287_v58 = vld [vmem:[#allocation132_spill] sm:$0xff] }
 0x5e5   : > { %v1172_v36 = vadd.f32 %v1156_v28, %v980_v15  ;;  %v4567_v28 = vsel %vm2580_vm12, 1.0, %v5244_v37  ;;  %v9279_v15 = vld [vmem:[#allocation79_spill] sm:$0xff]  ;;  %v4632_v9 = vsel %vm3349_vm4, 1.0, %v5244_v37  ;;  %vm1239_vm10 = vcmp.eq.s32.totalorder %v9287_v58, %v6647_v34  ;;  %v9302_v58 = vld [vmem:[#allocation68_spill] sm:$0xff] }
 0x5e6   : > { %v2692_v32 = vmul.f32 %v4567_v28, %v9279_v15  ;;  %v9288_v28 = vld [vmem:[#allocation106_spill] sm:$0xff]  ;;  %v9289_v15 = vld [vmem:[#allocation165_spill] sm:$0xff] }
 0x5e7   : > { %3063 = vperm.xlu1 %4947, %v8011_v44   ;;  %4949 = vset.pattern.permute.xlu2 %v9024_v20  ;;  %v1364_v43 = vadd.f32 %v1348_v57, %v1172_v36  ;;  %vm1431_vm11 = vcmp.eq.s32.totalorder %v9289_v15, %v6647_v34 }
 0x5e8   : > { %3141 = vperm.xlu2 %4949, %v7996_v54  }
 0x5e9   : > { %v3048_v50 = vpop.permute.xlu1 %3047  ;;  %v1556_v53 = vadd.f32 %v1540_v1, %v1364_v43  ;;  %v3076_v1 = vmul.f32 %v4599_v5, %v7789_v11  ;;  %v3268_v11 = vmul.f32 %v4615_v12, %v8017_v48  ;;  %v3483_v5 = vsel %vm3482_vm3, %v5097_v0, 0.0  ;;  %v9295_v12 = vld [vmem:[#allocation264_spill] sm:$0xff] }
 0x5ea   : > { %vm2007_vm14 = vcmp.eq.s32.totalorder %v9295_v12, %v6647_v34 }
 0x5eb   : > { %v8060_v62 = vpop.permute.xlu2 %3431  ;;  %v1748_v27 = vadd.f32 %v1732_v35, %v1556_v53 }
 0x5ec   : > { %v3461_v17 = vmul.f32 %v4632_v9, %v8060_v62  ;;  %v9281_v62 = vld [vmem:[#allocation21_spill] sm:$0xff] }
 0x5ed   : > { %v1940_v49 = vadd.f32 %v1924_v39, %v1748_v27  ;;  %v9280_v27 = vld [vmem:[#allocation43_spill] sm:$0xff]  ;;  %vm455_vm7 = vcmp.eq.s32.totalorder %v9281_v62, %v6647_v34 }
 0x5ee   : > { %vm663_vm6 = vcmp.eq.s32.totalorder %v9280_v27, %v6647_v34  ;;  %v9298_v27 = vld [vmem:[#allocation271_spill] sm:$0xff] }
 0x5ef   : > { %4951 = vset.pattern.permute.xlu1 %v9024_v20  ;;  %v9275_v20 = vld [vmem:[#allocation298_spill] sm:$0xff]  ;;  %v2132_v21 = vadd.f32 %v2116_v33, %v1940_v49  ;;  %v9284_v49 = vld [vmem:[#allocation99_spill] sm:$0xff] }
 0x5f0   : > { %3251 = vperm.xlu1 %4951, %v8007_v63   ;;  %3255 = vperm.xlu2 %4949, %v8011_v44   ;;  %v2308_v24 = vmul.f32 %v4535_v59, %v9275_v20  ;;  %v9282_v33 = vld [vmem:[#allocation66_spill] sm:$0xff]  ;;  %v4410_v59 = vsel %vm663_vm6, 1.0, %v5244_v37  ;;  %vm1047_vm9 = vcmp.eq.s32.totalorder %v9284_v49, %v6647_v34  ;;  %v4394_v20 = vsel %vm455_vm7, 1.0, %v5244_v37 }
 0x5f1   : > { %vm855_vm8 = vcmp.eq.s32.totalorder %v9282_v33, %v6647_v34  ;;  %v4442_v55 = vsel %vm1047_vm9, 1.0, %v5244_v37  ;;  %v9299_v33 = vld [vmem:[#allocation314_spill] sm:$0xff]  ;;  %vm2967_vm7 = vcmp.eq.s32.totalorder %v7841_v38, %v6647_v34 }
 0x5f2   : > { %v3133_v61 = vpop.permute.xlu1 %3132  ;;  %v2324_v10 = vadd.f32 %v2308_v24, %v2132_v21  ;;  %v4426_v24 = vsel %vm855_vm8, 1.0, %v5244_v37 }
 0x5f3   : > { %vm3157_vm0 = vcmp.eq.s32.totalorder %v3133_v61, %v6647_v34  ;;  %v775_v61 = vmul.f32 %v4410_v59, %v9283_v26  ;;  %v5099_v59 = vld [vmem:[%s5363_s30 + $0x8] sm:$0xff] }
 0x5f4   : > { %v2860_v6 = vpop.permute.xlu2 %2859  ;;  %v2516_v57 = vadd.f32 %v2500_v8, %v2324_v10  ;;  %v4616_v16 = vsel %vm3157_vm0, 1.0, %v5244_v37  ;;  %vm2391_vm0 = vcmp.eq.s32.totalorder %v9299_v33, %v6647_v34  ;;  %v3486_v26 = vsel %vm3482_vm3, %v5099_v59, 0.0 }
 0x5f5   : > { %v2886_v42 = vmul.f32 %v4585_v19, %v2860_v6  ;;  %v583_v6 = vmul.f32 %v4394_v20, %v9285_v3  ;;  %v9286_v19 = vld [vmem:[#allocation73_spill] sm:$0xff]  ;;  %v9301_v3 = vld [vmem:[#allocation76_spill] sm:$0xff]  ;;  %v3516_v59 = vsel %vm3482_vm3, %v7844_v47, 0.0 }
 0x5f6   : > { %v2708_v14 = vadd.f32 %v2692_v32, %v2516_v57  ;;  %v967_v21 = vmul.f32 %v4426_v24, %v9286_v19  ;;  %v4458_v32 = vsel %vm1239_vm10, 1.0, %v5244_v37  ;;  %v9300_v20 = vld [vmem:[#allocation301_spill] sm:$0xff]  ;;  %vm2583_vm2 = vcmp.eq.s32.totalorder %v9301_v3, %v6647_v34 }
 0x5f7   : > { %v8092_v25 = vadd.f32 %v2886_v42, %v9278_v30  ;;  %v3522_v42 = vsel %vm3482_vm3, %v7948_v51, 0.0  ;;  %v791_v10 = vadd.f32 %v775_v61, %v583_v6  ;;  %v1159_v30 = vmul.f32 %v4442_v55, %v9288_v28  ;;  %v9291_v51 = vld [vmem:[#allocation198_spill] sm:$0xff]  ;;  %v9303_v28 = vld [vmem:[#allocation120_spill] sm:$0xff]  ;;  %v9304_v47 = vld [vmem:[#allocation85_spill] sm:$0xff] }
 0x5f8   : > { %4952 = vset.pattern.permute.xlu1 %v9028_v60  ;;  %4953 = vset.pattern.permute.xlu2 %v9028_v60  ;;  %v3077_v60 = vmul.f32 %v4600_v31, %v3048_v50  ;;  %v2900_v40 = vadd.f32 %v2884_v29, %v2708_v14  ;;  %v9290_v29 = vld [vmem:[#allocation139_spill] sm:$0xff]  ;;  %vm1623_vm12 = vcmp.eq.s32.totalorder %v9291_v51, %v6647_v34  ;;  %v4554_v19 = vsel %vm2391_vm0, 1.0, %v5244_v37 }
 0x5f9   : > { %3333 = vperm.xlu1 %4952, %v7996_v54   ;;  %3336 = vperm.xlu2 %4953, %v8000_v13   ;;  %v3269_v54 = vmul.f32 %v4616_v16, %v3240_v4  ;;  %v983_v57 = vadd.f32 %v967_v21, %v791_v10  ;;  %v1351_v31 = vmul.f32 %v4458_v32, %v9290_v29  ;;  %v9293_v4 = vld [vmem:[#allocation231_spill] sm:$0xff]  ;;  %v4570_v55 = vsel %vm2583_vm2, 1.0, %v5244_v37 }
 0x5fa   : > { %v3092_v43 = vadd.f32 %v3076_v1, %v2900_v40  ;;  %v3093_v13 = vadd.f32 %v3077_v60, %v7980_v45  ;;  %3523 = vadd.xlane.f32.xlu0 %v3522_v42  ;;  %v9292_v1 = vld [vmem:[#allocation172_spill] sm:$0xff]  ;;  %vm1815_vm13 = vcmp.eq.s32.totalorder %v9293_v4, %v6647_v34  ;;  %v4490_v40 = vsel %vm1623_vm12, 1.0, %v5244_v37 }
 0x5fb   : > { %v3322_v36 = vpop.permute.xlu1 %3321  ;;  %v1175_v14 = vadd.f32 %v1159_v30, %v983_v57  ;;  %v2503_v42 = vmul.f32 %v4554_v19, %v9302_v58  ;;  %v2695_v30 = vmul.f32 %v4570_v55, %v9303_v28  ;;  %vm2968_vm12 = vcmp.eq.s32.totalorder %v7889_v7, %v6647_v34 }
 0x5fc   : > { %vm3348_vm5 = vcmp.eq.s32.totalorder %v3322_v36, %v6647_v34  ;;  %v3285_v50 = vadd.f32 %v3269_v54, %v3093_v13  ;;  %v3284_v52 = vadd.f32 %v3268_v11, %v3092_v43  ;;  %v4474_v36 = vsel %vm1431_vm11, 1.0, %v5244_v37  ;;  %v9294_v43 = vld [vmem:[#allocation205_spill] sm:$0xff] }
 0x5fd   : > { %v4631_v41 = vsel %vm3348_vm5, 1.0, %v5244_v37  ;;  %v8120_v56 = vpop.permute.xlu2 %2943  ;;  %v1543_v60 = vmul.f32 %v4474_v36, %v9292_v1  ;;  %v1367_v54 = vadd.f32 %v1351_v31, %v1175_v14  ;;  %v1735_v13 = vmul.f32 %v4490_v40, %v9294_v43  ;;  %v5101_v31 = vld [vmem:[%s5363_s30 + $0x28] sm:$0xff] }
 0x5fe   : > { %v3477_v2 = vadd.f32 %v3461_v17, %v3285_v50  ;;  %v4506_v11 = vsel %vm1815_vm13, 1.0, %v5244_v37  ;;  %v3244_v50 = vpop.permute.xlu0 %3243  ;;  %v9297_v17 = vld [vmem:[#allocation295_spill] sm:$0xff]  ;;  %vm2966_vm5 = vcmp.eq.s32.totalorder %v8120_v56, %v6647_v34  ;;  %v3498_v51 = vsel %vm3482_vm3, %v5101_v31, 0.0  ;;  %v9305_v31 = vld [vmem:[#allocation124_spill] sm:$0xff] }
 0x5ff   : > { %v1559_v9 = vadd.f32 %v1543_v60, %v1367_v54  ;;  %vm2199_vm15 = vcmp.eq.s32.totalorder %v9297_v17, %v6647_v34  ;;  %v4601_v56 = vsel %vm2966_vm5, 1.0, %v5244_v37  ;;  %v4602_v60 = vsel %vm2967_vm7, 1.0, %v5244_v37 }
 0x600   : > { %v4538_v61 = vsel %vm2199_vm15, 1.0, %v5244_v37  ;;  %v4603_v3 = vsel %vm2968_vm12, 1.0, %v5244_v37  ;;  %v3525_v58 = vsel %vm3482_vm3, %v8007_v63, 0.0  ;;  %v3528_v7 = vsel %vm3482_vm3, %v8011_v44, 0.0 }
 0x601   : > { %3447 = vperm.xlu1 %4952, %v8011_v44   ;;  %v2311_v24 = vmul.f32 %v4538_v61, %v9300_v20 }
 0x603   : > { %v3428_v35 = vpop.permute.xlu1 %3427 }
 0x604   : > { %v3460_v45 = vmul.f32 %v4631_v41, %v3428_v35  ;;  %v9296_v41 = vld [vmem:[#allocation238_spill] sm:$0xff] }
 0x605   : > { %v8125_v48 = vpop.permute.xlu2 %3055  ;;  %v1927_v35 = vmul.f32 %v4506_v11, %v9296_v41 }
 0x606   : > { %v3476_v53 = vadd.f32 %v3460_v45, %v3284_v52  ;;  %v4522_v45 = vsel %vm2007_vm14, 1.0, %v5244_v37  ;;  %v8196_v32 = vpop.permute.xlu0 %3144  ;;  %v3079_v54 = vmul.f32 %v4602_v60, %v8125_v48 }
 0x607   : > { %v2119_v62 = vmul.f32 %v4522_v45, %v9298_v27  ;;  %v5104_v27 = vld [vmem:[%s5363_s30 + $0x48] sm:$0xff] }
 0x608   : > { %v3552_v39 = vpack.c.bf16 %v3477_v2, %v3476_v53  ;;  %v5098_v53 = vld [vmem:[%s5363_s30 + $0x18] sm:$0xff] }
 0x609   : > { %v3492_v2 = vsel %vm3482_vm3, %v5098_v53, 0.0 }
 0x60a   : > { %4658 = vmatmul.msk.bf16.gmra.mxu0 %vm3587_vm1, %v3552_v39  ;;  %v1751_v39 = vadd.f32 %v1735_v13, %v1559_v9 }
 0x60c   : > { %v8123_v46 = vpop.permute.xlu1 %2754  ;;  %v1943_v49 = vadd.f32 %v1927_v35, %v1751_v39 }
 0x60d   : > { %vm2775_vm4 = vcmp.eq.s32.totalorder %v8123_v46, %v6647_v34 }
 0x60e   : > { %v8131_v23 = vpop.permute.xlu2 %3138  ;;  %v2135_v21 = vadd.f32 %v2119_v62, %v1943_v49  ;;  %v4586_v0 = vsel %vm2775_vm4, 1.0, %v5244_v37  ;;  %v3440_v35 = vpop.permute.xlu0 %3439  ;;  %v3510_v62 = vsel %vm3482_vm3, %v5104_v27, 0.0 }
 0x60f   : > { %vm3159_vm8 = vcmp.eq.s32.totalorder %v8131_v23, %v6647_v34 }
 0x610   : > { %v2327_v10 = vadd.f32 %v2311_v24, %v2135_v21  ;;  %v4618_v40 = vsel %vm3159_vm8, 1.0, %v5244_v37 }
 0x612   : > { %v2519_v29 = vadd.f32 %v2503_v42, %v2327_v10 }
 0x614   : > { %v8127_v18 = vpop.permute.xlu1 %2863  ;;  %v2711_v14 = vadd.f32 %v2695_v30, %v2519_v29  ;;  %v4775_v30 = vld [vmem:[%s8593_s3 + $0x38] sm:$0xff]  }
 0x615   : > { %v2887_v46 = vmul.f32 %v4586_v0, %v8127_v18  ;;  %v4767_v0 = vunpack.c.l.bf16 %v4775_v30 }
 0x617   : > { %v8161_v16 = vpop.permute.xlu2 %3327  ;;  %v2903_v38 = vadd.f32 %v2887_v46, %v2711_v14 }
 0x618   : > { %vm3350_vm9 = vcmp.eq.s32.totalorder %v8161_v16, %v6647_v34 }
 0x619   : > { %v3095_v9 = vadd.f32 %v3079_v54, %v2903_v38  ;;  %v4633_v48 = vsel %vm3350_vm9, 1.0, %v5244_v37  ;;  %v4773_v38 = vld [vmem:[%s8593_s3 + $0x28] sm:$0xff]  }
 0x61a   : > { %v4760_v54 = vunpack.c.h.bf16 %v4773_v38 }
 0x61d   : > { %v8150_v8 = vpop.permute.xlu1 %3051 }
 0x61e   : > { %v3078_v1 = vmul.f32 %v4601_v56, %v8150_v8  ;;  %v5102_v8 = vld [vmem:[%s5363_s30 + $0x30] sm:$0xff] }
 0x61f   : > { %v3436_v6 = vpop.permute.xlu2 %3435  ;;  %v3501_v12 = vsel %vm3482_vm3, %v5102_v8, 0.0 }
 0x620   : > { %v3094_v43 = vadd.f32 %v3078_v1, %v8092_v25  ;;  %v3462_v17 = vmul.f32 %v4633_v48, %v3436_v6  ;;  %v4772_v48 = vld [vmem:[%s8593_s3 + $0x20] sm:$0xff]  }
 0x622   : > { %3484 = vadd.xlane.f32.xlu2 %v3483_v5  ;;  %v5100_v5 = vld [vmem:[%s5363_s30 + $0x20] sm:$0xff] }
 0x623   : > { %v3495_v57 = vsel %vm3482_vm3, %v5100_v5, 0.0 }
 0x626   : > { %v3136_v52 = vpop.permute.xlu1 %3135 }
 0x627   : > { %vm3158_vm6 = vcmp.eq.s32.totalorder %v3136_v52, %v6647_v34 }
 0x628   : > { %v4617_v36 = vsel %vm3158_vm6, 1.0, %v5244_v37  ;;  %v2761_v4 = vpop.permute.xlu2 %2760 }
 0x629   : > { %v3270_v18 = vmul.f32 %v4617_v36, %v3244_v50  ;;  %v5103_v50 = vld [vmem:[%s5363_s30 + $0x40] sm:$0xff]  ;;  %vm2777_vm13 = vcmp.eq.s32.totalorder %v2761_v4, %v6647_v34  ;;  %v4774_v36 = vld [vmem:[%s8593_s3 + $0x30] sm:$0xff]  }
 0x62a   : > { %3493 = vadd.xlane.f32.xlu2 %v3492_v2  ;;  %v3507_v41 = vsel %vm3482_vm3, %v5103_v50, 0.0  ;;  %v4588_v63 = vsel %vm2777_vm13, 1.0, %v5244_v37  ;;  %v4764_v1 = vunpack.c.h.bf16 %v4774_v36  ;;  %v4763_v60 = vunpack.c.l.bf16 %v4774_v36 }
 0x62b   : > { %3487 = vadd.xlane.f32.xlu1 %v3486_v26  ;;  %v3286_v11 = vadd.f32 %v3270_v18, %v3094_v43  ;;  %v3519_v26 = vsel %vm3482_vm3, %v7943_v22, 0.0  ;;  %vm3161_vm3 = vcmp.eq.s32.totalorder %v8196_v32, %v6647_v34  ;;  %v4759_v50 = vunpack.c.l.bf16 %v4773_v38 }
 0x62c   : > { %v4620_v56 = vsel %vm3161_vm3, 1.0, %v5244_v37 }
 0x62d   : > { %v3478_v53 = vadd.f32 %v3462_v17, %v3286_v11 }
 0x62e   : > { %v3248_v15 = vpop.permute.xlu1 %3247 }
 0x62f   : > { %v3271_v23 = vmul.f32 %v4618_v40, %v3248_v15  ;;  %v4768_v15 = vunpack.c.h.bf16 %v4775_v30  ;;  %v3444_v40 = vpop.permute.xlu0 %3443 }
 0x630   : > { %v2872_v2 = vpop.permute.xlu2 %2871 }
 0x631   : > { %v3287_v25 = vadd.f32 %v3271_v23, %v3095_v9  ;;  %v2889_v5 = vmul.f32 %v4588_v63, %v2872_v2  ;;  %3937 = vmatpush.msra.mxu1 %v4768_v15  ;;  %v4770_v2 = vld [vmem:[%s8593_s3 + $0x10] sm:$0xff]  }
 0x632   : > { %3496 = vadd.xlane.f32.xlu2 %v3495_v57  ;;  %v4747_v27 = vunpack.c.l.bf16 %v4770_v2 }
 0x633   : > { %3499 = vadd.xlane.f32.xlu1 %v3498_v51  ;;  %3938 = vmatpush.msra.mxu1 %v4767_v0  ;;  %v2905_v51 = vadd.f32 %v2889_v5, %v9305_v31 }
 0x635   : > { %3939 = vmatpush.msra.mxu1 %v4764_v1 }
 0x637   : > { %v3331_v13 = vpop.permute.xlu1 %3330  ;;  %3940 = vmatpush.msra.mxu1 %v4763_v60 }
 0x638   : > { %vm3351_vm10 = vcmp.eq.s32.totalorder %v3331_v13, %v6647_v34 }
 0x639   : > { %v4634_v16 = vsel %vm3351_vm10, 1.0, %v5244_v37  ;;  %v3060_v61 = vpop.permute.xlu2 %3059  ;;  %3941 = vmatpush.msra.mxu1 %v4760_v54 }
 0x63a   : > { %v3463_v52 = vmul.f32 %v4634_v16, %v3440_v35  ;;  %3502 = vadd.xlane.f32.xlu2 %v3501_v12  ;;  %v3080_v6 = vmul.f32 %v4603_v3, %v3060_v61  ;;  %v4756_v16 = vunpack.c.h.bf16 %v4772_v48 }
 0x63b   : > { %3508 = vadd.xlane.f32.xlu1 %v3507_v41  ;;  %3942 = vmatpush.msra.mxu1 %v4759_v50 }
 0x63c   : > { %v3479_v45 = vadd.f32 %v3463_v52, %v3287_v25  ;;  %v4755_v25 = vunpack.c.l.bf16 %v4772_v48  ;;  %v4771_v52 = vld [vmem:[%s8593_s3 + $0x18] sm:$0xff]  }
 0x63d   : > { %3943 = vmatpush.msra.mxu1 %v4756_v16 }
 0x63e   : > { %v3553_v39 = vpack.c.bf16 %v3479_v45, %v3478_v53  ;;  %v4752_v45 = vunpack.c.h.bf16 %v4771_v52  ;;  %v4751_v53 = vunpack.c.l.bf16 %v4771_v52 }
 0x63f   : > { %3944 = vmatpush.msra.mxu1 %v4755_v25 }
 0x640   : > { %v2758_v33 = vpop.permute.xlu1 %2757  ;;  %4659 = vmatmul.msk.bf16.gmra.mxu0 %vm3587_vm1, %v3553_v39  ;;  %v4748_v39 = vunpack.c.h.bf16 %v4770_v2 }
 0x641   : > { %vm2776_vm11 = vcmp.eq.s32.totalorder %v2758_v33, %v6647_v34  ;;  %3945 = vmatpush.msra.mxu1 %v4752_v45 }
 0x642   : > { %3511 = vadd.xlane.f32.xlu2 %v3510_v62  ;;  %v4587_v49 = vsel %vm2776_vm11, 1.0, %v5244_v37  ;;  %v3142_v55 = vpop.permute.xlu2 %3141  ;;  %v4769_v62 = vld [vmem:[%s8593_s3 + $0x8] sm:$0xff]  }
 0x643   : > { %3517 = vadd.xlane.f32.xlu1 %v3516_v59  ;;  %vm3160_vm15 = vcmp.eq.s32.totalorder %v3142_v55, %v6647_v34  ;;  %3946 = vmatpush.msra.mxu1 %v4751_v53  ;;  %v4744_v33 = vunpack.c.h.bf16 %v4769_v62  ;;  %v4743_v59 = vunpack.c.l.bf16 %v4769_v62 }
 0x644   : > { %v4619_v32 = vsel %vm3160_vm15, 1.0, %v5244_v37 }
 0x645   : > { %3947 = vmatpush.msra.mxu1 %v4748_v39 }
 0x647   : > { %3948 = vmatpush.msra.mxu1 %v4747_v27 }
 0x648   : > { %v2868_v20 = vpop.permute.xlu1 %2867 }
 0x649   : > { %v2888_v24 = vmul.f32 %v4587_v49, %v2868_v20  ;;  %3949 = vmatpush.msra.mxu1 %v4744_v33  ;;  %v3491_v20 = vpop.xlane.xlu0 %3490 }
 0x64a   : > { %3520 = vadd.xlane.f32.xlu2 %v3519_v26  ;;  %v3256_v28 = vpop.permute.xlu2 %3255  ;;  %v4738_v26 = vld [vmem:[%s8593_s3] sm:$0xff]  }
 0x64b   : > { %v2904_v19 = vadd.f32 %v2888_v24, %v9304_v47  ;;  %3526 = vadd.xlane.f32.xlu1 %v3525_v58  ;;  %v3273_v43 = vmul.f32 %v4620_v56, %v3256_v28  ;;  %3950 = vmatpush.msra.mxu1 %v4743_v59  ;;  %v4740_v61 = vunpack.c.h.bf16 %v4738_v26  ;;  %v4739_v49 = vunpack.c.l.bf16 %v4738_v26  ;;  %v3621_v47 = vpop.f32.mrf.mxu0 }
 0x64c   : > { %v8280_v24 = vmax.f32 %v3491_v20, 1.0 }
 0x64d   : > { %v3096_v21 = vadd.f32 %v3080_v6, %v2904_v19  ;;  %3951 = vmatpush.msra.mxu1 %v4740_v61 }
 0x64e   : > { %vm3696_vm8 = vweird.f32 %v8280_v24 }
 0x64f   : > { %3952 = vmatpush.msra.mxu1 %v4739_v49 }
 0x651   : > { %v2953_v42 = vpop.permute.xlu1 %2952 }
 0x652   : > { %3529 = vadd.xlane.f32.xlu2 %v3528_v7  ;;  %vm2969_vm14 = vcmp.eq.s32.totalorder %v2953_v42, %v6647_v34 }
 0x653   : > { %v4604_v44 = vsel %vm2969_vm14, 1.0, %v5244_v37  ;;  %v3337_v46 = vpop.permute.xlu2 %3336 }
 0x654   : > { %vm3353_vm2 = vcmp.eq.s32.totalorder %v3337_v46, %v6647_v34 }
 0x655   : > { %v4636_v8 = vsel %vm3353_vm2, 1.0, %v5244_v37 }
 0x659   : > { %v3064_v22 = vpop.permute.xlu1 %3063 }
 0x65a   : > { %v3081_v29 = vmul.f32 %v4604_v44, %v3064_v22 }
 0x65c   : > { %v3097_v18 = vadd.f32 %v3081_v29, %v2905_v51 }
 0x65e   : > { %v3289_v11 = vadd.f32 %v3273_v43, %v3097_v18 }
 0x662   : > { %v3252_v10 = vpop.permute.xlu1 %3251 }
 0x663   : > { %v3272_v4 = vmul.f32 %v4619_v32, %v3252_v10  ;;  %v3623_v10 = vpop.f32.mrf.mxu0 }
 0x665   : > { %v3288_v12 = vadd.f32 %v3272_v4, %v3096_v21 }
 0x66b   : > { %v3334_v57 = vpop.permute.xlu1 %3333 }
 0x66c   : > { %vm3352_vm0 = vcmp.eq.s32.totalorder %v3334_v57, %v6647_v34 }
 0x66d   : > { %v4635_v14 = vsel %vm3352_vm0, 1.0, %v5244_v37 }
 0x66e   : > { %v3464_v23 = vmul.f32 %v4635_v14, %v3444_v40  ;;  %v3626_v14 = vpop.f32.mrf.mxu0 }
 0x670   : > { %v3480_v41 = vadd.f32 %v3464_v23, %v3288_v12 }
 0x673   : > { %v3448_v13 = vpop.permute.xlu1 %3447 }
 0x674   : > { %v3465_v9 = vmul.f32 %v4636_v8, %v3448_v13  ;;  %v3702_v8 = vand.u32 2147483648, %v8280_v24 }
 0x676   : > { %v3481_v35 = vadd.f32 %v3465_v9, %v3289_v11  ;;  %v3700_v9 = vand.u32 2147483647, %v8280_v24  ;;  %v3628_v25 = vpop.f32.mrf.mxu0 }
 0x678   : > { %v3554_v17 = vpack.c.bf16 %v3481_v35, %v3480_v41  ;;  %vm3701_vm14 = vcmp.eq.f32.partialorder %v3700_v9, 8.507059e+37 }
 0x67a   : > { %4660 = vmatmul.msk.bf16.gmra.mxu0 %vm3587_vm1, %v3554_v17  ;;  %v3703_v17 = vor.u32 1.1754944e-38, %v3702_v8 }
 0x67e   : > { %v3631_v20 = vpop.f32.mrf.mxu0 }
 0x695   : > { %v3485_v3 = vpop.xlane.xlu2 %3484 }
 0x696   : > { %v3531_v6 = vmax.f32 %v3485_v3, 1.0  ;;  %v3506_v3 = vpop.xlane.xlu0 %3505 }
 0x698   : > { %4956 = vrcp.f32 %v3531_v6  ;;  %v3672_v63 = vand.u32 2147483648, %v3531_v6  ;;  %v3670_v0 = vand.u32 2147483647, %v3531_v6  ;;  %vm3666_vm4 = vweird.f32 %v3531_v6 }
 0x699   : > { %4958 = vrcp.f32 %v8280_v24 }
 0x69a   : > { %v3673_v57 = vor.u32 1.1754944e-38, %v3672_v63  ;;  %vm3671_vm6 = vcmp.eq.f32.partialorder %v3670_v0, 8.507059e+37 }
 0x69d   : > { %v3494_v19 = vpop.xlane.xlu2 %3493 }
 0x69e   : > { %v4957_v21 = vpop.eup %4956  ;;  %v3488_v58 = vpop.xlane.xlu1 %3487  ;;  %v8285_v22 = vmax.f32 %v3494_v19, 1.0 }
 0x69f   : > { %v8283_v42 = vpop.eup %4958  ;;  %v3662_v7 = vmul.f32 %v4957_v21, %v3531_v6  ;;  %v3532_v55 = vmax.f32 %v3488_v58, 1.0  ;;  %vm3667_vm1 = vweird.f32 %v4957_v21 }
 0x6a0   : > { %v3692_v30 = vmul.f32 %v8283_v42, %v8280_v24  ;;  %vm3668_vm5 = vmor %vm3666_vm4, %vm3667_vm1  ;;  %vm3697_vm9 = vweird.f32 %v8283_v42  ;;  %vm3711_vm3 = vweird.f32 %v8285_v22  ;;  %v3717_v62 = vand.u32 2147483648, %v8285_v22 }
 0x6a1   : > { %4960 = vrcp.f32 %v3532_v55  ;;  %v3663_v28 = vsub.f32 1.0, %v3662_v7  ;;  %v3687_v18 = vand.u32 2147483648, %v3532_v55  ;;  %v3685_v43 = vand.u32 2147483647, %v3532_v55  ;;  %vm3698_vm13 = vmor %vm3696_vm8, %vm3697_vm9 }
 0x6a2   : > { %4962 = vrcp.f32 %v8285_v22  ;;  %v3693_v46 = vsub.f32 1.0, %v3692_v30  ;;  %vm3681_vm10 = vweird.f32 %v3532_v55  ;;  %v3715_v59 = vand.u32 2147483647, %v8285_v22 }
 0x6a3   : > { %v3664_v15 = vmul.f32 %v4957_v21, %v3663_v28  ;;  %v3688_v11 = vor.u32 1.1754944e-38, %v3687_v18  ;;  %vm3686_vm12 = vcmp.eq.f32.partialorder %v3685_v43, 8.507059e+37  ;;  %v3718_v24 = vor.u32 1.1754944e-38, %v3717_v62 }
 0x6a4   : > { %v3694_v38 = vmul.f32 %v8283_v42, %v3693_v46  ;;  %vm3716_vm2 = vcmp.eq.f32.partialorder %v3715_v59, 8.507059e+37 }
 0x6a5   : > { %v3497_v5 = vpop.xlane.xlu2 %3496  ;;  %v3665_v44 = vadd.f32 %v4957_v21, %v3664_v15 }
 0x6a6   : > { %v8290_v31 = vmax.f32 %v3497_v5, 1.0  ;;  %v3500_v40 = vpop.xlane.xlu1 %3499  ;;  %v3695_v13 = vadd.f32 %v8283_v42, %v3694_v38 }
 0x6a7   : > { %v4961_v29 = vpop.eup %4960  ;;  %v3669_v51 = vsel %vm3668_vm5, %v4957_v21, %v3665_v44  ;;  %v8302_v12 = vmax.f32 %v3500_v40, 1.0  ;;  %v8320_v21 = vmax.f32 %v3506_v3, 1.0  ;;  %v3633_v44 = vpop.f32.mrf.mxu0 }
 0x6a8   : > { %v3677_v56 = vmul.f32 %v4961_v29, %v3532_v55  ;;  %v3674_v36 = vsel %vm3671_vm6, %v3673_v57, %v3669_v51  ;;  %v8292_v32 = vpop.eup %4962  ;;  %4964 = vrcp.f32 %v8290_v31  ;;  %vm3682_vm7 = vweird.f32 %v4961_v29 }
 0x6a9   : > { %v3675_v1 = vmul.f32 %v3674_v36, %v3621_v47  ;;  %v3707_v4 = vmul.f32 %v8292_v32, %v8285_v22  ;;  %vm3683_vm11 = vmor %vm3681_vm10, %vm3682_vm7  ;;  %4966 = vrcp.f32 %v8302_v12  ;;  %v3699_v52 = vsel %vm3698_vm13, %v8283_v42, %v3695_v13 }
 0x6aa   : > { %v3678_v60 = vsub.f32 1.0, %v3677_v56  ;;  %vm3712_vm15 = vweird.f32 %v8292_v32  ;;  %v3704_v39 = vsel %vm3701_vm14, %v3703_v17, %v3699_v52  ;;  %vm3726_vm1 = vweird.f32 %v8290_v31 }
 0x6ab   : > { %3953 = vmatmul.f32.vlgmr.msra.gmra.mxu1 %v3675_v1  ;;  %v3708_v41 = vsub.f32 1.0, %v3707_v4  ;;  %vm3713_vm0 = vmor %vm3711_vm3, %vm3712_vm15  ;;  %v3705_v49 = vmul.f32 %v3704_v39, %v3626_v14  ;;  %v3732_v42 = vand.u32 2147483648, %v8290_v31  ;;  %v3730_v22 = vand.u32 2147483647, %v8290_v31 }
 0x6ac   : > { %v3679_v54 = vmul.f32 %v4961_v29, %v3678_v60  ;;  %vm3741_vm7 = vweird.f32 %v8302_v12  ;;  %v3747_v46 = vand.u32 2147483648, %v8302_v12  ;;  %v3745_v51 = vand.u32 2147483647, %v8302_v12 }
 0x6ad   : > { %v3503_v53 = vpop.xlane.xlu2 %3502  ;;  %v3709_v2 = vmul.f32 %v8292_v32, %v3708_v41  ;;  %v3733_v30 = vor.u32 1.1754944e-38, %v3732_v42  ;;  %vm3731_vm6 = vcmp.eq.f32.partialorder %v3730_v22, 8.507059e+37  ;;  %vm3771_vm3 = vweird.f32 %v8320_v21 }
 0x6ae   : > { %v3680_v23 = vadd.f32 %v4961_v29, %v3679_v54  ;;  %v4965_v35 = vpop.eup %4964  ;;  %v8311_v27 = vmax.f32 %v3503_v53, 1.0  ;;  %v3509_v15 = vpop.xlane.xlu1 %3508  ;;  %v3748_v14 = vor.u32 1.1754944e-38, %v3747_v46  ;;  %vm3746_vm10 = vcmp.eq.f32.partialorder %v3745_v51, 8.507059e+37 }
 0x6af   : > { %v3722_v45 = vmul.f32 %v4965_v35, %v8290_v31  ;;  %v3710_v33 = vadd.f32 %v8292_v32, %v3709_v2  ;;  %v4967_v61 = vpop.eup %4966  ;;  %vm3727_vm4 = vweird.f32 %v4965_v35  ;;  %v8327_v57 = vmax.f32 %v3509_v15, 1.0  ;;  %v3636_v4 = vpop.f32.mrf.mxu0 }
 0x6b0   : > { %v3684_v50 = vsel %vm3683_vm11, %v4961_v29, %v3680_v23  ;;  %4968 = vrcp.f32 %v8311_v27  ;;  %v3737_v6 = vmul.f32 %v4967_v61, %v8302_v12  ;;  %vm3728_vm5 = vmor %vm3726_vm1, %vm3727_vm4  ;;  %vm3742_vm8 = vweird.f32 %v4967_v61 }
 0x6b1   : > { %v3689_v48 = vsel %vm3686_vm12, %v3688_v11, %v3684_v50  ;;  %v3723_v26 = vsub.f32 1.0, %v3722_v45  ;;  %v3714_v47 = vsel %vm3713_vm0, %v8292_v32, %v3710_v33  ;;  %4970 = vrcp.f32 %v8320_v21  ;;  %vm3743_vm9 = vmor %vm3741_vm7, %vm3742_vm8 }
 0x6b2   : > { %v3690_v16 = vmul.f32 %v3689_v48, %v3623_v10  ;;  %v3719_v58 = vsel %vm3716_vm2, %v3718_v24, %v3714_v47  ;;  %v3738_v55 = vsub.f32 1.0, %v3737_v6  ;;  %4972 = vrcp.f32 %v8327_v57 }
 0x6b3   : > { %v3724_v19 = vmul.f32 %v4965_v35, %v3723_v26  ;;  %v3720_v28 = vmul.f32 %v3719_v58, %v3628_v25  ;;  %vm3756_vm11 = vweird.f32 %v8311_v27  ;;  %v3762_v43 = vand.u32 2147483648, %v8311_v27 }
 0x6b4   : > { %3956 = vmatmul.f32.gmra.mxu1 %v3690_v16  ;;  %v3739_v5 = vmul.f32 %v4967_v61, %v3738_v55  ;;  %v3760_v8 = vand.u32 2147483647, %v8311_v27  ;;  %v3777_v25 = vand.u32 2147483648, %v8320_v21  ;;  %v3775_v2 = vand.u32 2147483647, %v8320_v21 }
 0x6b5   : > { %v3725_v7 = vadd.f32 %v4965_v35, %v3724_v19  ;;  %v3512_v60 = vpop.xlane.xlu2 %3511  ;;  %v3763_v50 = vor.u32 1.1754944e-38, %v3762_v43  ;;  %vm3786_vm1 = vweird.f32 %v8327_v57  ;;  %v3792_v6 = vand.u32 2147483648, %v8327_v57 }
 0x6b6   : > { %v4969_v10 = vpop.eup %4968  ;;  %v3740_v31 = vadd.f32 %v4967_v61, %v3739_v5  ;;  %v8334_v40 = vmax.f32 %v3512_v60, 1.0  ;;  %vm3761_vm14 = vcmp.eq.f32.partialorder %v3760_v8, 8.507059e+37  ;;  %v3778_v33 = vor.u32 1.1754944e-38, %v3777_v25 }
 0x6b7   : > { %v3752_v63 = vmul.f32 %v4969_v10, %v8311_v27  ;;  %v3729_v0 = vsel %vm3728_vm5, %v4965_v35, %v3725_v7  ;;  %v4971_v36 = vpop.eup %4970  ;;  %vm3757_vm12 = vweird.f32 %v4969_v10  ;;  %v3515_v35 = vpop.xlane.xlu0 %3514  ;;  %vm3776_vm2 = vcmp.eq.f32.partialorder %v3775_v2, 8.507059e+37 }
 0x6b8   : > { %v3734_v29 = vsel %vm3731_vm6, %v3733_v30, %v3729_v0  ;;  %v3767_v1 = vmul.f32 %v4971_v36, %v8320_v21  ;;  %v3744_v38 = vsel %vm3743_vm9, %v4967_v61, %v3740_v31  ;;  %v4973_v12 = vpop.eup %4972  ;;  %vm8338_vm13 = vmor %vm3756_vm11, %vm3757_vm12  ;;  %4974 = vrcp.f32 %v8334_v40  ;;  %v3638_v17 = vpop.f32.mrf.mxu0 }
 0x6b9   : > { %v3753_v56 = vsub.f32 1.0, %v3752_v63  ;;  %v3735_v32 = vmul.f32 %v3734_v29, %v3631_v20  ;;  %v3749_v54 = vsel %vm3746_vm10, %v3748_v14, %v3744_v38  ;;  %v3782_v48 = vmul.f32 %v4973_v12, %v8327_v57  ;;  %v3518_v61 = vpop.xlane.xlu1 %3517 }
 0x6ba   : > { %v3768_v23 = vsub.f32 1.0, %v3767_v1  ;;  %v3750_v9 = vmul.f32 %v3749_v54, %v3633_v44  ;;  %vm3772_vm15 = vweird.f32 %v4971_v36  ;;  %v8348_v52 = vmax.f32 %v3515_v35, 1.0 }
 0x6bb   : > { %v3754_v18 = vmul.f32 %v4969_v10, %v3753_v56  ;;  %v3783_v39 = vsub.f32 1.0, %v3782_v48  ;;  %vm3773_vm0 = vmor %vm3771_vm3, %vm3772_vm15  ;;  %vm3787_vm4 = vweird.f32 %v4973_v12  ;;  %v8354_v3 = vmax.f32 %v3518_v61, 1.0 }
 0x6bc   : > { %3959 = vmatmul.f32.gmra.mxu1 %v3705_v49  ;;  %v3769_v41 = vmul.f32 %v4971_v36, %v3768_v23  ;;  %4976 = vrcp.f32 %v8348_v52  ;;  %v3790_v19 = vand.u32 2147483647, %v8327_v57  ;;  %vm3788_vm5 = vmor %vm3786_vm1, %vm3787_vm4  ;;  %v3793_v7 = vor.u32 1.1754944e-38, %v3792_v6 }
 0x6bd   : > { %v3755_v13 = vadd.f32 %v4969_v10, %v3754_v18  ;;  %v3784_v49 = vmul.f32 %v4973_v12, %v3783_v39  ;;  %4978 = vrcp.f32 %v8354_v3  ;;  %v3521_v55 = vpop.xlane.xlu2 %3520  ;;  %vm3801_vm7 = vweird.f32 %v8334_v40 }
 0x6be   : > { %v3770_v53 = vadd.f32 %v4971_v36, %v3769_v41  ;;  %v4975_v27 = vpop.eup %4974  ;;  %vm3791_vm6 = vcmp.eq.f32.partialorder %v3790_v19, 8.507059e+37  ;;  %v8361_v30 = vmax.f32 %v3521_v55, 1.0  ;;  %v3807_v15 = vand.u32 2147483648, %v8334_v40 }
 0x6bf   : > { %v3759_v16 = vsel %vm8338_vm13, %v4969_v10, %v3755_v13  ;;  %v3797_v26 = vmul.f32 %v4975_v27, %v8334_v40  ;;  %v3785_v47 = vadd.f32 %v4973_v12, %v3784_v49  ;;  %vm3802_vm8 = vweird.f32 %v4975_v27  ;;  %v3524_v56 = vpop.xlane.xlu0 %3523 }
 0x6c0   : > { %v3764_v45 = vsel %vm3761_vm14, %v3763_v50, %v3759_v16  ;;  %v3774_v59 = vsel %vm3773_vm0, %v4971_v36, %v3770_v53  ;;  %v3641_v24 = vpop.f32.mrf.mxu0  ;;  %v3805_v44 = vand.u32 2147483647, %v8334_v40  ;;  %vm3803_vm9 = vmor %vm3801_vm7, %vm3802_vm8  ;;  %4980 = vrcp.f32 %v8361_v30 }
 0x6c1   : > { %v3765_v62 = vmul.f32 %v3764_v45, %v3636_v4  ;;  %v3779_v20 = vsel %vm3776_vm2, %v3778_v33, %v3774_v59  ;;  %v3798_v21 = vsub.f32 1.0, %v3797_v26  ;;  %v3789_v10 = vsel %vm3788_vm5, %v4973_v12, %v3785_v47  ;;  %v3527_v12 = vpop.xlane.xlu1 %3526 }
 0x6c2   : > { %v4977_v58 = vpop.eup %4976  ;;  %v3780_v42 = vmul.f32 %v3779_v20, %v3638_v17  ;;  %v3794_v63 = vsel %vm3791_vm6, %v3793_v7, %v3789_v10  ;;  %v3808_v31 = vor.u32 1.1754944e-38, %v3807_v15  ;;  %vm3806_vm10 = vcmp.eq.f32.partialorder %v3805_v44, 8.507059e+37 }
 0x6c3   : > { %v3812_v22 = vmul.f32 %v4977_v58, %v8348_v52  ;;  %v4979_v57 = vpop.eup %4978  ;;  %v3795_v46 = vmul.f32 %v3794_v63, %v3641_v24  ;;  %vm3816_vm11 = vweird.f32 %v8348_v52  ;;  %vm3817_vm12 = vweird.f32 %v4977_v58 }
 0x6c4   : > { %3962 = vmatmul.f32.gmra.mxu1 %v3720_v28  ;;  %v3799_v28 = vmul.f32 %v4975_v27, %v3798_v21  ;;  %v3827_v36 = vmul.f32 %v4979_v57, %v8354_v3  ;;  %v3822_v14 = vand.u32 2147483648, %v8348_v52  ;;  %v8369_v1 = vmax.f32 %v3524_v56, 1.0  ;;  %vm3818_vm13 = vmor %vm3816_vm11, %vm3817_vm12 }
 0x6c5   : > { %v3813_v0 = vsub.f32 1.0, %v3812_v22  ;;  %v3820_v18 = vand.u32 2147483647, %v8348_v52  ;;  %vm3831_vm3 = vweird.f32 %v8354_v3  ;;  %vm3832_vm15 = vweird.f32 %v4979_v57 }
 0x6c6   : > { %v3800_v5 = vadd.f32 %v4975_v27, %v3799_v28  ;;  %v3828_v4 = vsub.f32 1.0, %v3827_v36  ;;  %v4981_v40 = vpop.eup %4980  ;;  %v3823_v23 = vor.u32 1.1754944e-38, %v3822_v14  ;;  %4982 = vrcp.f32 %v8369_v1  ;;  %vm8379_vm0 = vmor %vm3831_vm3, %vm3832_vm15 }
 0x6c7   : > { %v3814_v51 = vmul.f32 %v4977_v58, %v3813_v0  ;;  %vm3821_vm14 = vcmp.eq.f32.partialorder %v3820_v18, 8.507059e+37  ;;  %v3842_v8 = vmul.f32 %v4981_v40, %v8361_v30  ;;  %v8375_v50 = vmax.f32 %v3527_v12, 1.0 }
 0x6c8   : > { %v3643_v29 = vpop.f32.mrf.mxu0  ;;  %v3829_v11 = vmul.f32 %v4979_v57, %v3828_v4  ;;  %v3837_v41 = vand.u32 2147483648, %v8354_v3  ;;  %v3835_v16 = vand.u32 2147483647, %v8354_v3  ;;  %vm3846_vm1 = vweird.f32 %v8361_v30 }
 0x6c9   : > { %v3815_v38 = vadd.f32 %v4977_v58, %v3814_v51  ;;  %v3843_v35 = vsub.f32 1.0, %v3842_v8  ;;  %4984 = vrcp.f32 %v8375_v50  ;;  %vm3847_vm4 = vweird.f32 %v4981_v40 }
 0x6ca   : > { %v3830_v48 = vadd.f32 %v4979_v57, %v3829_v11  ;;  %v3838_v53 = vor.u32 1.1754944e-38, %v3837_v41  ;;  %vm3836_vm2 = vcmp.eq.f32.partialorder %v3835_v16, 8.507059e+37  ;;  %v3852_v33 = vand.u32 2147483648, %v8361_v30  ;;  %vm3848_vm5 = vmor %vm3846_vm1, %vm3847_vm4 }
 0x6cb   : > { %v3819_v13 = vsel %vm3818_vm13, %v4977_v58, %v3815_v38  ;;  %v3844_v2 = vmul.f32 %v4981_v40, %v3843_v35  ;;  %v3850_v49 = vand.u32 2147483647, %v8361_v30  ;;  %vm3861_vm7 = vweird.f32 %v8369_v1 }
 0x6cc   : > { %3965 = vmatmul.f32.gmra.mxu1 %v3735_v32  ;;  %v3804_v32 = vsel %vm3803_vm9, %v4975_v27, %v3800_v5  ;;  %v4983_v17 = vpop.eup %4982  ;;  %v3530_v27 = vpop.xlane.xlu2 %3529  ;;  %v3853_v47 = vor.u32 1.1754944e-38, %v3852_v33  ;;  %v3867_v7 = vand.u32 2147483648, %v8369_v1  ;;  %v3865_v55 = vand.u32 2147483647, %v8369_v1 }
 0x6cd   : > { %v3809_v60 = vsel %vm3806_vm10, %v3808_v31, %v3804_v32  ;;  %v3857_v39 = vmul.f32 %v4983_v17, %v8369_v1  ;;  %v3546_v59 = vmax.f32 %v3530_v27, 1.0  ;;  %v3845_v61 = vadd.f32 %v4981_v40, %v3844_v2  ;;  %v8408_v27 = vld [vmem:[%s8594_s4] ss:$0 sm:$0xff] }
 0x6ce   : > { %v3810_v43 = vmul.f32 %v3809_v60, %v3643_v29  ;;  %vm3851_vm6 = vcmp.eq.f32.partialorder %v3850_v49, 8.507059e+37  ;;  %vm3862_vm8 = vweird.f32 %v4983_v17  ;;  %v3868_v63 = vor.u32 1.1754944e-38, %v3867_v7 }
 0x6cf   : > { %v3858_v20 = vsub.f32 1.0, %v3857_v39  ;;  %v4985_v24 = vpop.eup %4984  ;;  %4986 = vrcp.f32 %v3546_v59  ;;  %v3849_v19 = vsel %vm3848_vm5, %v4981_v40, %v3845_v61  ;;  %vm3863_vm9 = vmor %vm3861_vm7, %vm3862_vm8  ;;  %vm3866_vm10 = vcmp.eq.f32.partialorder %v3865_v55, 8.507059e+37 }
 0x6d0   : > { %v3646_v54 = vpop.f32.mrf.mxu0  ;;  %v3872_v58 = vmul.f32 %v4985_v24, %v8375_v50  ;;  %vm3876_vm11 = vweird.f32 %v8375_v50  ;;  %vm3877_vm12 = vweird.f32 %v4985_v24  ;;  %v3882_v29 = vand.u32 2147483648, %v8375_v50 }
 0x6d1   : > { %v3859_v21 = vmul.f32 %v4983_v17, %v3858_v20  ;;  %v3880_v31 = vand.u32 2147483647, %v8375_v50  ;;  %vm3878_vm13 = vmor %vm3876_vm11, %vm3877_vm12  ;;  %vm3891_vm3 = vweird.f32 %v3546_v59  ;;  %v3897_v38 = vand.u32 2147483648, %v3546_v59 }
 0x6d2   : > { %v3873_v10 = vsub.f32 1.0, %v3872_v58  ;;  %v3883_v36 = vor.u32 1.1754944e-38, %v3882_v29  ;;  %v3895_v4 = vand.u32 2147483647, %v3546_v59 }
 0x6d3   : > { %v3860_v22 = vadd.f32 %v4983_v17, %v3859_v21 }
 0x6d4   : > { %3968 = vmatmul.f32.gmra.mxu1 %v3750_v9  ;;  %v3824_v9 = vsel %vm3821_vm14, %v3823_v23, %v3819_v13  ;;  %v3874_v0 = vmul.f32 %v4985_v24, %v3873_v10  ;;  %vm3881_vm14 = vcmp.eq.f32.partialorder %v3880_v31, 8.507059e+37 }
 0x6d5   : > { %v3825_v52 = vmul.f32 %v3824_v9, %v3646_v54  ;;  %v4987_v28 = vpop.eup %4986  ;;  %v3864_v15 = vsel %vm3863_vm9, %v4983_v17, %v3860_v22  ;;  %v3898_v54 = vor.u32 1.1754944e-38, %v3897_v38 }
 0x6d6   : > { %v3887_v5 = vmul.f32 %v4987_v28, %v3546_v59  ;;  %vm3892_vm15 = vweird.f32 %v4987_v28 }
 0x6d8   : > { %v3648_v45 = vpop.f32.mrf.mxu0  ;;  %v3888_v51 = vsub.f32 1.0, %v3887_v5  ;;  %v8425_v5 = vmul.u32 2, %v6647_v34 }
 0x6da   : > { %v3889_v14 = vmul.f32 %v4987_v28, %v3888_v51  ;;  %v5247_v51 = vmov 1.0  }
 0x6dc   : > { %3971 = vmatmul.f32.gmra.mxu1 %v3765_v62  ;;  %v3834_v62 = vsel %vm8379_vm0, %v4979_v57, %v3830_v48  ;;  %v3869_v57 = vsel %vm3866_vm10, %v3868_v63, %v3864_v15  ;;  %v3890_v18 = vadd.f32 %v4987_v28, %v3889_v14  ;;  %vm3893_vm0 = vmor %vm3891_vm3, %vm3892_vm15  ;;  %v4019_v63 = vld [vmem:[#allocation2] sm:$0x1]  ;;  %v9310_v15 = vlaneseq }
 0x6dd   : > { %v3839_v26 = vsel %vm3836_vm2, %v3838_v53, %v3834_v62  ;;  %vm3896_vm2 = vcmp.eq.f32.partialorder %v3895_v4, 8.507059e+37  ;;  %4022 = vperm.xlu0 %4954, %v4019_v63  }
 0x6de   : > { %v3840_v3 = vmul.f32 %v3839_v26, %v3648_v45 }
 0x6e0   : > { %v3651_v6 = vpop.f32.mrf.mxu0 }
 0x6e4   : > { %3974 = vmatmul.f32.gmra.mxu1 %v3780_v42  ;;  %v3854_v42 = vsel %vm3851_vm6, %v3853_v47, %v3849_v19 }
 0x6e5   : > { %v3855_v30 = vmul.f32 %v3854_v42, %v3651_v6 }
 0x6e8   : > { %v3653_v44 = vpop.f32.mrf.mxu0 }
 0x6e9   : > { %v3870_v56 = vmul.f32 %v3869_v57, %v3653_v44 }
 0x6ec   : > { %3977 = vmatmul.f32.gmra.mxu1 %v3795_v46  ;;  %v3875_v46 = vadd.f32 %v4985_v24, %v3874_v0  ;;  %v8422_v0 = vshrl.u32 %v9310_v15, 7 }
 0x6ee   : > { %v3879_v32 = vsel %vm3878_vm13, %v4985_v24, %v3875_v46  ;;  %v8429_v57 = vadd.s32 120, %v8422_v0  ;;  %v8432_v29 = vadd.s32 112, %v8422_v0  ;;  %v8435_v46 = vadd.s32 104, %v8422_v0 }
 0x6ef   : > { %v3884_v60 = vsel %vm3881_vm14, %v3883_v36, %v3879_v32  ;;  %v8442_v34 = vadd.s32 96, %v8422_v0  ;;  %v8450_v36 = vadd.s32 88, %v8422_v0  ;;  %v8456_v14 = vadd.s32 80, %v8422_v0 }
 0x6f0   : > { %vm4080_vm1 = vcmp.eq.s32.totalorder %v8429_v57, %v8425_v5  ;;  %vm4079_vm4 = vcmp.eq.s32.totalorder %v8432_v29, %v8425_v5  ;;  %vm4078_vm5 = vcmp.eq.s32.totalorder %v8435_v46, %v8425_v5 }
 0x6f1   : > { %4693 = vmatpush.msk.msra.mxu3 %vm4080_vm1, %v5247_v51  ;;  %vm4077_vm6 = vcmp.eq.s32.totalorder %v8442_v34, %v8425_v5  ;;  %vm4076_vm7 = vcmp.eq.s32.totalorder %v8450_v36, %v8425_v5  ;;  %vm4075_vm8 = vcmp.eq.s32.totalorder %v8456_v14, %v8425_v5 }
 0x6f3   : > { %4694 = vmatpush.msk.msra.mxu3 %vm4079_vm4, %v5247_v51 }
 0x6f4   : > { %3980 = vmatmul.f32.gmra.mxu1 %v3810_v43  ;;  %v3894_v43 = vsel %vm3893_vm0, %v4987_v28, %v3890_v18  ;;  %v8470_v18 = vadd.s32 64, %v8422_v0 }
 0x6f5   : > { %v3899_v13 = vsel %vm3896_vm2, %v3898_v54, %v3894_v43  ;;  %4695 = vmatpush.msk.msra.mxu3 %vm4078_vm5, %v5247_v51  ;;  %v4054_v43 = vadd.s32 48, %v8422_v0  ;;  %vm4065_vm2 = vcmp.eq.s32.totalorder %v8422_v0, %v8425_v5 }
 0x6f6   : > { %vm4073_vm10 = vcmp.eq.s32.totalorder %v8470_v18, %v8425_v5 }
 0x6f7   : > { %v3656_v1 = vpop.f32.mrf.mxu0  ;;  %4696 = vmatpush.msk.msra.mxu3 %vm4077_vm6, %v5247_v51  ;;  %vm4071_vm12 = vcmp.eq.s32.totalorder %v4054_v43, %v8425_v5 }
 0x6f8   : > { %v3885_v40 = vmul.f32 %v3884_v60, %v3656_v1  ;;  %v8464_v60 = vadd.s32 72, %v8422_v0 }
 0x6f9   : > { %4697 = vmatpush.msk.msra.mxu3 %vm4076_vm7, %v5247_v51 }
 0x6fa   : > { %vm4074_vm9 = vcmp.eq.s32.totalorder %v8464_v60, %v8425_v5 }
 0x6fb   : > { %4698 = vmatpush.msk.msra.mxu3 %vm4075_vm8, %v5247_v51 }
 0x6fc   : > { %3983 = vmatmul.f32.gmra.mxu1 %v3825_v52 }
 0x6fd   : > { %4699 = vmatpush.msk.msra.mxu3 %vm4074_vm9, %v5247_v51 }
 0x6ff   : > { %v3658_v23 = vpop.f32.mrf.mxu0  ;;  %4700 = vmatpush.msk.msra.mxu3 %vm4073_vm10, %v5247_v51 }
 0x700   : > { %v3900_v8 = vmul.f32 %v3899_v13, %v3658_v23  ;;  %v4053_v13 = vadd.s32 40, %v8422_v0 }
 0x702   : > { %vm4070_vm13 = vcmp.eq.s32.totalorder %v4053_v13, %v8425_v5 }
 0x704   : > { %3986 = vmatmul.f32.gmra.mxu1 %v3840_v3 }
 0x70c   : > { %3989 = vmatmul.f32.gmra.mxu1 %v3855_v30 }
 0x714   : > { %3992 = vmatmul.f32.gmra.mxu1 %v3870_v56 }
 0x71c   : > { %3995 = vmatmul.f32.gmra.mxu1 %v3885_v40  ;;  %v4055_v40 = vadd.s32 56, %v8422_v0 }
 0x71e   : > { %vm4072_vm11 = vcmp.eq.s32.totalorder %v4055_v40, %v8425_v5 }
 0x71f   : > { %4701 = vmatpush.msk.msra.mxu3 %vm4072_vm11, %v5247_v51 }
 0x721   : > { %4702 = vmatpush.msk.msra.mxu3 %vm4071_vm12, %v5247_v51 }
 0x723   : > { %4703 = vmatpush.msk.msra.mxu3 %vm4070_vm13, %v5247_v51 }
 0x724   : > { %3998 = vmatmul.f32.gmra.mxu1 %v3900_v8 }
 0x728   : > { %v8397_v12 = vpop.f32.mrf.mxu1 }
 0x729   : > { %v3955_v23 = vadd.f32 %v8408_v27, %v8397_v12  ;;  %v4051_v12 = vadd.s32 24, %v8422_v0 }
 0x72b   : > { %vm4068_vm3 = vcmp.eq.s32.totalorder %v4051_v12, %v8425_v5 }
 0x731   : > { %v8399_v11 = vpop.f32.mrf.mxu1 }
 0x732   : > { %v3958_v4 = vadd.f32 %v8408_v27, %v8399_v11  ;;  %v4052_v11 = vadd.s32 32, %v8422_v0 }
 0x734   : > { %vm4069_vm14 = vcmp.eq.s32.totalorder %v4052_v11, %v8425_v5 }
 0x735   : > { %4704 = vmatpush.msk.msra.mxu3 %vm4069_vm14, %v5247_v51 }
 0x737   : > { %4705 = vmatpush.msk.msra.mxu3 %vm4068_vm3, %v5247_v51 }
 0x739   : > { %v8401_v9 = vpop.f32.mrf.mxu1 }
 0x73a   : > { %v3961_v1 = vadd.f32 %v8408_v27, %v8401_v9 }
 0x741   : > { %v8403_v50 = vpop.f32.mrf.mxu1 }
 0x742   : > { %v3964_v56 = vadd.f32 %v8408_v27, %v8403_v50  ;;  %v4050_v50 = vadd.s32 16, %v8422_v0 }
 0x744   : > { %vm4067_vm15 = vcmp.eq.s32.totalorder %v4050_v50, %v8425_v5 }
 0x745   : > { %4706 = vmatpush.msk.msra.mxu3 %vm4067_vm15, %v5247_v51 }
 0x749   : > { %v3966_v41 = vpop.f32.mrf.mxu1 }
 0x74a   : > { %v3967_v44 = vadd.f32 %v8408_v27, %v3966_v41  ;;  %v4049_v41 = vadd.s32 8, %v8422_v0 }
 0x74c   : > { %vm4066_vm0 = vcmp.eq.s32.totalorder %v4049_v41, %v8425_v5 }
 0x74d   : > { %4707 = vmatpush.msk.msra.mxu3 %vm4066_vm0, %v5247_v51 }
 0x74f   : > { %4708 = vmatpush.msk.msra.mxu3 %vm4065_vm2, %v5247_v51 }
 0x751   : > { %v3969_v35 = vpop.f32.mrf.mxu1 }
 0x752   : > { %v3970_v28 = vadd.f32 %v8408_v27, %v3969_v35 }
 0x759   : > { %v3972_v48 = vpop.f32.mrf.mxu1 }
 0x75a   : > { %v3973_v55 = vadd.f32 %v8408_v27, %v3972_v48  ;;  %v4018_v48 = vld [vmem:[%s8595_s5] sm:$0x1] }
 0x761   : > { %v3975_v16 = vpop.f32.mrf.mxu1 }
 0x762   : > { %v3976_v7 = vadd.f32 %v8408_v27, %v3975_v16  ;;  %v4113_v16 = vadd.s32 1, %v8425_v5 }
 0x764   : > { %vm4129_vm1 = vcmp.eq.s32.totalorder %v8429_v57, %v4113_v16  ;;  %vm4128_vm4 = vcmp.eq.s32.totalorder %v8432_v29, %v4113_v16  ;;  %vm4127_vm5 = vcmp.eq.s32.totalorder %v8435_v46, %v4113_v16  ;;  %vm4126_vm6 = vcmp.eq.s32.totalorder %v8442_v34, %v4113_v16 }
 0x765   : > { %4709 = vmatpush.msk.msrb.mxu3 %vm4129_vm1, %v5247_v51  ;;  %vm4125_vm7 = vcmp.eq.s32.totalorder %v8450_v36, %v4113_v16  ;;  %vm4124_vm8 = vcmp.eq.s32.totalorder %v8456_v14, %v4113_v16  ;;  %vm4123_vm9 = vcmp.eq.s32.totalorder %v8464_v60, %v4113_v16  ;;  %vm4122_vm10 = vcmp.eq.s32.totalorder %v8470_v18, %v4113_v16 }
 0x766   : > { %vm4121_vm11 = vcmp.eq.s32.totalorder %v4055_v40, %v4113_v16  ;;  %vm4120_vm12 = vcmp.eq.s32.totalorder %v4054_v43, %v4113_v16  ;;  %vm4119_vm13 = vcmp.eq.s32.totalorder %v4053_v13, %v4113_v16  ;;  %vm4118_vm14 = vcmp.eq.s32.totalorder %v4052_v11, %v4113_v16 }
 0x767   : > { %4710 = vmatpush.msk.msrb.mxu3 %vm4128_vm4, %v5247_v51  ;;  %vm4117_vm3 = vcmp.eq.s32.totalorder %v4051_v12, %v4113_v16  ;;  %vm4116_vm15 = vcmp.eq.s32.totalorder %v4050_v50, %v4113_v16  ;;  %vm4115_vm0 = vcmp.eq.s32.totalorder %v4049_v41, %v4113_v16  ;;  %vm4114_vm2 = vcmp.eq.s32.totalorder %v8422_v0, %v4113_v16 }
 0x768   : > { %vm4222_vm1 = vcmask 516096  }
 0x769   : > { %v3978_v17 = vpop.f32.mrf.mxu1  ;;  %4711 = vmatpush.msk.msrb.mxu3 %vm4127_vm5, %v5247_v51 }
 0x76a   : > { %v3979_v58 = vadd.f32 %v8408_v27, %v3978_v17  ;;  %v4023_v17 = vpop.permute.xlu0 %4022 }
 0x76b   : > { %4712 = vmatpush.msk.msrb.mxu3 %vm4126_vm6, %v5247_v51  ;;  %vm4227_vm6 = vcmask 0  }
 0x76d   : > { %4713 = vmatpush.msk.msrb.mxu3 %vm4125_vm7, %v5247_v51 }
 0x76f   : > { %4714 = vmatpush.msk.msrb.mxu3 %vm4124_vm8, %v5247_v51 }
 0x771   : > { %v3981_v25 = vpop.f32.mrf.mxu1  ;;  %4715 = vmatpush.msk.msrb.mxu3 %vm4123_vm9, %v5247_v51 }
 0x772   : > { %v3982_v19 = vadd.f32 %v8408_v27, %v3981_v25  ;;  %v4025_v25 = vperm.slane %v4023_v17, 0 }
 0x773   : > { %4716 = vmatpush.msk.msrb.mxu3 %vm4122_vm10, %v5247_v51 }
 0x775   : > { %4717 = vmatpush.msk.msrb.mxu3 %vm4121_vm11, %v5247_v51 }
 0x777   : > { %4718 = vmatpush.msk.msrb.mxu3 %vm4120_vm12, %v5247_v51 }
 0x779   : > { %v3984_v52 = vpop.f32.mrf.mxu1  ;;  %4719 = vmatpush.msk.msrb.mxu3 %vm4119_vm13, %v5247_v51 }
 0x77a   : > { %v3985_v6 = vadd.f32 %v8408_v27, %v3984_v52 }
 0x77b   : > { %4720 = vmatpush.msk.msrb.mxu3 %vm4118_vm14, %v5247_v51 }
 0x77d   : > { %4721 = vmatpush.msk.msrb.mxu3 %vm4117_vm3, %v5247_v51 }
 0x77f   : > { %4722 = vmatpush.msk.msrb.mxu3 %vm4116_vm15, %v5247_v51 }
 0x781   : > { %v3987_v45 = vpop.f32.mrf.mxu1  ;;  %4723 = vmatpush.msk.msrb.mxu3 %vm4115_vm0, %v5247_v51 }
 0x782   : > { %v3988_v24 = vadd.f32 %v8408_v27, %v3987_v45 }
 0x783   : > { %4724 = vmatpush.msk.msrb.mxu3 %vm4114_vm2, %v5247_v51 }
 0x789   : > { %v3990_v53 = vpop.f32.mrf.mxu1 }
 0x78a   : > { %v3991_v49 = vadd.f32 %v8408_v27, %v3990_v53 }
 0x791   : > { %v3993_v2 = vpop.f32.mrf.mxu1 }
 0x792   : > { %v3994_v26 = vadd.f32 %v8408_v27, %v3993_v2 }
 0x799   : > { %v3996_v39 = vpop.f32.mrf.mxu1 }
 0x79a   : > { %v3997_v59 = vadd.f32 %v8408_v27, %v3996_v39 }
 0x7a1   : > { %v3999_v62 = vpop.f32.mrf.mxu1 }
 0x7a2   : > { %v4000_v33 = vadd.f32 %v8408_v27, %v3999_v62 }
 0x7a4   : > { %4988 = vtanh.f32 %v4000_v33 }
 0x7a5   : > { %4990 = vtanh.f32 %v3997_v59 }
 0x7a6   : > { %4992 = vtanh.f32 %v3994_v26 }
 0x7a7   : > { %4994 = vtanh.f32 %v3991_v49 }
 0x7a8   : > { %4996 = vtanh.f32 %v3988_v24 }
 0x7a9   : > { %4998 = vtanh.f32 %v3985_v6 }
 0x7aa   : > { %v4989_v61 = vpop.eup %4988  ;;  %5000 = vtanh.f32 %v3982_v19 }
 0x7ab   : > { %4026 = vmatpush.xpose.msra.mxu2 %v4989_v61  ;;  %v4991_v20 = vpop.eup %4990  ;;  %5002 = vtanh.f32 %v3979_v58 }
 0x7ac   : > { %v4993_v3 = vpop.eup %4992  ;;  %5004 = vtanh.f32 %v3976_v7  ;;  %v4229_v7 = vld [vmem:[#allocation7] sm:$0x1] }
 0x7ad   : > { %v4995_v47 = vpop.eup %4994  ;;  %5006 = vtanh.f32 %v3973_v55 }
 0x7ae   : > { %v4997_v21 = vpop.eup %4996  ;;  %5008 = vtanh.f32 %v3970_v28 }
 0x7af   : > { %4027 = vmatpush.xpose.msra.mxu2 %v4991_v20  ;;  %v4999_v42 = vpop.eup %4998  ;;  %5010 = vtanh.f32 %v3967_v44 }
 0x7b0   : > { %v5001_v22 = vpop.eup %5000  ;;  %5012 = vtanh.f32 %v3964_v56 }
 0x7b1   : > { %v5003_v10 = vpop.eup %5002  ;;  %5014 = vtanh.f32 %v3961_v1 }
 0x7b2   : > { %v5005_v30 = vpop.eup %5004  ;;  %5016 = vtanh.f32 %v3958_v4 }
 0x7b3   : > { %4028 = vmatpush.xpose.msra.mxu2 %v4993_v3  ;;  %v5007_v31 = vpop.eup %5006  ;;  %5018 = vtanh.f32 %v3955_v23 }
 0x7b4   : > { %v5009_v32 = vpop.eup %5008 }
 0x7b5   : > { %v5011_v38 = vpop.eup %5010 }
 0x7b6   : > { %v5013_v54 = vpop.eup %5012 }
 0x7b7   : > { %4029 = vmatpush.xpose.msra.mxu2 %v4995_v47  ;;  %v5015_v8 = vpop.eup %5014 }
 0x7b8   : > { %v5017_v9 = vpop.eup %5016 }
 0x7b9   : > { %v5019_v35 = vpop.eup %5018 }
 0x7bb   : > { %4030 = vmatpush.xpose.msra.mxu2 %v4997_v21 }
 0x7bf   : > { %4031 = vmatpush.xpose.msra.mxu2 %v4999_v42 }
 0x7c3   : > { %4032 = vmatpush.xpose.msra.mxu2 %v5001_v22 }
 0x7c7   : > { %4033 = vmatpush.xpose.msra.mxu2 %v5003_v10  ;;  %v4221_v10 = vld [vmem:[#allocation5] sm:$0x1] }
 0x7cb   : > { %4034 = vmatpush.xpose.msra.mxu2 %v5005_v30 }
 0x7cf   : > { %4035 = vmatpush.xpose.msra.mxu2 %v5007_v31 }
 0x7d3   : > { %4036 = vmatpush.xpose.msra.mxu2 %v5009_v32 }
 0x7d7   : > { %4037 = vmatpush.xpose.msra.mxu2 %v5011_v38 }
 0x7db   : > { %4038 = vmatpush.xpose.msra.mxu2 %v5013_v54 }
 0x7df   : > { %4039 = vmatpush.xpose.msra.mxu2 %v5015_v8 }
 0x7e3   : > { %4040 = vmatpush.xpose.msra.mxu2 %v5017_v9 }
 0x7e7   : > { %4041 = vmatpush.xpose.msra.mxu2 %v5019_v35 }
 0x7ea   : > { %4042 = vmatmul.f32.vlgmr.msra.gmra.mxu2 %v4018_v48 }
 0x86d   : > { %v4043_v52 = vpop.f32.mrf.mxu2 }
 0x86e   : > { %v4044_v45 = vadd.f32 %v4043_v52, %v4025_v25 }
 0x870   : > { %4046 = vst [vmem:[%s5367_s10] sm:$0x1] %v4044_v45  ;;  %4178 = vmatmul.f32.vlgmr.msra.gmra.mxu3 %v4044_v45 }
 0x878   : > { %4198 = vmatmul.f32.vlgmr.msrb.gmra.mxu3 %v4044_v45 }
 0x8f3   : > { %v4179_v53 = vpop.f32.mrf.mxu3 }
 0x8fb   : > { %v4199_v2 = vpop.f32.mrf.mxu3 }
 0x8fc   : > { %v4202_v39 = vsub.f32 %v4199_v2, %v4179_v53 }
 0x8fe   : > { %v4204_v27 = vand.u32 2147483647, %v4202_v39  ;;  %vm4218_vm4 = vcmp.le.f32.partialorder %v4202_v39, 0.0  ;;  %v4203_v21 = vmax.f32 %v4202_v39, 0.0 }
 0x8ff   : > { %v4725_v62 = vsel %vm4218_vm4, 1.0, %v5244_v37 }
 0x900   : > { %v4205_v33 = vsub.f32 0.0, %v4204_v27  ;;  %v4230_v59 = vsel %vm4222_vm1, %v4725_v62, 0.0 }
 0x901   : > { %4231 = vadd.xlane.f32.xlu2 %v4230_v59 }
 0x902   : > { %v4206_v26 = vmul.f32 1.442695, %v4205_v33 }
 0x904   : > { %5020 = vpow2.f32 %v4206_v26 }
 0x90a   : > { %v5021_v61 = vpop.eup %5020 }
 0x90b   : > { %v4208_v49 = vadd.f32 1.0, %v5021_v61  ;;  %v4211_v20 = vmul.f32 -0.5, %v5021_v61  ;;  %v4214_v3 = vand.u32 2147483647, %v5021_v61 }
 0x90d   : > { %5022 = vlog2.f32 %v4208_v49  ;;  %v4212_v24 = vadd.f32 1.0, %v4211_v20  ;;  %vm4215_vm5 = vcmp.lt.f32.partialorder %v4214_v3, 0.0004427343 }
 0x90f   : > { %v4213_v19 = vmul.f32 %v5021_v61, %v4212_v24 }
 0x913   : > { %v5023_v6 = vpop.eup %5022 }
 0x914   : > { %v4210_v47 = vmul.f32 0.6931472, %v5023_v6 }
 0x916   : > { %v4216_v58 = vsel %vm4215_vm5, %v4213_v19, %v4210_v47 }
 0x917   : > { %v4217_v42 = vadd.f32 %v4216_v58, %v4203_v21 }
 0x919   : > { %v4223_v37 = vsel %vm4222_vm1, %v4217_v42, 0.0 }
 0x91a   : > { %4224 = vadd.xlane.f32.xlu1 %v4223_v37 }
 0x974   : > { %v4232_v22 = vpop.xlane.xlu2 %4231 }
 0x975   : > { %v4233_v55 = vadd.f32 %v4232_v22, %v4229_v7 }
 0x977   : > { %4234 = vst.msk [vmem:[#allocation7] sm:$0x1] %vm4227_vm6, %v4233_v55 }
 0x98c   : > { %4238 = sbr.rel (%p4726_p12) target bundleno = 2459 (0x99b), region = 56 }
 0x98d   : > { %v4225_v28 = vpop.xlane.xlu1 %4224 }
 0x98e   : > { %v4226_v30 = vadd.f32 %v4225_v28, %v4221_v10 }
 0x990   : > { %4228 = vst.msk [vmem:[#allocation5] sm:$0x1] %vm4227_vm6, %v4226_v30 }
 0x991   : > { %v4242_v15 = vld [vmem:[#allocation7] sm:$0x1] }
 0x992   : > { %v4243_v5 = vmul.f32 0.0078125, %v4242_v15 }
 0x994   : > { %4244 = vst.msk [vmem:[#allocation7] sm:$0x1] %vm4227_vm6, %v4243_v5 }
 0x997   : > { %v4239_v63 = vld [vmem:[#allocation5] sm:$0x1] }
 0x998   : > { %v4240_v0 = vmul.f32 0.0078125, %v4239_v63 }
 0x99a   : > { %4241 = vst.msk [vmem:[#allocation5] sm:$0x1] %vm4227_vm6, %v4240_v0 }
 0x99b PF: > { %s4270_s27 = sshll.u32 %s8598_s8, 4  ;;  %s5248_s29 = smov [#allocation5]   ;;  %s4271_s27 = int_to_ptr.hbm [resolvable:$true] %s4270_s27 }
 0x99c   : > { %s4268_s30 = sshll.u32 %s5248_s29, 4  ;;  %s4254_s18 = scalar_lea.hbm %s8597_s7, %s5324_s6  ;;  %s4269_s30 = int_to_ptr.vmem [resolvable:$true] %s4268_s30 }
 0x99d   : > { %4778 = dma.vmem_to_hbm [thread:$0]  (%p201_p2), %s4269_s30, 16, %s4271_s27, [#allocation6]  }
 0x99e   : > { %s4256_s23 = sshll.u32 %s5367_s10, 4  ;;  %s4258_s24 = sshll.u32 %s4254_s18, 4  ;;  %s4257_s23 = int_to_ptr.vmem [resolvable:$true] %s4256_s23  ;;  %s4259_s24 = int_to_ptr.hbm [resolvable:$true] %s4258_s24 }
 0x99f   : > { %s4246_s25 = scalar_lea.sflag [#allocation4], %s334_s22  ;;  %s5147_s26 = sshra.s32 %s4259_s24, 4  ;;  %s5148_s26 = int_to_ptr.hbm [resolvable:$true] %s5147_s26 }
 0x9a0   : > { %s5149_s28 = scalar_lea.hbm %s5148_s26, 1  ;;  %s5153_s27 = scalar_lea.hbm %s8597_s7, 2 }
 0x9a1   : > { %p5150_p13 = scmp.ne.s32.totalorder %s5148_s26, %s5149_s28  ;;  %p5154_p3 = scmp.lt.s32.totalorder %s5148_s26, %s8597_s7 }
 0x9a2   : > { %p5155_p4 = scmp.lt.s32.totalorder %s5153_s27, %s5149_s28 }
 0x9a3   : > { %p5151_p0 = pnand %p5150_p13, %p5343_p5 }
 0x9a4   : > { %p5156_p7 = por %p5155_p4, %p5154_p3 }
 0x9a5   : > { %p5152_p1 = pneg %p5151_p0 }
 0x9a7   : > { %p5157_p8 = pnand %p5156_p7, %p5152_p1 }
 0x9a9   : > { %5160 = shalt.err (!%p5157_p8)
}
 0x9aa   : > { %4776 = dma.vmem_to_hbm [thread:$0]  (%p5343_p5), %s4257_s23, 16, %s4259_s24, %s4246_s25  }
 0x9ab   : > { %s5249_s22 = smov [#allocation7]   ;;  %s4282_s0 = sshll.u32 %s8599_s9, 4  ;;  %s4283_s0 = int_to_ptr.hbm [resolvable:$true] %s4282_s0 }
 0x9ac   : > { %s4280_s10 = sshll.u32 %s5249_s22, 4  ;;  %s4281_s10 = int_to_ptr.vmem [resolvable:$true] %s4280_s10 }
 0x9ad   : > { %4780 = dma.vmem_to_hbm [thread:$0]  (%p201_p2), %s4281_s10, 16, %s4283_s0, [#allocation6]  }
 0x9ae   : > { %5206 = dma.done.wait (%p201_p2), [#allocation6], 32  }
 0x9af   : > { %5208 = vsyncadd (%p201_p2), [#allocation6], 4294967264 }
 0x9b0 PF: > { %p4794_p5 = scmp.ge.s32.totalorder %s5227_s14, 2  ;;  %s4304_s20 = sand.u32 1, %s5215_s11  }
 0x9b1   : > { %s4305_s23 = scalar_lea.sflag [#allocation4], %s4304_s20 }
 0x9b2   : > { %p4787_p9 = pnand %p4794_p5, %p5347_p6 }
 0x9b4   : > { %p4788_p10 = pneg %p4787_p9 }
 0x9b6   : > { %5210 = dma.done.wait (%p4788_p10), %s4305_s23, 16  }
 0x9b7   : > { %5212 = vsyncadd (%p4788_p10), %s4305_s23, 4294967280  ;;  %p23_p11 = scmp.ge.s32.totalorder %s5328_s16, 4   ;;  %s9311_s11 = smov %s5219_s12 }
 0x9b8   : > { %s9312_s12 = smov %s5223_s13  ;;  %s9313_s13 = smov %s5339_s19 }
 0x9b9   : > { %s9314_s14 = smov %s5328_s16  ;;  %25 = sbr.rel (!%p23_p11) target bundleno = 7 (0x7), region = 110 }
 0x9be   :  { %4310 = vsyncpa [#allocation4], 1 }
 0x9bf   :  { %4312 = vsyncpa [#allocation4 + $0x1], 1 }
 0x9c0   :  { %4313 = vsyncpa [#allocation6], 1 }

</bundles_post_ra>
